<compile_context>
chip_gen: v5e
topology: v5e:2x2
jax: 0.10.0
libtpu: 0.0.40
codegen_flags: <defaults>
</compile_context>

<pallas_src>
import jax
import jax.numpy as jnp
from jax.experimental import pallas as pl
from jax.experimental.pallas import tpu as pltpu


def _se_kernel(x_ref, s_ref, w1_ref, b1_ref, w2_ref, b2_ref, o_ref):
    # x_ref : [Cin, HW]   f32   feature map (x140), native NCHW flattening
    # s_ref : [Cin, 1]    f32   squeeze vector (x141)
    # w1_ref: [Cmid, Cin] bf16  conv2d48 weight, PyTorch orientation (no transpose)
    # b1_ref: [Cmid, 1]   f32
    # w2_ref: [Cin, Cmid] bf16  conv2d49 weight, PyTorch orientation (no transpose)
    # b2_ref: [Cin, 1]    f32
    # o_ref : [Cin, HW]   f32
    #
    # bf16 weights go straight to the MXU; only the tiny vectors are cast.
    s = s_ref[...].astype(jnp.bfloat16)

    # conv2d48 (1x1) == W1 @ s_col, f32 accumulate, then bias + ReLU.
    h = jnp.dot(w1_ref[...], s, preferred_element_type=jnp.float32) + b1_ref[...]
    h = jnp.maximum(h, 0.0).astype(jnp.bfloat16)

    # conv2d49 (1x1) == W2 @ h, f32 accumulate, then bias + Hardsigmoid.
    g = jnp.dot(w2_ref[...], h, preferred_element_type=jnp.float32) + b2_ref[...]
    g = jnp.clip(g * (1.0 / 6.0) + 0.5, 0.0, 1.0)

    # Per-channel gate [Cin, 1] lane-broadcasts over HW; single VPU multiply.
    o_ref[...] = x_ref[...] * g


def prepare_params(w1, b1, w2, b2):
    """One-time (model-load) parameter prep: drop the 1x1 spatial dims, keep the
    PyTorch [C_out, C_in] orientation (no transposes), store big weights in bf16."""
    cmid, cin = w1.shape[0], w1.shape[1]
    return (
        w1.reshape(cmid, cin).astype(jnp.bfloat16),   # [Cmid, Cin]
        b1.reshape(cmid, 1).astype(jnp.float32),      # [Cmid, 1]
        w2.reshape(cin, cmid).astype(jnp.bfloat16),   # [Cin, Cmid]
        b2.reshape(cin, 1).astype(jnp.float32),       # [Cin, 1]
    )


@jax.jit
def se_block(x141, x140, w1, b1, w2, b2):
    """x141: [1, Cin, 1, 1], x140: [1, Cin, H, W] (NCHW). w1/b1/w2/b2 from prepare_params."""
    n, cin, h, w = x140.shape  # module spec has n == 1
    cmid = w1.shape[0]
    hw = h * w

    x = x140.reshape(cin, hw)   # native NCHW flattening — no transpose
    s = x141.reshape(cin, 1)

    vmem = pl.BlockSpec(memory_space=pltpu.MemorySpace.VMEM)
    cost = pl.CostEstimate(
        flops=2 * 2 * cin * cmid + cin * hw,
        transcendentals=0,
        bytes_accessed=(2 * cin * hw * 4          # x in + fresh out
                        + 2 * cin * cmid * 2      # both weights (bf16)
                        + (cin + cmid) * 4        # biases
                        + cin * 4),               # squeeze vector
    )

    out = pl.pallas_call(
        _se_kernel,
        out_shape=jax.ShapeDtypeStruct((cin, hw), jnp.float32),
        in_specs=[vmem] * 6,
        out_specs=vmem,
        cost_estimate=cost,
        # Single shot, no grid / dimension_semantics: the whole problem (~0.7 MB)
        # fits VMEM on every generation; splitting it would cost more than the work.
    )(x, s, w1, b1, w2, b2)

    return out.reshape(n, cin, h, w)   # back to NCHW — still no transpose


def _init_params(key, cin=672, cmid=168):
    # Deterministic init matching PyTorch Conv2d default (uniform +/- 1/sqrt(fan_in)).
    k1, k2, k3, k4 = jax.random.split(key, 4)
    bnd1 = 1.0 / (cin ** 0.5)
    bnd2 = 1.0 / (cmid ** 0.5)
    w1 = jax.random.uniform(k1, (cmid, cin, 1, 1), jnp.float32, -bnd1, bnd1)
    b1 = jax.random.uniform(k2, (cmid,), jnp.float32, -bnd1, bnd1)
    w2 = jax.random.uniform(k3, (cin, cmid, 1, 1), jnp.float32, -bnd2, bnd2)
    b2 = jax.random.uniform(k4, (cin,), jnp.float32, -bnd2, bnd2)
    return w1, b1, w2, b2


def _reference(x141, x140, w1_p, b1_p, w2_p, b2_p):
    # Pure-JAX reference of the PyTorch forward, mirroring the kernel's dtype flow
    # (bf16 weights/vectors, f32 accumulation) so the comparison stays tight.
    cin = x140.shape[1]
    s = x141.reshape(cin, 1).astype(jnp.bfloat16)
    h = jnp.dot(w1_p, s, preferred_element_type=jnp.float32) + b1_p
    h = jnp.maximum(h, 0.0).astype(jnp.bfloat16)
    g = jnp.dot(w2_p, h, preferred_element_type=jnp.float32) + b2_p
    g = jnp.clip(g * (1.0 / 6.0) + 0.5, 0.0, 1.0)
    return x140 * g.reshape(1, cin, 1, 1)


if __name__ == "__main__":
    key = jax.random.PRNGKey(0)
    kx1, kx2, kp = jax.random.split(key, 3)

    N, Cin, Cmid, H, W = 1, 672, 168, 7, 7
    x140 = jax.random.normal(kx1, (N, Cin, H, W), jnp.float32)
    x141 = jax.random.normal(kx2, (N, Cin, 1, 1), jnp.float32)
    w1, b1, w2, b2 = _init_params(kp, Cin, Cmid)
    params = prepare_params(w1, b1, w2, b2)   # one-time weight prep (no per-call cost)

    out = se_block(x141, x140, *params)
    out = jax.block_until_ready(out)

    ref = _reference(x141, x140, *params)
    assert out.shape == (N, Cin, H, W)
    err = float(jnp.max(jnp.abs(out - ref)))
    assert jnp.allclose(out, ref, atol=1e-4, rtol=1e-4), err

    print("KERNEL_OK")
</pallas_src>

<mosaic_0001>
module attributes {stable_mosaic.version = 11 : i64} {
  func.func @_se_kernel(%arg0: memref<672x49xf32, #tpu.memory_space<vmem>>, %arg1: memref<672x1xf32, #tpu.memory_space<vmem>>, %arg2: memref<168x672xbf16, #tpu.memory_space<vmem>>, %arg3: memref<168x1xf32, #tpu.memory_space<vmem>>, %arg4: memref<672x168xbf16, #tpu.memory_space<vmem>>, %arg5: memref<672x1xf32, #tpu.memory_space<vmem>>, %arg6: memref<672x49xf32, #tpu.memory_space<vmem>>) attributes {dimension_semantics = [], scalar_prefetch = 0 : i64, scratch_operands = 0 : i64, tpu.core_type = #tpu.core_type<tc>} {
    %c0 = arith.constant 0 : index
    %c0_0 = arith.constant 0 : index
    %0 = vector.load %arg1[%c0, %c0_0] : memref<672x1xf32, #tpu.memory_space<vmem>>, vector<672x1xf32>
    %1 = arith.truncf %0 : vector<672x1xf32> to vector<672x1xbf16>
    %c0_1 = arith.constant 0 : index
    %c0_2 = arith.constant 0 : index
    %2 = vector.load %arg2[%c0_1, %c0_2] : memref<168x672xbf16, #tpu.memory_space<vmem>>, vector<168x672xbf16>
    %cst = arith.constant dense<0.000000e+00> : vector<168x1xf32>
    %3 = tpu.matmul %2, %1, %cst {dimension_numbers = #tpu.dot_dimension_numbers<[1], [0], [0], [1], [0, 0, 1, 1], [], []>} : vector<168x672xbf16>, vector<672x1xbf16>, vector<168x1xf32> -> vector<168x1xf32>
    %c0_3 = arith.constant 0 : index
    %c0_4 = arith.constant 0 : index
    %4 = vector.load %arg3[%c0_3, %c0_4] : memref<168x1xf32, #tpu.memory_space<vmem>>, vector<168x1xf32>
    %5 = arith.addf %3, %4 : vector<168x1xf32>
    %cst_5 = arith.constant 0.000000e+00 : f32
    %6 = vector.broadcast %cst_5 : f32 to vector<168x1xf32>
    %7 = arith.maximumf %5, %6 : vector<168x1xf32>
    %8 = arith.truncf %7 : vector<168x1xf32> to vector<168x1xbf16>
    %c0_6 = arith.constant 0 : index
    %c0_7 = arith.constant 0 : index
    %9 = vector.load %arg4[%c0_6, %c0_7] : memref<672x168xbf16, #tpu.memory_space<vmem>>, vector<672x168xbf16>
    %cst_8 = arith.constant dense<0.000000e+00> : vector<672x1xf32>
    %10 = tpu.matmul %9, %8, %cst_8 {dimension_numbers = #tpu.dot_dimension_numbers<[1], [0], [0], [1], [0, 0, 1, 1], [], []>} : vector<672x168xbf16>, vector<168x1xbf16>, vector<672x1xf32> -> vector<672x1xf32>
    %c0_9 = arith.constant 0 : index
    %c0_10 = arith.constant 0 : index
    %11 = vector.load %arg5[%c0_9, %c0_10] : memref<672x1xf32, #tpu.memory_space<vmem>>, vector<672x1xf32>
    %12 = arith.addf %10, %11 : vector<672x1xf32>
    %cst_11 = arith.constant 0.166666672 : f32
    %13 = vector.broadcast %cst_11 : f32 to vector<672x1xf32>
    %14 = arith.mulf %12, %13 : vector<672x1xf32>
    %cst_12 = arith.constant 5.000000e-01 : f32
    %15 = vector.broadcast %cst_12 : f32 to vector<672x1xf32>
    %16 = arith.addf %14, %15 : vector<672x1xf32>
    %cst_13 = arith.constant 0.000000e+00 : f32
    %cst_14 = arith.constant 1.000000e+00 : f32
    %17 = vector.broadcast %cst_13 : f32 to vector<672x1xf32>
    %18 = arith.maximumf %17, %16 : vector<672x1xf32>
    %19 = vector.broadcast %cst_14 : f32 to vector<672x1xf32>
    %20 = arith.minimumf %19, %18 : vector<672x1xf32>
    %c0_15 = arith.constant 0 : index
    %c0_16 = arith.constant 0 : index
    %21 = vector.load %arg0[%c0_15, %c0_16] : memref<672x49xf32, #tpu.memory_space<vmem>>, vector<672x49xf32>
    %22 = vector.broadcast %20 : vector<672x1xf32> to vector<672x49xf32>
    %23 = arith.mulf %21, %22 : vector<672x49xf32>
    %c0_17 = arith.constant 0 : index
    %c0_18 = arith.constant 0 : index
    %24 = vector.load %arg6[%c0_17, %c0_18] : memref<672x49xf32, #tpu.memory_space<vmem>>, vector<672x49xf32>
    tpu.vector_store %arg6[%c0_17, %c0_18], %23 {strides = array<i32>} : memref<672x49xf32, #tpu.memory_space<vmem>>, vector<672x49xf32>,
    return
  }
}

</mosaic_0001>

<bundles_post_ra>
// kernel: se_block.1
= control target key start
LH: loop header
LB: loop body
LE: loop exit
PB: predicated region body
PF: predicated region fallthrough
CT: control target
= control target key end

     0   :  { %vm544_vm0 = vcmask 261120   ;;  %vm1661_vm1 = vcmask 1043456   ;;  %vm1534_vm2 = vcmask 326656   ;;  %vm3027_vm3 = vcmask 400384   ;;  %s6325_s1 = inlined_call_operand.vmem [shape: f32[672,1], index: 1, kind: input, shape index: {}]   ;;  %s6326_s2 = inlined_call_operand.vmem [shape: bf16[168,672], index: 2, kind: input, shape index: {}]   ;;  %s6327_s3 = inlined_call_operand.vmem [shape: f32[168,1], index: 3, kind: input, shape index: {}]   ;;  %s6328_s4 = inlined_call_operand.vmem [shape: bf16[672,168], index: 4, kind: input, shape index: {}]   ;;  %s6329_s5 = inlined_call_operand.vmem [shape: f32[672,1], index: 5, kind: input, shape index: {}]   ;;  %s6330_s0 = inlined_call_operand.vmem [shape: f32[672,49], index: 0, kind: input, shape index: {}]   ;;  %s6331_s6 = inlined_call_operand.vmem [shape: f32[672,49], index: 6, kind: output, shape index: {}]  }
   0x1   :  { %v38_v0 = vld [vmem:[%s6325_s1 + $0x70] sm:$0xff]  ;;  %v39_v1 = vld [vmem:[%s6325_s1 + $0x78] sm:$0xff]  ;;  %v36_v11 = vld [vmem:[%s6325_s1 + $0x60] sm:$0xff] }
   0x2   :  { %v54_v2 = vld [vmem:[%s6325_s1 + $0xf0] sm:$0xff]  ;;  %v115_v3 = vpack.c.bf16 %v39_v1, %v38_v0  ;;  %v55_v4 = vld [vmem:[%s6325_s1 + $0xf8] sm:$0xff]  ;;  %v37_v13 = vld [vmem:[%s6325_s1 + $0x68] sm:$0xff] }
   0x3   :  { %v70_v5 = vld [vmem:[%s6325_s1 + $0x170] sm:$0xff]  ;;  %v71_v6 = vld [vmem:[%s6325_s1 + $0x178] sm:$0xff]  ;;  %v123_v7 = vpack.c.bf16 %v55_v4, %v54_v2  ;;  %v52_v14 = vld [vmem:[%s6325_s1 + $0xe0] sm:$0xff]  ;;  %v114_v16 = vpack.c.bf16 %v37_v13, %v36_v11 }
   0x4   :  { %v131_v8 = vpack.c.bf16 %v71_v6, %v70_v5  ;;  %v86_v9 = vld [vmem:[%s6325_s1 + $0x1f0] sm:$0xff]  ;;  %v87_v10 = vld [vmem:[%s6325_s1 + $0x1f8] sm:$0xff]  ;;  %578 = vmatpush.bf16.msra.mxu0 %v115_v3  ;;  %v53_v15 = vld [vmem:[%s6325_s1 + $0xe8] sm:$0xff] }
   0x5   :  { %v139_v12 = vpack.c.bf16 %v87_v10, %v86_v9  ;;  %641 = vmatpush.bf16.msra.mxu1 %v123_v7  ;;  %v122_v17 = vpack.c.bf16 %v53_v15, %v52_v14  ;;  %v68_v18 = vld [vmem:[%s6325_s1 + $0x160] sm:$0xff]  ;;  %v69_v19 = vld [vmem:[%s6325_s1 + $0x168] sm:$0xff]  ;;  %v34_v23 = vld [vmem:[%s6325_s1 + $0x50] sm:$0xff] }
   0x6   :  { %704 = vmatpush.bf16.msra.mxu2 %v131_v8  ;;  %v84_v20 = vld [vmem:[%s6325_s1 + $0x1e0] sm:$0xff]  ;;  %v130_v21 = vpack.c.bf16 %v69_v19, %v68_v18  ;;  %v85_v22 = vld [vmem:[%s6325_s1 + $0x1e8] sm:$0xff]  ;;  %v35_v24 = vld [vmem:[%s6325_s1 + $0x58] sm:$0xff] }
   0x7   :  { %767 = vmatpush.bf16.msra.mxu3 %v139_v12  ;;  %v138_v25 = vpack.c.bf16 %v85_v22, %v84_v20  ;;  %v50_v26 = vld [vmem:[%s6325_s1 + $0xd0] sm:$0xff]  ;;  %v51_v27 = vld [vmem:[%s6325_s1 + $0xd8] sm:$0xff]  ;;  %v113_v29 = vpack.c.bf16 %v35_v24, %v34_v23  ;;  %v32_v35 = vld [vmem:[%s6325_s1 + $0x40] sm:$0xff] }
   0x8   :  { %v66_v28 = vld [vmem:[%s6325_s1 + $0x150] sm:$0xff]  ;;  %579 = vmatpush.bf16.msra.mxu0 %v114_v16  ;;  %v67_v30 = vld [vmem:[%s6325_s1 + $0x158] sm:$0xff]  ;;  %v121_v33 = vpack.c.bf16 %v51_v27, %v50_v26  ;;  %v33_v36 = vld [vmem:[%s6325_s1 + $0x48] sm:$0xff] }
   0x9   :  { %v82_v31 = vld [vmem:[%s6325_s1 + $0x1d0] sm:$0xff]  ;;  %v83_v32 = vld [vmem:[%s6325_s1 + $0x1d8] sm:$0xff]  ;;  %642 = vmatpush.bf16.msra.mxu1 %v122_v17  ;;  %v129_v34 = vpack.c.bf16 %v67_v30, %v66_v28  ;;  %v48_v37 = vld [vmem:[%s6325_s1 + $0xc0] sm:$0xff]  ;;  %v112_v44 = vpack.c.bf16 %v33_v36, %v32_v35 }
   0xa   :  { %705 = vmatpush.bf16.msra.mxu2 %v130_v21  ;;  %v137_v38 = vpack.c.bf16 %v83_v32, %v82_v31  ;;  %v49_v39 = vld [vmem:[%s6325_s1 + $0xc8] sm:$0xff]  ;;  %v64_v40 = vld [vmem:[%s6325_s1 + $0x140] sm:$0xff]  ;;  %v30_v47 = vld [vmem:[%s6325_s1 + $0x30] sm:$0xff] }
   0xb   :  { %768 = vmatpush.bf16.msra.mxu3 %v138_v25  ;;  %v65_v41 = vld [vmem:[%s6325_s1 + $0x148] sm:$0xff]  ;;  %v80_v42 = vld [vmem:[%s6325_s1 + $0x1c0] sm:$0xff]  ;;  %v120_v45 = vpack.c.bf16 %v49_v39, %v48_v37  ;;  %v31_v48 = vld [vmem:[%s6325_s1 + $0x38] sm:$0xff] }
   0xc   :  { %v81_v43 = vld [vmem:[%s6325_s1 + $0x1c8] sm:$0xff]  ;;  %580 = vmatpush.bf16.msra.mxu0 %v113_v29  ;;  %v128_v46 = vpack.c.bf16 %v65_v41, %v64_v40  ;;  %v46_v49 = vld [vmem:[%s6325_s1 + $0xb0] sm:$0xff]  ;;  %v47_v51 = vld [vmem:[%s6325_s1 + $0xb8] sm:$0xff]  ;;  %v111_v56 = vpack.c.bf16 %v31_v48, %v30_v47 }
   0xd   :  { %643 = vmatpush.bf16.msra.mxu1 %v121_v33  ;;  %v136_v50 = vpack.c.bf16 %v81_v43, %v80_v42  ;;  %v62_v52 = vld [vmem:[%s6325_s1 + $0x130] sm:$0xff]  ;;  %v63_v53 = vld [vmem:[%s6325_s1 + $0x138] sm:$0xff]  ;;  %v119_v57 = vpack.c.bf16 %v47_v51, %v46_v49  ;;  %v28_v59 = vld [vmem:[%s6325_s1 + $0x20] sm:$0xff] }
   0xe   :  { %706 = vmatpush.bf16.msra.mxu2 %v129_v34  ;;  %v78_v54 = vld [vmem:[%s6325_s1 + $0x1b0] sm:$0xff]  ;;  %v79_v55 = vld [vmem:[%s6325_s1 + $0x1b8] sm:$0xff]  ;;  %v127_v58 = vpack.c.bf16 %v63_v53, %v62_v52  ;;  %v29_v60 = vld [vmem:[%s6325_s1 + $0x28] sm:$0xff] }
   0xf   :  { %769 = vmatpush.bf16.msra.mxu3 %v137_v38  ;;  %v44_v61 = vld [vmem:[%s6325_s1 + $0xa0] sm:$0xff]  ;;  %v135_v62 = vpack.c.bf16 %v79_v55, %v78_v54  ;;  %v45_v63 = vld [vmem:[%s6325_s1 + $0xa8] sm:$0xff]  ;;  %v110_v4 = vpack.c.bf16 %v29_v60, %v28_v59  ;;  %v26_v7 = vld [vmem:[%s6325_s1 + $0x10] sm:$0xff] }
  0x10   :  { %581 = vmatpush.bf16.msra.mxu0 %v112_v44  ;;  %v60_v0 = vld [vmem:[%s6325_s1 + $0x120] sm:$0xff]  ;;  %v61_v1 = vld [vmem:[%s6325_s1 + $0x128] sm:$0xff]  ;;  %v118_v5 = vpack.c.bf16 %v45_v63, %v44_v61  ;;  %v27_v8 = vld [vmem:[%s6325_s1 + $0x18] sm:$0xff] }
  0x11   :  { %644 = vmatpush.bf16.msra.mxu1 %v120_v45  ;;  %v76_v2 = vld [vmem:[%s6325_s1 + $0x1a0] sm:$0xff]  ;;  %v77_v3 = vld [vmem:[%s6325_s1 + $0x1a8] sm:$0xff]  ;;  %v126_v6 = vpack.c.bf16 %v61_v1, %v60_v0  ;;  %v42_v9 = vld [vmem:[%s6325_s1 + $0x90] sm:$0xff]  ;;  %v109_v16 = vpack.c.bf16 %v27_v8, %v26_v7 }
  0x12   :  { %707 = vmatpush.bf16.msra.mxu2 %v128_v46  ;;  %v134_v10 = vpack.c.bf16 %v77_v3, %v76_v2  ;;  %v43_v11 = vld [vmem:[%s6325_s1 + $0x98] sm:$0xff]  ;;  %v58_v12 = vld [vmem:[%s6325_s1 + $0x110] sm:$0xff]  ;;  %v24_v19 = vld [vmem:[%s6325_s1] sm:$0xff] }
  0x13   :  { %770 = vmatpush.bf16.msra.mxu3 %v136_v50  ;;  %v59_v13 = vld [vmem:[%s6325_s1 + $0x118] sm:$0xff]  ;;  %v74_v14 = vld [vmem:[%s6325_s1 + $0x190] sm:$0xff]  ;;  %v117_v17 = vpack.c.bf16 %v43_v11, %v42_v9  ;;  %v25_v20 = vld [vmem:[%s6325_s1 + $0x8] sm:$0xff] }
  0x14   :  { %582 = vmatpush.bf16.msra.mxu0 %v111_v56  ;;  %v75_v15 = vld [vmem:[%s6325_s1 + $0x198] sm:$0xff]  ;;  %v125_v18 = vpack.c.bf16 %v59_v13, %v58_v12  ;;  %v40_v21 = vld [vmem:[%s6325_s1 + $0x80] sm:$0xff]  ;;  %v41_v23 = vld [vmem:[%s6325_s1 + $0x88] sm:$0xff]  ;;  %v108_v28 = vpack.c.bf16 %v25_v20, %v24_v19 }
  0x15   :  { %645 = vmatpush.bf16.msra.mxu1 %v119_v57  ;;  %v133_v22 = vpack.c.bf16 %v75_v15, %v74_v14  ;;  %v56_v24 = vld [vmem:[%s6325_s1 + $0x100] sm:$0xff]  ;;  %v57_v25 = vld [vmem:[%s6325_s1 + $0x108] sm:$0xff]  ;;  %v3748_v30 = vld [vmem:[%s6326_s2 + $0x14] sm:$0xf0]  ;;  %v116_v32 = vpack.c.bf16 %v41_v23, %v40_v21 }
  0x16   :  { %708 = vmatpush.bf16.msra.mxu2 %v127_v58  ;;  %v72_v26 = vld [vmem:[%s6325_s1 + $0x180] sm:$0xff]  ;;  %v73_v27 = vld [vmem:[%s6325_s1 + $0x188] sm:$0xff]  ;;  %v124_v33 = vpack.c.bf16 %v57_v25, %v56_v24  ;;  %v3120_v34 = vld [vmem:[%s6326_s2 + $0x18] sm:$0xf0] }
  0x17   :  { %771 = vmatpush.bf16.msra.mxu3 %v135_v62  ;;  %v3118_v29 = vld [vmem:[%s6326_s2] sm:$0xf]  ;;  %v3745_v31 = vld [vmem:[%s6326_s2 + $0x4] sm:$0xf]  ;;  %v3126_v35 = vld [vmem:[%s6326_s2 + $0x8] sm:$0xf]  ;;  %v132_v37 = vpack.c.bf16 %v73_v27, %v72_v26 }
  0x18   :  { %583 = vmatpush.bf16.msra.mxu0 %v110_v4  ;;  %v3749_v36 = vld [vmem:[%s6326_s2 + $0x1c] sm:$0xf0]  ;;  %v3746_v38 = vld [vmem:[%s6326_s2 + $0xc] sm:$0xf]  ;;  %v3128_v39 = vld [vmem:[%s6326_s2 + $0x20] sm:$0xf0]  ;;  %v3119_v40 = vor.u32 %v3748_v30, %v3118_v29  ;;  %v3123_v41 = vor.u32 %v3745_v31, %v3120_v34 }
  0x19   :  { %646 = vmatpush.bf16.msra.mxu1 %v118_v5  ;;  %v3127_v42 = vor.u32 %v3749_v36, %v3126_v35  ;;  %v3131_v43 = vor.u32 %v3746_v38, %v3128_v39  ;;  %v3142_v44 = vld [vmem:[%s6326_s2 + $0x30] sm:$0xf]  ;;  %v3754_v45 = vld [vmem:[%s6326_s2 + $0x44] sm:$0xf0]  ;;  %v3751_v46 = vld [vmem:[%s6326_s2 + $0x34] sm:$0xf] }
  0x1a   :  { %709 = vmatpush.bf16.msra.mxu2 %v126_v6  ;;  %v3144_v47 = vld [vmem:[%s6326_s2 + $0x48] sm:$0xf0]  ;;  %v3150_v48 = vld [vmem:[%s6326_s2 + $0x38] sm:$0xf]  ;;  %v3755_v49 = vld [vmem:[%s6326_s2 + $0x4c] sm:$0xf0]  ;;  %v3143_v52 = vor.u32 %v3754_v45, %v3142_v44 }
  0x1b   :  { %772 = vmatpush.bf16.msra.mxu3 %v134_v10  ;;  %v3752_v50 = vld [vmem:[%s6326_s2 + $0x3c] sm:$0xf]  ;;  %v3152_v51 = vld [vmem:[%s6326_s2 + $0x50] sm:$0xf0]  ;;  %v3147_v53 = vor.u32 %v3751_v46, %v3144_v47  ;;  %v3151_v54 = vor.u32 %v3755_v49, %v3150_v48  ;;  %v3166_v56 = vld [vmem:[%s6326_s2 + $0x60] sm:$0xf] }
  0x1c   :  { %584 = vmatpush.bf16.msra.mxu0 %v109_v16  ;;  %v3155_v55 = vor.u32 %v3752_v50, %v3152_v51  ;;  %v3760_v57 = vld [vmem:[%s6326_s2 + $0x74] sm:$0xf0]  ;;  %v3757_v58 = vld [vmem:[%s6326_s2 + $0x64] sm:$0xf]  ;;  %v3168_v59 = vld [vmem:[%s6326_s2 + $0x78] sm:$0xf0] }
  0x1d   :  { %647 = vmatpush.bf16.msra.mxu1 %v117_v17  ;;  %v3174_v60 = vld [vmem:[%s6326_s2 + $0x68] sm:$0xf]  ;;  %v3761_v61 = vld [vmem:[%s6326_s2 + $0x7c] sm:$0xf0]  ;;  %v3758_v62 = vld [vmem:[%s6326_s2 + $0x6c] sm:$0xf]  ;;  %v3167_v0 = vor.u32 %v3760_v57, %v3166_v56  ;;  %v3171_v1 = vor.u32 %v3757_v58, %v3168_v59 }
  0x1e   :  { %710 = vmatpush.bf16.msra.mxu2 %v125_v18  ;;  %v3176_v63 = vld [vmem:[%s6326_s2 + $0x80] sm:$0xf0]  ;;  %v3175_v2 = vor.u32 %v3761_v61, %v3174_v60  ;;  %v3190_v4 = vld [vmem:[%s6326_s2 + $0x90] sm:$0xf]  ;;  %v3766_v5 = vld [vmem:[%s6326_s2 + $0xa4] sm:$0xf0] }
  0x1f   :  { %773 = vmatpush.bf16.msra.mxu3 %v133_v22  ;;  %v3179_v3 = vor.u32 %v3758_v62, %v3176_v63  ;;  %v3763_v6 = vld [vmem:[%s6326_s2 + $0x94] sm:$0xf]  ;;  %v3192_v7 = vld [vmem:[%s6326_s2 + $0xa8] sm:$0xf0]  ;;  %v3198_v8 = vld [vmem:[%s6326_s2 + $0x98] sm:$0xf]  ;;  %v3191_v12 = vor.u32 %v3766_v5, %v3190_v4 }
  0x20   :  { %585 = vmatpush.bf16.msra.mxu0 %v108_v28  ;;  %v3767_v9 = vld [vmem:[%s6326_s2 + $0xac] sm:$0xf0]  ;;  %v3764_v10 = vld [vmem:[%s6326_s2 + $0x9c] sm:$0xf]  ;;  %v3200_v11 = vld [vmem:[%s6326_s2 + $0xb0] sm:$0xf0]  ;;  %v3195_v13 = vor.u32 %v3763_v6, %v3192_v7 }
  0x21   :  { %648 = vmatpush.bf16.msra.mxu1 %v116_v32  ;;  %v3199_v14 = vor.u32 %v3767_v9, %v3198_v8  ;;  %v3203_v15 = vor.u32 %v3764_v10, %v3200_v11  ;;  %v3214_v16 = vld [vmem:[%s6326_s2 + $0xc0] sm:$0xf]  ;;  %v3772_v17 = vld [vmem:[%s6326_s2 + $0xd4] sm:$0xf0]  ;;  %v3769_v18 = vld [vmem:[%s6326_s2 + $0xc4] sm:$0xf] }
  0x22   :  { %711 = vmatpush.bf16.msra.mxu2 %v124_v33  ;;  %v3216_v19 = vld [vmem:[%s6326_s2 + $0xd8] sm:$0xf0]  ;;  %v3222_v20 = vld [vmem:[%s6326_s2 + $0xc8] sm:$0xf]  ;;  %v3773_v21 = vld [vmem:[%s6326_s2 + $0xdc] sm:$0xf0]  ;;  %v3215_v24 = vor.u32 %v3772_v17, %v3214_v16 }
  0x23   :  { %774 = vmatpush.bf16.msra.mxu3 %v132_v37  ;;  %586 = vmatmul.bf16.vlgmr.msra.gmra.mxu0 %v3119_v40  ;;  %v3770_v22 = vld [vmem:[%s6326_s2 + $0xcc] sm:$0xf]  ;;  %v3224_v23 = vld [vmem:[%s6326_s2 + $0xe0] sm:$0xf0]  ;;  %v3219_v25 = vor.u32 %v3769_v18, %v3216_v19  ;;  %v3223_v26 = vor.u32 %v3773_v21, %v3222_v20  ;;  %v3238_v28 = vld [vmem:[%s6326_s2 + $0xf0] sm:$0xf] }
  0x24   :  { %649 = vmatmul.bf16.vlgmr.msra.gmra.mxu1 %v3123_v41  ;;  %v3227_v27 = vor.u32 %v3770_v22, %v3224_v23  ;;  %v3778_v29 = vld [vmem:[%s6326_s2 + $0x104] sm:$0xf0]  ;;  %v3775_v30 = vld [vmem:[%s6326_s2 + $0xf4] sm:$0xf]  ;;  %v3240_v31 = vld [vmem:[%s6326_s2 + $0x108] sm:$0xf0] }
  0x25   :  { %712 = vmatmul.bf16.vlgmr.msra.gmra.mxu2 %v3127_v42  ;;  %v3246_v32 = vld [vmem:[%s6326_s2 + $0xf8] sm:$0xf]  ;;  %v3779_v33 = vld [vmem:[%s6326_s2 + $0x10c] sm:$0xf0]  ;;  %v3776_v34 = vld [vmem:[%s6326_s2 + $0xfc] sm:$0xf]  ;;  %v3239_v36 = vor.u32 %v3778_v29, %v3238_v28  ;;  %v3243_v37 = vor.u32 %v3775_v30, %v3240_v31 }
  0x26   :  { %775 = vmatmul.bf16.vlgmr.msra.gmra.mxu3 %v3131_v43  ;;  %v3248_v35 = vld [vmem:[%s6326_s2 + $0x110] sm:$0xf0]  ;;  %v3247_v38 = vor.u32 %v3779_v33, %v3246_v32  ;;  %v3262_v40 = vld [vmem:[%s6326_s2 + $0x120] sm:$0xf]  ;;  %v3784_v41 = vld [vmem:[%s6326_s2 + $0x134] sm:$0xf0] }
  0x27   :  { %v3251_v39 = vor.u32 %v3776_v34, %v3248_v35  ;;  %v3781_v42 = vld [vmem:[%s6326_s2 + $0x124] sm:$0xf]  ;;  %v3264_v43 = vld [vmem:[%s6326_s2 + $0x138] sm:$0xf0]  ;;  %v3270_v44 = vld [vmem:[%s6326_s2 + $0x128] sm:$0xf]  ;;  %v3263_v48 = vor.u32 %v3784_v41, %v3262_v40 }
  0x28   :  { %v3785_v45 = vld [vmem:[%s6326_s2 + $0x13c] sm:$0xf0]  ;;  %v3782_v46 = vld [vmem:[%s6326_s2 + $0x12c] sm:$0xf]  ;;  %v3272_v47 = vld [vmem:[%s6326_s2 + $0x140] sm:$0xf0]  ;;  %v3267_v49 = vor.u32 %v3781_v42, %v3264_v43 }
  0x29   :  { %v3271_v50 = vor.u32 %v3785_v45, %v3270_v44  ;;  %v3275_v51 = vor.u32 %v3782_v46, %v3272_v47  ;;  %v3294_v56 = vld [vmem:[%s6326_s2 + $0x158] sm:$0xf]  ;;  %v3791_v57 = vld [vmem:[%s6326_s2 + $0x16c] sm:$0xf0]  ;;  %v3788_v58 = vld [vmem:[%s6326_s2 + $0x15c] sm:$0xf] }
  0x2a   :  { %v3296_v59 = vld [vmem:[%s6326_s2 + $0x170] sm:$0xf0]  ;;  %v3295_v62 = vor.u32 %v3791_v57, %v3294_v56  ;;  %v101_v4 = vld [vmem:[%s6325_s1 + $0x268] sm:$0xff]  ;;  %v99_v7 = vld [vmem:[%s6325_s1 + $0x258] sm:$0xff] }
  0x2b   :  { %v3299_v63 = vor.u32 %v3788_v58, %v3296_v59  ;;  %v98_v6 = vld [vmem:[%s6325_s1 + $0x250] sm:$0xff]  ;;  %v3310_v8 = vld [vmem:[%s6326_s2 + $0x180] sm:$0xf]  ;;  %v3796_v11 = vld [vmem:[%s6326_s2 + $0x194] sm:$0xf0] }
  0x2c   :  { %v145_v9 = vpack.c.bf16 %v99_v7, %v98_v6  ;;  %v213_v10 = vld [vmem:[%s6327_s3] sm:$0xff]  ;;  %v3794_v16 = vld [vmem:[%s6326_s2 + $0x18c] sm:$0xf]  ;;  %v3311_v20 = vor.u32 %v3796_v11, %v3310_v8  ;;  %v94_v28 = vld [vmem:[%s6325_s1 + $0x230] sm:$0xff] }
  0x2d   :  { %v3320_v17 = vld [vmem:[%s6326_s2 + $0x1a0] sm:$0xf0]  ;;  %v97_v19 = vld [vmem:[%s6325_s1 + $0x248] sm:$0xff]  ;;  %v95_v29 = vld [vmem:[%s6325_s1 + $0x238] sm:$0xff] }
  0x2e   :  { %v96_v18 = vld [vmem:[%s6325_s1 + $0x240] sm:$0xff]  ;;  %v143_v31 = vpack.c.bf16 %v95_v29, %v94_v28  ;;  %v214_v32 = vld [vmem:[%s6327_s3 + $0x8] sm:$0xff]  ;;  %v106_v43 = vld [vmem:[%s6325_s1 + $0x290] sm:$0xff] }
  0x2f   :  { %v144_v21 = vpack.c.bf16 %v97_v19, %v96_v18  ;;  %v92_v33 = vld [vmem:[%s6325_s1 + $0x220] sm:$0xff]  ;;  %v93_v34 = vld [vmem:[%s6325_s1 + $0x228] sm:$0xff]  ;;  %v107_v44 = vld [vmem:[%s6325_s1 + $0x298] sm:$0xff] }
  0x30   :  { %v90_v45 = vld [vmem:[%s6325_s1 + $0x210] sm:$0xff]  ;;  %v3800_v57 = vld [vmem:[%s6326_s2 + $0x1bc] sm:$0xf]  ;;  %v88_v59 = vld [vmem:[%s6325_s1 + $0x200] sm:$0xff] }
  0x31   :  { %v3334_v47 = vld [vmem:[%s6326_s2 + $0x1b0] sm:$0xf]  ;;  %v3344_v58 = vld [vmem:[%s6326_s2 + $0x1d0] sm:$0xf0]  ;;  %v216_v11 = vld [vmem:[%s6327_s3 + $0x18] sm:$0xff] }
  0x32   :  { %v3803_v56 = vld [vmem:[%s6326_s2 + $0x1cc] sm:$0xf0]  ;;  %v211_v19 = vld [vmem:[%s6326_s2 + $0x1e8] sm:$0xff] }
  0x33   :  { %591 = vmatmul.bf16.gmra.mxu0 %v3143_v52  ;;  %v3286_v52 = vld [vmem:[%s6326_s2 + $0x150] sm:$0xf] }
  0x34   :  { %654 = vmatmul.bf16.gmra.mxu1 %v3147_v53  ;;  %v3790_v53 = vld [vmem:[%s6326_s2 + $0x164] sm:$0xf0] }
  0x35   :  { %717 = vmatmul.bf16.gmra.mxu2 %v3151_v54  ;;  %v3787_v54 = vld [vmem:[%s6326_s2 + $0x154] sm:$0xf]  ;;  %v3287_v60 = vor.u32 %v3790_v53, %v3286_v52  ;;  %v3336_v53 = vld [vmem:[%s6326_s2 + $0x1c8] sm:$0xf0] }
  0x36   :  { %780 = vmatmul.bf16.gmra.mxu3 %v3155_v55  ;;  %v3288_v55 = vld [vmem:[%s6326_s2 + $0x168] sm:$0xf0]  ;;  %v3799_v52 = vld [vmem:[%s6326_s2 + $0x1b4] sm:$0xf] }
  0x37   :  { %v3291_v61 = vor.u32 %v3787_v54, %v3288_v55  ;;  %v3342_v54 = vld [vmem:[%s6326_s2 + $0x1b8] sm:$0xf] }
  0x43   :  { %596 = vmatmul.bf16.gmra.mxu0 %v3167_v0  ;;  %v102_v0 = vld [vmem:[%s6325_s1 + $0x270] sm:$0xff] }
  0x44   :  { %659 = vmatmul.bf16.gmra.mxu1 %v3171_v1  ;;  %v103_v1 = vld [vmem:[%s6325_s1 + $0x278] sm:$0xff] }
  0x45   :  { %722 = vmatmul.bf16.gmra.mxu2 %v3175_v2  ;;  %v147_v2 = vpack.c.bf16 %v103_v1, %v102_v0  ;;  %v105_v1 = vld [vmem:[%s6325_s1 + $0x288] sm:$0xff] }
  0x46   :  { %785 = vmatmul.bf16.gmra.mxu3 %v3179_v3  ;;  %v100_v3 = vld [vmem:[%s6325_s1 + $0x260] sm:$0xff] }
  0x47   :  { %830 = vmatpush.bf16.msrb.mxu0 %v147_v2  ;;  %v146_v5 = vpack.c.bf16 %v101_v4, %v100_v3  ;;  %v3339_v4 = vor.u32 %v3799_v52, %v3336_v53  ;;  %v219_v52 = vld [vmem:[%s6327_s3 + $0x30] sm:$0xff] }
  0x4b   :  { %831 = vmatpush.bf16.msrb.mxu0 %v146_v5  ;;  %v3343_v5 = vor.u32 %v3803_v56, %v3342_v54 }
  0x4f   :  { %832 = vmatpush.bf16.msrb.mxu0 %v145_v9  ;;  %v3347_v9 = vor.u32 %v3800_v57, %v3344_v58 }
  0x53   :  { %601 = vmatmul.bf16.gmra.mxu0 %v3191_v12  ;;  %v3793_v12 = vld [vmem:[%s6326_s2 + $0x184] sm:$0xf] }
  0x54   :  { %664 = vmatmul.bf16.gmra.mxu1 %v3195_v13  ;;  %v3312_v13 = vld [vmem:[%s6326_s2 + $0x198] sm:$0xf0]  ;;  %833 = vmatpush.bf16.msrb.mxu0 %v144_v21 }
  0x55   :  { %727 = vmatmul.bf16.gmra.mxu2 %v3199_v14  ;;  %v3318_v14 = vld [vmem:[%s6326_s2 + $0x188] sm:$0xf]  ;;  %v3315_v23 = vor.u32 %v3793_v12, %v3312_v13 }
  0x56   :  { %790 = vmatmul.bf16.gmra.mxu3 %v3203_v15  ;;  %v3797_v15 = vld [vmem:[%s6326_s2 + $0x19c] sm:$0xf0] }
  0x58   :  { %834 = vmatpush.bf16.msrb.mxu0 %v143_v31 }
  0x63   :  { %606 = vmatmul.bf16.gmra.mxu0 %v3215_v24  ;;  %v3319_v24 = vor.u32 %v3797_v15, %v3318_v14 }
  0x64   :  { %669 = vmatmul.bf16.gmra.mxu1 %v3219_v25 }
  0x65   :  { %732 = vmatmul.bf16.gmra.mxu2 %v3223_v26 }
  0x66   :  { %795 = vmatmul.bf16.gmra.mxu3 %v3227_v27  ;;  %v3323_v27 = vor.u32 %v3794_v16, %v3320_v17  ;;  %v210_v16 = vld [vmem:[%s6326_s2 + $0x1e0] sm:$0xff] }
  0x73   :  { %611 = vmatmul.bf16.gmra.mxu0 %v3239_v36  ;;  %v142_v36 = vpack.c.bf16 %v93_v34, %v92_v33 }
  0x74   :  { %674 = vmatmul.bf16.gmra.mxu1 %v3243_v37 }
  0x75   :  { %737 = vmatmul.bf16.gmra.mxu2 %v3247_v38  ;;  %835 = vmatpush.bf16.msrb.mxu0 %v142_v36 }
  0x76   :  { %800 = vmatmul.bf16.gmra.mxu3 %v3251_v39 }
  0x83   :  { %616 = vmatmul.bf16.gmra.mxu0 %v3263_v48  ;;  %v3802_v48 = vld [vmem:[%s6326_s2 + $0x1c4] sm:$0xf0] }
  0x84   :  { %679 = vmatmul.bf16.gmra.mxu1 %v3267_v49  ;;  %v149_v49 = vpack.c.bf16 %v107_v44, %v106_v43 }
  0x85   :  { %742 = vmatmul.bf16.gmra.mxu2 %v3271_v50  ;;  %v91_v50 = vld [vmem:[%s6325_s1 + $0x218] sm:$0xff] }
  0x86   :  { %805 = vmatmul.bf16.gmra.mxu3 %v3275_v51  ;;  %v215_v51 = vld [vmem:[%s6327_s3 + $0x10] sm:$0xff]  ;;  %v141_v55 = vpack.c.bf16 %v91_v50, %v90_v45  ;;  %899 = vmatpush.bf16.msrb.mxu1 %v149_v49  ;;  %v3750_v49 = vld [vmem:[%s6326_s2 + $0x24] sm:$0xf0] }
  0x87   :  { %v3747_v50 = vld [vmem:[%s6326_s2 + $0x14] sm:$0xf] }
  0x88   :  { %836 = vmatpush.bf16.msrb.mxu0 %v141_v55 }
  0x93   :  { %621 = vmatmul.bf16.gmra.mxu0 %v3287_v60  ;;  %v89_v60 = vld [vmem:[%s6325_s1 + $0x208] sm:$0xff] }
  0x94   :  { %684 = vmatmul.bf16.gmra.mxu1 %v3291_v61  ;;  %v104_v61 = vld [vmem:[%s6325_s1 + $0x280] sm:$0xff]  ;;  %v140_v0 = vpack.c.bf16 %v89_v60, %v88_v59 }
  0x95   :  { %747 = vmatmul.bf16.gmra.mxu2 %v3295_v62  ;;  %v148_v6 = vpack.c.bf16 %v105_v1, %v104_v61  ;;  %v220_v61 = vld [vmem:[%s6327_s3 + $0x38] sm:$0xff] }
  0x96   :  { %810 = vmatmul.bf16.gmra.mxu3 %v3299_v63  ;;  %v3335_v63 = vor.u32 %v3802_v48, %v3334_v47  ;;  %837 = vmatpush.bf16.msrb.mxu0 %v140_v0  ;;  %v3134_v48 = vld [vmem:[%s6326_s2 + $0x10] sm:$0xf] }
  0x97   :  { %900 = vmatpush.bf16.msrb.mxu1 %v148_v6  ;;  %v3135_v54 = vor.u32 %v3750_v49, %v3134_v48 }
  0xa0   :  { %v587_v22 = vpop.f32.mrf.mxu0 }
  0xa1   :  { %v588_v25 = vadd.f32 %v587_v22, %v213_v10  ;;  %v650_v26 = vpop.f32.mrf.mxu1  ;;  %v417_v22 = vunpack.c.l.b16 %v210_v16 }
  0xa3   :  { %v651_v30 = vadd.f32 %v650_v26, %v588_v25  ;;  %626 = vmatmul.bf16.gmra.mxu0 %v3311_v20  ;;  %v420_v25 = vunpack.c.h.b16 %v211_v19  ;;  %v217_v26 = vld [vmem:[%s6327_s3 + $0x20] sm:$0xff]  ;;  %v483_v28 = vpack.c.b16 %v417_v22, %v417_v22 }
  0xa4   :  { %689 = vmatmul.bf16.gmra.mxu1 %v3315_v23  ;;  %v418_v23 = vunpack.c.h.b16 %v210_v16 }
  0xa5   :  { %752 = vmatmul.bf16.gmra.mxu2 %v3319_v24  ;;  %v419_v24 = vunpack.c.l.b16 %v211_v19 }
  0xa6   :  { %815 = vmatmul.bf16.gmra.mxu3 %v3323_v27  ;;  %v484_v31 = vpack.c.b16 %v418_v23, %v418_v23  ;;  %v222_v23 = vld [vmem:[%s6327_s3 + $0x48] sm:$0xff] }
  0xa8   :  { %v713_v35 = vpop.f32.mrf.mxu2  ;;  %v589_v38 = vpop.f32.mrf.mxu0 }
  0xa9   :  { %v714_v37 = vadd.f32 %v713_v35, %v651_v30  ;;  %v776_v39 = vpop.f32.mrf.mxu3  ;;  %v590_v40 = vadd.f32 %v589_v38, %v214_v32  ;;  %v652_v41 = vpop.f32.mrf.mxu1  ;;  %v485_v32 = vpack.c.b16 %v419_v24, %v419_v24  ;;  %v486_v35 = vpack.c.b16 %v420_v25, %v420_v25 }
  0xab   :  { %v4390_v42 = vadd.f32 %v776_v39, %v714_v37  ;;  %v4401_v46 = vadd.f32 %v652_v41, %v590_v40  ;;  %v218_v37 = vld [vmem:[%s6327_s3 + $0x28] sm:$0xff] }
  0xb0   :  { %v4442_v62 = vpop.f32.mrf.mxu2  ;;  %v592_v2 = vpop.f32.mrf.mxu0 }
  0xb1   :  { %v4447_v3 = vpop.f32.mrf.mxu3  ;;  %v593_v7 = vadd.f32 %v592_v2, %v215_v51  ;;  %v655_v8 = vpop.f32.mrf.mxu1  ;;  %v3136_v51 = vld [vmem:[%s6326_s2 + $0x28] sm:$0xf0] }
  0xb2   :  { %v3139_v57 = vor.u32 %v3747_v50, %v3136_v51  ;;  %v224_v51 = vld [vmem:[%s6327_s3 + $0x58] sm:$0xff] }
  0xb3   :  { %v656_v10 = vadd.f32 %v655_v8, %v593_v7  ;;  %631 = vmatmul.bf16.gmra.mxu0 %v3335_v63  ;;  %v3158_v8 = vld [vmem:[%s6326_s2 + $0x40] sm:$0xf] }
  0xb4   :  { %694 = vmatmul.bf16.gmra.mxu1 %v3339_v4 }
  0xb5   :  { %757 = vmatmul.bf16.gmra.mxu2 %v3343_v5 }
  0xb6   :  { %820 = vmatmul.bf16.gmra.mxu3 %v3347_v9  ;;  %v3756_v9 = vld [vmem:[%s6326_s2 + $0x54] sm:$0xf0] }
  0xb8   :  { %v718_v12 = vpop.f32.mrf.mxu2  ;;  %v594_v14 = vpop.f32.mrf.mxu0 }
  0xb9   :  { %v719_v13 = vadd.f32 %v718_v12, %v656_v10  ;;  %v781_v15 = vpop.f32.mrf.mxu3  ;;  %v595_v17 = vadd.f32 %v594_v14, %v216_v11  ;;  %v657_v18 = vpop.f32.mrf.mxu1  ;;  %v3753_v10 = vld [vmem:[%s6326_s2 + $0x44] sm:$0xf]  ;;  %v3160_v11 = vld [vmem:[%s6326_s2 + $0x58] sm:$0xf0]  ;;  %v3159_v14 = vor.u32 %v3756_v9, %v3158_v8 }
  0xba   :  { %v221_v12 = vld [vmem:[%s6327_s3 + $0x40] sm:$0xff] }
  0xbb   :  { %v4458_v20 = vadd.f32 %v781_v15, %v719_v13  ;;  %v4460_v21 = vadd.f32 %v657_v18, %v595_v17  ;;  %v3163_v17 = vor.u32 %v3753_v10, %v3160_v11 }
  0xc0   :  { %v4465_v27 = vpop.f32.mrf.mxu2  ;;  %v597_v29 = vpop.f32.mrf.mxu0 }
  0xc1   :  { %v4467_v30 = vpop.f32.mrf.mxu3  ;;  %v598_v33 = vadd.f32 %v597_v29, %v217_v26  ;;  %v660_v34 = vpop.f32.mrf.mxu1 }
  0xc3   :  { %v661_v36 = vadd.f32 %v660_v34, %v598_v33  ;;  %636 = vmatmul.bf16.gmra.mxu0 %v483_v28  ;;  %v3182_v34 = vld [vmem:[%s6326_s2 + $0x70] sm:$0xf] }
  0xc4   :  { %699 = vmatmul.bf16.gmra.mxu1 %v484_v31 }
  0xc5   :  { %762 = vmatmul.bf16.gmra.mxu2 %v485_v32 }
  0xc6   :  { %825 = vmatmul.bf16.gmra.mxu3 %v486_v35  ;;  %v3762_v35 = vld [vmem:[%s6326_s2 + $0x84] sm:$0xf0] }
  0xc8   :  { %v723_v38 = vpop.f32.mrf.mxu2  ;;  %v599_v40 = vpop.f32.mrf.mxu0 }
  0xc9   :  { %v724_v39 = vadd.f32 %v723_v38, %v661_v36  ;;  %v786_v41 = vpop.f32.mrf.mxu3  ;;  %v600_v43 = vadd.f32 %v599_v40, %v218_v37  ;;  %v662_v44 = vpop.f32.mrf.mxu1  ;;  %v3759_v36 = vld [vmem:[%s6326_s2 + $0x74] sm:$0xf]  ;;  %v3184_v37 = vld [vmem:[%s6326_s2 + $0x88] sm:$0xf0]  ;;  %v3183_v40 = vor.u32 %v3762_v35, %v3182_v34 }
  0xca   :  { %v223_v38 = vld [vmem:[%s6327_s3 + $0x50] sm:$0xff]  ;;  %v3232_v35 = vld [vmem:[%s6326_s2 + $0xe8] sm:$0xf0] }
  0xcb   :  { %v4472_v45 = vadd.f32 %v786_v41, %v724_v39  ;;  %v4474_v47 = vadd.f32 %v662_v44, %v600_v43  ;;  %v3187_v44 = vor.u32 %v3759_v36, %v3184_v37  ;;  %v3771_v34 = vld [vmem:[%s6326_s2 + $0xd4] sm:$0xf] }
  0xcc   :  { %v227_v36 = vld [vmem:[%s6327_s3 + $0x70] sm:$0xff] }
  0xd0   :  { %v4491_v53 = vpop.f32.mrf.mxu2  ;;  %v602_v55 = vpop.f32.mrf.mxu0 }
  0xd1   :  { %v4493_v56 = vpop.f32.mrf.mxu3  ;;  %v603_v58 = vadd.f32 %v602_v55, %v219_v52  ;;  %v665_v59 = vpop.f32.mrf.mxu1 }
  0xd3   :  { %v666_v60 = vadd.f32 %v665_v59, %v603_v58  ;;  %838 = vmatmul.bf16.vlgmr.msrb.gmra.mxu0 %v3135_v54 }
  0xd4   :  { %3356 = vmatmul.msk.bf16.vlgmr.msrb.gmra.mxu1 %vm544_vm0, %v3139_v57 }
  0xd8   :  { %v728_v63 = vpop.f32.mrf.mxu2  ;;  %v604_v1 = vpop.f32.mrf.mxu0 }
  0xd9   :  { %v729_v0 = vadd.f32 %v728_v63, %v666_v60  ;;  %v791_v2 = vpop.f32.mrf.mxu3  ;;  %v605_v4 = vadd.f32 %v604_v1, %v220_v61  ;;  %v667_v5 = vpop.f32.mrf.mxu1  ;;  %v3206_v63 = vld [vmem:[%s6326_s2 + $0xa0] sm:$0xf]  ;;  %v3765_v1 = vld [vmem:[%s6326_s2 + $0xa4] sm:$0xf] }
  0xdb   :  { %v4499_v6 = vadd.f32 %v791_v2, %v729_v0  ;;  %v4501_v7 = vadd.f32 %v667_v5, %v605_v4  ;;  %v3768_v0 = vld [vmem:[%s6326_s2 + $0xb4] sm:$0xf0]  ;;  %v3208_v2 = vld [vmem:[%s6326_s2 + $0xb8] sm:$0xf0]  ;;  %v225_v4 = vld [vmem:[%s6327_s3 + $0x60] sm:$0xff] }
  0xdc   :  { %v3207_v8 = vor.u32 %v3768_v0, %v3206_v63  ;;  %v3211_v11 = vor.u32 %v3765_v1, %v3208_v2  ;;  %v3254_v1 = vld [vmem:[%s6326_s2 + $0x100] sm:$0xf]  ;;  %v3780_v2 = vld [vmem:[%s6326_s2 + $0x114] sm:$0xf0] }
  0xe0   :  { %v4518_v13 = vpop.f32.mrf.mxu2  ;;  %v607_v15 = vpop.f32.mrf.mxu0 }
  0xe1   :  { %v4520_v16 = vpop.f32.mrf.mxu3  ;;  %v608_v18 = vadd.f32 %v607_v15, %v221_v12  ;;  %v670_v19 = vpop.f32.mrf.mxu1 }
  0xe3   :  { %v671_v22 = vadd.f32 %v670_v19, %v608_v18  ;;  %843 = vmatmul.bf16.gmra.mxu0 %v3159_v14 }
  0xe4   :  { %3357 = vmatmul.msk.bf16.gmra.mxu1 %vm544_vm0, %v3163_v17  ;;  %v226_v17 = vld [vmem:[%s6327_s3 + $0x68] sm:$0xff] }
  0xe8   :  { %v733_v24 = vpop.f32.mrf.mxu2  ;;  %v609_v26 = vpop.f32.mrf.mxu0 }
  0xe9   :  { %v734_v25 = vadd.f32 %v733_v24, %v671_v22  ;;  %v796_v28 = vpop.f32.mrf.mxu3  ;;  %v610_v29 = vadd.f32 %v609_v26, %v222_v23  ;;  %v672_v31 = vpop.f32.mrf.mxu1 }
  0xeb   :  { %v4526_v32 = vadd.f32 %v796_v28, %v734_v25  ;;  %v4528_v33 = vadd.f32 %v672_v31, %v610_v29  ;;  %v3230_v29 = vld [vmem:[%s6326_s2 + $0xd0] sm:$0xf]  ;;  %v3774_v31 = vld [vmem:[%s6326_s2 + $0xe4] sm:$0xf0] }
  0xf0   :  { %v4545_v39 = vpop.f32.mrf.mxu2  ;;  %v612_v41 = vpop.f32.mrf.mxu0 }
  0xf1   :  { %v4547_v43 = vpop.f32.mrf.mxu3  ;;  %v613_v48 = vadd.f32 %v612_v41, %v223_v38  ;;  %v675_v49 = vpop.f32.mrf.mxu1  ;;  %v3231_v38 = vor.u32 %v3774_v31, %v3230_v29 }
  0xf3   :  { %v676_v50 = vadd.f32 %v675_v49, %v613_v48  ;;  %848 = vmatmul.bf16.gmra.mxu0 %v3183_v40 }
  0xf4   :  { %3358 = vmatmul.msk.bf16.gmra.mxu1 %vm544_vm0, %v3187_v44  ;;  %v3235_v44 = vor.u32 %v3771_v34, %v3232_v35 }
  0xf8   :  { %v738_v52 = vpop.f32.mrf.mxu2  ;;  %v614_v55 = vpop.f32.mrf.mxu0 }
  0xf9   :  { %v739_v54 = vadd.f32 %v738_v52, %v676_v50  ;;  %v801_v57 = vpop.f32.mrf.mxu3  ;;  %v615_v58 = vadd.f32 %v614_v55, %v224_v51  ;;  %v677_v59 = vpop.f32.mrf.mxu1  ;;  %v228_v51 = vld [vmem:[%s6327_s3 + $0x78] sm:$0xff] }
  0xfb   :  { %v4553_v60 = vadd.f32 %v801_v57, %v739_v54  ;;  %v4555_v61 = vadd.f32 %v677_v59, %v615_v58 }
 0x100   :  { %v4572_v5 = vpop.f32.mrf.mxu2  ;;  %v617_v9 = vpop.f32.mrf.mxu0 }
 0x101   :  { %v4574_v10 = vpop.f32.mrf.mxu3  ;;  %v618_v12 = vadd.f32 %v617_v9, %v225_v4  ;;  %v680_v14 = vpop.f32.mrf.mxu1  ;;  %v3777_v4 = vld [vmem:[%s6326_s2 + $0x104] sm:$0xf] }
 0x102   :  { %v229_v9 = vld [vmem:[%s6327_s3 + $0x80] sm:$0xff] }
 0x103   :  { %v681_v15 = vadd.f32 %v680_v14, %v618_v12  ;;  %853 = vmatmul.bf16.gmra.mxu0 %v3207_v8  ;;  %v3256_v8 = vld [vmem:[%s6326_s2 + $0x118] sm:$0xf0]  ;;  %v3255_v12 = vor.u32 %v3780_v2, %v3254_v1 }
 0x104   :  { %3359 = vmatmul.msk.bf16.gmra.mxu1 %vm544_vm0, %v3211_v11  ;;  %v232_v2 = vld [vmem:[%s6327_s3 + $0x98] sm:$0xff] }
 0x108   :  { %v743_v18 = vpop.f32.mrf.mxu2  ;;  %v619_v22 = vpop.f32.mrf.mxu0 }
 0x109   :  { %v744_v19 = vadd.f32 %v743_v18, %v681_v15  ;;  %v806_v23 = vpop.f32.mrf.mxu3  ;;  %v620_v24 = vadd.f32 %v619_v22, %v226_v17  ;;  %v682_v25 = vpop.f32.mrf.mxu1  ;;  %v3259_v17 = vor.u32 %v3777_v4, %v3256_v8 }
 0x10b   :  { %v4580_v26 = vadd.f32 %v806_v23, %v744_v19  ;;  %v4582_v28 = vadd.f32 %v682_v25, %v620_v24  ;;  %v230_v23 = vld [vmem:[%s6327_s3 + $0x88] sm:$0xff] }
 0x110   :  { %v4599_v37 = vpop.f32.mrf.mxu2  ;;  %v622_v40 = vpop.f32.mrf.mxu0 }
 0x111   :  { %v4601_v41 = vpop.f32.mrf.mxu3  ;;  %v623_v48 = vadd.f32 %v622_v40, %v227_v36  ;;  %v685_v49 = vpop.f32.mrf.mxu1  ;;  %v3278_v40 = vld [vmem:[%s6326_s2 + $0x130] sm:$0xf] }
 0x113   :  { %v686_v50 = vadd.f32 %v685_v49, %v623_v48  ;;  %858 = vmatmul.bf16.gmra.mxu0 %v3231_v38  ;;  %v3783_v48 = vld [vmem:[%s6326_s2 + $0x134] sm:$0xf]  ;;  %v3280_v49 = vld [vmem:[%s6326_s2 + $0x148] sm:$0xf0] }
 0x114   :  { %3360 = vmatmul.msk.bf16.gmra.mxu1 %vm544_vm0, %v3235_v44  ;;  %v3786_v44 = vld [vmem:[%s6326_s2 + $0x144] sm:$0xf0] }
 0x118   :  { %v748_v52 = vpop.f32.mrf.mxu2  ;;  %v624_v55 = vpop.f32.mrf.mxu0 }
 0x119   :  { %v749_v54 = vadd.f32 %v748_v52, %v686_v50  ;;  %v811_v57 = vpop.f32.mrf.mxu3  ;;  %v625_v58 = vadd.f32 %v624_v55, %v228_v51  ;;  %v687_v59 = vpop.f32.mrf.mxu1  ;;  %v231_v50 = vld [vmem:[%s6327_s3 + $0x90] sm:$0xff]  ;;  %v3279_v52 = vor.u32 %v3786_v44, %v3278_v40 }
 0x11b   :  { %v4607_v63 = vadd.f32 %v811_v57, %v749_v54  ;;  %v4609_v0 = vadd.f32 %v687_v59, %v625_v58  ;;  %v3283_v57 = vor.u32 %v3783_v48, %v3280_v49 }
 0x120   :  { %v4626_v11 = vpop.f32.mrf.mxu2  ;;  %v627_v14 = vpop.f32.mrf.mxu0 }
 0x121   :  { %v4628_v15 = vpop.f32.mrf.mxu3  ;;  %v628_v18 = vadd.f32 %v627_v14, %v229_v9  ;;  %v690_v19 = vpop.f32.mrf.mxu1 }
 0x123   :  { %v691_v22 = vadd.f32 %v690_v19, %v628_v18  ;;  %863 = vmatmul.bf16.gmra.mxu0 %v3255_v12 }
 0x124   :  { %3361 = vmatmul.msk.bf16.gmra.mxu1 %vm544_vm0, %v3259_v17 }
 0x128   :  { %v753_v24 = vpop.f32.mrf.mxu2  ;;  %v629_v29 = vpop.f32.mrf.mxu0 }
 0x129   :  { %v754_v25 = vadd.f32 %v753_v24, %v691_v22  ;;  %v816_v31 = vpop.f32.mrf.mxu3  ;;  %v630_v34 = vadd.f32 %v629_v29, %v230_v23  ;;  %v692_v35 = vpop.f32.mrf.mxu1  ;;  %v3302_v22 = vld [vmem:[%s6326_s2 + $0x160] sm:$0xf]  ;;  %v3792_v23 = vld [vmem:[%s6326_s2 + $0x174] sm:$0xf0]  ;;  %v3789_v24 = vld [vmem:[%s6326_s2 + $0x164] sm:$0xf] }
 0x12a   :  { %v233_v29 = vld [vmem:[%s6327_s3 + $0xa0] sm:$0xff] }
 0x12b   :  { %v4634_v36 = vadd.f32 %v816_v31, %v754_v25  ;;  %v4636_v38 = vadd.f32 %v692_v35, %v630_v34  ;;  %v3304_v25 = vld [vmem:[%s6326_s2 + $0x178] sm:$0xf0]  ;;  %v3303_v34 = vor.u32 %v3792_v23, %v3302_v22 }
 0x12c   :  { %v3307_v44 = vor.u32 %v3789_v24, %v3304_v25 }
 0x130   :  { %v4653_v51 = vpop.f32.mrf.mxu2  ;;  %v632_v54 = vpop.f32.mrf.mxu0 }
 0x131   :  { %v4655_v55 = vpop.f32.mrf.mxu3  ;;  %v633_v58 = vadd.f32 %v632_v54, %v231_v50  ;;  %v695_v59 = vpop.f32.mrf.mxu1 }
 0x133   :  { %v696_v1 = vadd.f32 %v695_v59, %v633_v58  ;;  %868 = vmatmul.bf16.gmra.mxu0 %v3279_v52 }
 0x134   :  { %3362 = vmatmul.msk.bf16.gmra.mxu1 %vm544_vm0, %v3283_v57 }
 0x138   :  { %v758_v4 = vpop.f32.mrf.mxu2  ;;  %v634_v9 = vpop.f32.mrf.mxu0 }
 0x139   :  { %v759_v8 = vadd.f32 %v758_v4, %v696_v1  ;;  %v821_v12 = vpop.f32.mrf.mxu3  ;;  %v635_v14 = vadd.f32 %v634_v9, %v232_v2  ;;  %v697_v17 = vpop.f32.mrf.mxu1  ;;  %v3326_v2 = vld [vmem:[%s6326_s2 + $0x190] sm:$0xf]  ;;  %v3798_v4 = vld [vmem:[%s6326_s2 + $0x1a4] sm:$0xf0]  ;;  %v3328_v9 = vld [vmem:[%s6326_s2 + $0x1a8] sm:$0xf0] }
 0x13b   :  { %v4661_v18 = vadd.f32 %v821_v12, %v759_v8  ;;  %v4663_v19 = vadd.f32 %v697_v17, %v635_v14  ;;  %v3795_v8 = vld [vmem:[%s6326_s2 + $0x194] sm:$0xf]  ;;  %v3327_v12 = vor.u32 %v3798_v4, %v3326_v2 }
 0x13c   :  { %v3331_v22 = vor.u32 %v3795_v8, %v3328_v9  ;;  %v721_v9 = vadd.f32 %v4465_v27, %v4460_v21 }
 0x140   :  { %v4680_v31 = vpop.f32.mrf.mxu2  ;;  %v637_v35 = vpop.f32.mrf.mxu0 }
 0x141   :  { %v4682_v40 = vpop.f32.mrf.mxu3  ;;  %v638_v48 = vadd.f32 %v637_v35, %v233_v29  ;;  %v700_v49 = vpop.f32.mrf.mxu1  ;;  %v716_v29 = vadd.f32 %v4442_v62, %v4401_v46  ;;  %v3801_v62 = vld [vmem:[%s6326_s2 + $0x1c4] sm:$0xf] }
 0x143   :  { %v701_v50 = vadd.f32 %v700_v49, %v638_v48  ;;  %873 = vmatmul.bf16.gmra.mxu0 %v3303_v34  ;;  %v779_v35 = vadd.f32 %v4447_v3, %v716_v29  ;;  %v3352_v3 = vld [vmem:[%s6326_s2 + $0x1d8] sm:$0xf0] }
 0x144   :  { %3363 = vmatmul.msk.bf16.gmra.mxu1 %vm544_vm0, %v3307_v44  ;;  %v3355_v2 = vor.u32 %v3801_v62, %v3352_v3 }
 0x148   :  { %v763_v52 = vpop.f32.mrf.mxu2  ;;  %v639_v57 = vpop.f32.mrf.mxu0 }
 0x149   :  { %v764_v54 = vadd.f32 %v763_v52, %v701_v50  ;;  %v826_v58 = vpop.f32.mrf.mxu3  ;;  %v702_v59 = vpop.f32.mrf.mxu1  ;;  %v3350_v52 = vld [vmem:[%s6326_s2 + $0x1c0] sm:$0xf] }
 0x14b   :  { %v4685_v1 = vadd.f32 %v826_v58, %v764_v54 }
 0x150   :  { %v765_v14 = vpop.f32.mrf.mxu2  ;;  %v839_v17 = vpop.f32.mrf.mxu0 }
 0x151   :  { %v828_v23 = vpop.f32.mrf.mxu3  ;;  %v840_v24 = vadd.f32 %v839_v17, %v4390_v42  ;;  %v902_v25 = vpop.f32.mrf.mxu1  ;;  %v3804_v42 = vld [vmem:[%s6326_s2 + $0x1d4] sm:$0xf0]  ;;  %v784_v14 = vadd.f32 %v4467_v30, %v721_v9 }
 0x152   :  { %v3351_v57 = vor.u32 %v3804_v42, %v3350_v52 }
 0x153   :  { %v903_v34 = vadd.f32 %v902_v25, %v840_v24  ;;  %878 = vmatmul.bf16.gmra.mxu0 %v3327_v12 }
 0x154   :  { %3364 = vmatmul.msk.bf16.gmra.mxu1 %vm544_vm0, %v3331_v22  ;;  %v212_v22 = vld [vmem:[%s6326_s2 + $0x1f0] sm:$0xff] }
 0x155   :  { %v956_v54 = vmax.f32 %v903_v34, 0.0  ;;  %v421_v29 = vunpack.c.l.b16 %v212_v22 }
 0x158   :  { %v841_v44 = vpop.f32.mrf.mxu0 }
 0x159   :  { %v842_v48 = vadd.f32 %v841_v44, %v779_v35  ;;  %v904_v49 = vpop.f32.mrf.mxu1  ;;  %v487_v44 = vpack.c.b16 %v421_v29, %v421_v29 }
 0x15b   :  { %v905_v50 = vadd.f32 %v904_v49, %v842_v48 }
 0x15d   :  { %v957_v46 = vmax.f32 %v905_v50, 0.0  ;;  %v726_v50 = vadd.f32 %v4491_v53, %v4474_v47  ;;  %v731_v47 = vadd.f32 %v4518_v13, %v4501_v7 }
 0x15f   :  { %v4716_v58 = vpack.c.bf16 %v957_v46, %v956_v54  ;;  %v789_v42 = vadd.f32 %v4493_v56, %v726_v50  ;;  %v794_v9 = vadd.f32 %v4520_v16, %v731_v47 }
 0x160   :  { %v844_v59 = vpop.f32.mrf.mxu0 }
 0x161   :  { %v845_v4 = vadd.f32 %v844_v59, %v4458_v20  ;;  %v907_v8 = vpop.f32.mrf.mxu1  ;;  %v422_v20 = vunpack.c.h.b16 %v212_v22 }
 0x163   :  { %v908_v12 = vadd.f32 %v907_v8, %v845_v4  ;;  %883 = vmatmul.bf16.gmra.mxu0 %v3351_v57  ;;  %v488_v48 = vpack.c.b16 %v422_v20, %v422_v20 }
 0x164   :  { %3365 = vmatmul.msk.bf16.gmra.mxu1 %vm544_vm0, %v3355_v2 }
 0x165   :  { %v958_v34 = vmax.f32 %v908_v12, 0.0 }
 0x168   :  { %v846_v17 = vpop.f32.mrf.mxu0 }
 0x169   :  { %v847_v23 = vadd.f32 %v846_v17, %v784_v14  ;;  %v909_v24 = vpop.f32.mrf.mxu1 }
 0x16b   :  { %v910_v25 = vadd.f32 %v909_v24, %v847_v23 }
 0x16d   :  { %v959_v35 = vmax.f32 %v910_v25, 0.0 }
 0x16f   :  { %v4726_v21 = vpack.c.bf16 %v959_v35, %v958_v34 }
 0x170   :  { %v849_v27 = vpop.f32.mrf.mxu0 }
 0x171   :  { %v850_v49 = vadd.f32 %v849_v27, %v4472_v45  ;;  %v912_v30 = vpop.f32.mrf.mxu1 }
 0x173   :  { %v913_v52 = vadd.f32 %v912_v30, %v850_v49  ;;  %888 = vmatmul.bf16.gmra.mxu0 %v487_v44 }
 0x174   :  { %3366 = vmatmul.msk.bf16.gmra.mxu1 %vm544_vm0, %v488_v48 }
 0x175   :  { %v960_v57 = vmax.f32 %v913_v52, 0.0  ;;  %v741_v52 = vadd.f32 %v4572_v5, %v4555_v61 }
 0x178   :  { %v851_v54 = vpop.f32.mrf.mxu0 }
 0x179   :  { %v852_v46 = vadd.f32 %v851_v54, %v789_v42  ;;  %v914_v62 = vpop.f32.mrf.mxu1  ;;  %v804_v42 = vadd.f32 %v4574_v10, %v741_v52 }
 0x17b   :  { %v915_v3 = vadd.f32 %v914_v62, %v852_v46 }
 0x17d   :  { %v961_v59 = vmax.f32 %v915_v3, 0.0 }
 0x17f   :  { %v4733_v2 = vpack.c.bf16 %v961_v59, %v960_v57 }
 0x180   :  { %v854_v4 = vpop.f32.mrf.mxu0 }
 0x181   :  { %v855_v45 = vadd.f32 %v854_v4, %v4499_v6  ;;  %v917_v8 = vpop.f32.mrf.mxu1  ;;  %v736_v6 = vadd.f32 %v4545_v39, %v4528_v33 }
 0x183   :  { %v918_v53 = vadd.f32 %v917_v8, %v855_v45  ;;  %v799_v7 = vadd.f32 %v4547_v43, %v736_v6  ;;  %v746_v45 = vadd.f32 %v4599_v37, %v4582_v28 }
 0x185   :  { %v962_v22 = vmax.f32 %v918_v53, 0.0  ;;  %v809_v61 = vadd.f32 %v4601_v41, %v746_v45 }
 0x188   :  { %v856_v12 = vpop.f32.mrf.mxu0 }
 0x189   :  { %v857_v56 = vadd.f32 %v856_v12, %v794_v9  ;;  %v919_v14 = vpop.f32.mrf.mxu1 }
 0x18b   :  { %v920_v17 = vadd.f32 %v919_v14, %v857_v56 }
 0x18d   :  { %v963_v23 = vmax.f32 %v920_v17, 0.0 }
 0x18f   :  { %v4739_v24 = vpack.c.bf16 %v963_v23, %v962_v22  ;;  %v751_v22 = vadd.f32 %v4626_v11, %v4609_v0 }
 0x190   :  { %v859_v25 = vpop.f32.mrf.mxu0 }
 0x191   :  { %v860_v29 = vadd.f32 %v859_v25, %v4526_v32  ;;  %v922_v20 = vpop.f32.mrf.mxu1  ;;  %v814_v28 = vadd.f32 %v4628_v15, %v751_v22  ;;  %v3505_v22 = vld [vmem:[%s6328_s4 + $0x110] sm:$0xf] }
 0x193   :  { %v923_v34 = vadd.f32 %v922_v20, %v860_v29 }
 0x195   :  { %v964_v27 = vmax.f32 %v923_v34, 0.0 }
 0x198   :  { %v861_v13 = vpop.f32.mrf.mxu0 }
 0x199   :  { %v862_v16 = vadd.f32 %v861_v13, %v799_v7  ;;  %v924_v35 = vpop.f32.mrf.mxu1 }
 0x19b   :  { %v925_v44 = vadd.f32 %v924_v35, %v862_v16  ;;  %v756_v16 = vadd.f32 %v4653_v51, %v4636_v38 }
 0x19d   :  { %v965_v48 = vmax.f32 %v925_v44, 0.0 }
 0x19f   :  { %v981_v49 = vpack.c.bf16 %v965_v48, %v964_v27 }
 0x1a0   :  { %v864_v30 = vpop.f32.mrf.mxu0 }
 0x1a1   :  { %v927_v50 = vpop.f32.mrf.mxu1  ;;  %v865_v32 = vadd.f32 %v864_v30, %v4553_v60 }
 0x1a3   :  { %v928_v39 = vadd.f32 %v927_v50, %v865_v32 }
 0x1a5   :  { %v966_v62 = vmax.f32 %v928_v39, 0.0 }
 0x1a8   :  { %v866_v33 = vpop.f32.mrf.mxu0 }
 0x1a9   :  { %v867_v54 = vadd.f32 %v866_v33, %v804_v42  ;;  %v929_v43 = vpop.f32.mrf.mxu1 }
 0x1ab   :  { %v930_v46 = vadd.f32 %v929_v43, %v867_v54 }
 0x1ad   :  { %v967_v3 = vmax.f32 %v930_v46, 0.0 }
 0x1af   :  { %v982_v57 = vpack.c.bf16 %v967_v3, %v966_v62 }
 0x1b0   :  { %v869_v59 = vpop.f32.mrf.mxu0 }
 0x1b1   :  { %v932_v4 = vpop.f32.mrf.mxu1  ;;  %v870_v8 = vadd.f32 %v869_v59, %v4580_v26 }
 0x1b3   :  { %v933_v5 = vadd.f32 %v932_v4, %v870_v8  ;;  %v3497_v8 = vld [vmem:[%s6328_s4 + $0x100] sm:$0xf] }
 0x1b5   :  { %v968_v9 = vmax.f32 %v933_v5, 0.0  ;;  %v3808_v5 = vld [vmem:[%s6328_s4 + $0x14] sm:$0xf0] }
 0x1b8   :  { %v871_v60 = vpop.f32.mrf.mxu0 }
 0x1b9   :  { %v872_v10 = vadd.f32 %v871_v60, %v809_v61  ;;  %v934_v47 = vpop.f32.mrf.mxu1 }
 0x1bb   :  { %v935_v53 = vadd.f32 %v934_v47, %v872_v10 }
 0x1bd   :  { %v969_v12 = vmax.f32 %v935_v53, 0.0  ;;  %v3835_v53 = vld [vmem:[%s6328_s4 + $0xf4] sm:$0xf] }
 0x1bf   :  { %v983_v56 = vpack.c.bf16 %v969_v12, %v968_v9  ;;  %v3491_v9 = vld [vmem:[%s6328_s4 + $0xf8] sm:$0xf0]  ;;  %v3805_v12 = vld [vmem:[%s6328_s4 + $0x4] sm:$0xf] }
 0x1c0   :  { %v874_v14 = vpop.f32.mrf.mxu0 }
 0x1c1   :  { %v937_v17 = vpop.f32.mrf.mxu1  ;;  %v875_v23 = vadd.f32 %v874_v14, %v4607_v63  ;;  %v819_v63 = vadd.f32 %v4655_v55, %v756_v16  ;;  %v3494_v14 = vor.u32 %v3835_v53, %v3491_v9  ;;  %v3842_v16 = vld [vmem:[%s6328_s4 + $0x124] sm:$0xf0] }
 0x1c3   :  { %v938_v37 = vadd.f32 %v937_v17, %v875_v23  ;;  %v3840_v23 = vld [vmem:[%s6328_s4 + $0x114] sm:$0xf0] }
 0x1c5   :  { %v970_v20 = vmax.f32 %v938_v37, 0.0  ;;  %v3506_v37 = vor.u32 %v3840_v23, %v3505_v22 }
 0x1c8   :  { %v876_v26 = vpop.f32.mrf.mxu0 }
 0x1c9   :  { %v877_v41 = vadd.f32 %v876_v26, %v814_v28  ;;  %v939_v25 = vpop.f32.mrf.mxu1  ;;  %v3385_v28 = vld [vmem:[%s6328_s4 + $0x20] sm:$0xf]  ;;  %v3810_v26 = vld [vmem:[%s6328_s4 + $0x24] sm:$0xf0] }
 0x1cb   :  { %v940_v29 = vadd.f32 %v939_v25, %v877_v41  ;;  %v3386_v41 = vor.u32 %v3810_v26, %v3385_v28  ;;  %v3837_v25 = vld [vmem:[%s6328_s4 + $0x104] sm:$0xf]  ;;  %v3847_v28 = vld [vmem:[%s6328_s4 + $0x154] sm:$0xf]  ;;  %v3539_v26 = vld [vmem:[%s6328_s4 + $0x158] sm:$0xf0] }
 0x1cd   :  { %v971_v6 = vmax.f32 %v940_v29, 0.0  ;;  %v3499_v29 = vld [vmem:[%s6328_s4 + $0x108] sm:$0xf0] }
 0x1cf   :  { %v984_v34 = vpack.c.bf16 %v971_v6, %v970_v20  ;;  %v3807_v20 = vld [vmem:[%s6328_s4 + $0x14] sm:$0xf]  ;;  %v3379_v6 = vld [vmem:[%s6328_s4 + $0x18] sm:$0xf0] }
 0x1d0   :  { %v879_v7 = vpop.f32.mrf.mxu0 }
 0x1d1   :  { %v942_v13 = vpop.f32.mrf.mxu1  ;;  %1665 = vmatpush.bf16.msra.mxu0 %v984_v34  ;;  %3889 = vmatpush.bf16.msrb.mxu2 %v984_v34  ;;  %v880_v0 = vadd.f32 %v879_v7, %v4634_v36  ;;  %v761_v36 = vadd.f32 %v4680_v31, %v4663_v19  ;;  %v3369_v19 = vld [vmem:[%s6328_s4] sm:$0xf]  ;;  %v3806_v31 = vld [vmem:[%s6328_s4 + $0x4] sm:$0xf0]  ;;  %v3502_v34 = vor.u32 %v3837_v25, %v3499_v29 }
 0x1d2   :  { %v3382_v7 = vor.u32 %v3807_v20, %v3379_v6  ;;  %v3542_v25 = vor.u32 %v3847_v28, %v3539_v26  ;;  %v3553_v20 = vld [vmem:[%s6328_s4 + $0x170] sm:$0xf]  ;;  %v3852_v6 = vld [vmem:[%s6328_s4 + $0x174] sm:$0xf0]  ;;  %v3853_v26 = vld [vmem:[%s6328_s4 + $0x184] sm:$0xf] }
 0x1d3   :  { %v943_v15 = vadd.f32 %v942_v13, %v880_v0  ;;  %v824_v55 = vadd.f32 %v4682_v40, %v761_v36  ;;  %v3513_v13 = vld [vmem:[%s6328_s4 + $0x120] sm:$0xf]  ;;  %v3393_v0 = vld [vmem:[%s6328_s4 + $0x30] sm:$0xf] }
 0x1d4   :  { %v3401_v36 = vld [vmem:[%s6328_s4 + $0x40] sm:$0xf] }
 0x1d5   :  { %1666 = vmatpush.bf16.msra.mxu0 %v983_v56  ;;  %3890 = vmatpush.bf16.msrb.mxu2 %v983_v56  ;;  %v972_v48 = vmax.f32 %v943_v15, 0.0  ;;  %v3371_v56 = vld [vmem:[%s6328_s4 + $0x8] sm:$0xf0] }
 0x1d6   :  { %v3374_v17 = vor.u32 %v3805_v12, %v3371_v56  ;;  %v3545_v12 = vld [vmem:[%s6328_s4 + $0x160] sm:$0xf]  ;;  %v3850_v56 = vld [vmem:[%s6328_s4 + $0x164] sm:$0xf0] }
 0x1d7   :  { %v3546_v22 = vor.u32 %v3850_v56, %v3545_v12 }
 0x1d8   :  { %v881_v11 = vpop.f32.mrf.mxu0 }
 0x1d9   :  { %v882_v35 = vadd.f32 %v881_v11, %v819_v63  ;;  %v944_v44 = vpop.f32.mrf.mxu1  ;;  %1667 = vmatpush.bf16.msra.mxu0 %v982_v57  ;;  %3891 = vmatpush.bf16.msrb.mxu2 %v982_v57  ;;  %v3812_v63 = vld [vmem:[%s6328_s4 + $0x34] sm:$0xf0]  ;;  %v3514_v11 = vor.u32 %v3842_v16, %v3513_v13  ;;  %v3554_v13 = vor.u32 %v3852_v6, %v3553_v20  ;;  %v3443_v20 = vld [vmem:[%s6328_s4 + $0x98] sm:$0xf0] }
 0x1da   :  { %v3394_v15 = vor.u32 %v3812_v63, %v3393_v0  ;;  %v3849_v0 = vld [vmem:[%s6328_s4 + $0x164] sm:$0xf] }
 0x1db   :  { %v945_v27 = vadd.f32 %v944_v44, %v882_v35  ;;  %v3839_v35 = vld [vmem:[%s6328_s4 + $0x114] sm:$0xf]  ;;  %v3507_v44 = vld [vmem:[%s6328_s4 + $0x118] sm:$0xf0] }
 0x1dd   :  { %v973_v30 = vmax.f32 %v945_v27, 0.0  ;;  %1668 = vmatpush.bf16.msra.mxu0 %v981_v49  ;;  %3892 = vmatpush.bf16.msrb.mxu2 %v981_v49  ;;  %v3489_v49 = vld [vmem:[%s6328_s4 + $0xf0] sm:$0xf]  ;;  %v3809_v27 = vld [vmem:[%s6328_s4 + $0x24] sm:$0xf] }
 0x1df   :  { %v985_v50 = vpack.c.bf16 %v973_v30, %v972_v48  ;;  %v3387_v48 = vld [vmem:[%s6328_s4 + $0x28] sm:$0xf0]  ;;  %v3510_v30 = vor.u32 %v3839_v35, %v3507_v44  ;;  %v3819_v35 = vld [vmem:[%s6328_s4 + $0x74] sm:$0xf]  ;;  %v3427_v44 = vld [vmem:[%s6328_s4 + $0x78] sm:$0xf0] }
 0x1e0   :  { %v884_v52 = vpop.f32.mrf.mxu0 }
 0x1e1   :  { %v947_v38 = vpop.f32.mrf.mxu1  ;;  %1669 = vmatpush.bf16.msra.mxu0 %v4739_v24  ;;  %3893 = vmatpush.bf16.msrb.mxu2 %v4739_v24  ;;  %v885_v51 = vadd.f32 %v884_v52, %v4661_v18  ;;  %v3836_v18 = vld [vmem:[%s6328_s4 + $0xf4] sm:$0xf0]  ;;  %v3370_v24 = vor.u32 %v3806_v31, %v3369_v19  ;;  %v3521_v52 = vld [vmem:[%s6328_s4 + $0x130] sm:$0xf]  ;;  %v3529_v31 = vld [vmem:[%s6328_s4 + $0x140] sm:$0xf] }
 0x1e3   :  { %v948_v42 = vadd.f32 %v947_v38, %v885_v51  ;;  %v3844_v38 = vld [vmem:[%s6328_s4 + $0x134] sm:$0xf0]  ;;  %v3814_v51 = vld [vmem:[%s6328_s4 + $0x44] sm:$0xf0] }
 0x1e5   :  { %1670 = vmatpush.bf16.msra.mxu0 %v4733_v2  ;;  %3894 = vmatpush.bf16.msrb.mxu2 %v4733_v2  ;;  %v3490_v2 = vor.u32 %v3836_v18, %v3489_v49  ;;  %v974_v54 = vmax.f32 %v948_v42, 0.0  ;;  %v3841_v49 = vld [vmem:[%s6328_s4 + $0x124] sm:$0xf]  ;;  %v3515_v42 = vld [vmem:[%s6328_s4 + $0x128] sm:$0xf0] }
 0x1e6   :  { %v3518_v18 = vor.u32 %v3841_v49, %v3515_v42  ;;  %v1072_v49 = vld [vmem:[%s6329_s5] sm:$0xff] }
 0x1e8   :  { %v886_v32 = vpop.f32.mrf.mxu0 }
 0x1e9   :  { %v887_v33 = vadd.f32 %v886_v32, %v824_v55  ;;  %v949_v39 = vpop.f32.mrf.mxu1  ;;  %1671 = vmatpush.bf16.msra.mxu0 %v4726_v21  ;;  %3895 = vmatpush.bf16.msrb.mxu2 %v4726_v21  ;;  %v3522_v55 = vor.u32 %v3844_v38, %v3521_v52  ;;  %v3402_v32 = vor.u32 %v3814_v51, %v3401_v36  ;;  %v3561_v52 = vld [vmem:[%s6328_s4 + $0x180] sm:$0xf]  ;;  %v3854_v38 = vld [vmem:[%s6328_s4 + $0x184] sm:$0xf0]  ;;  %v3441_v36 = vld [vmem:[%s6328_s4 + $0x90] sm:$0xf] }
 0x1ea   :  { %v3824_v51 = vld [vmem:[%s6328_s4 + $0x94] sm:$0xf0] }
 0x1eb   :  { %v950_v40 = vadd.f32 %v949_v39, %v887_v33  ;;  %v3811_v33 = vld [vmem:[%s6328_s4 + $0x34] sm:$0xf]  ;;  %v3395_v39 = vld [vmem:[%s6328_s4 + $0x38] sm:$0xf0]  ;;  %v3442_v42 = vor.u32 %v3824_v51, %v3441_v36 }
 0x1ec   :  { %v3398_v19 = vor.u32 %v3811_v33, %v3395_v39  ;;  %v3851_v33 = vld [vmem:[%s6328_s4 + $0x174] sm:$0xf] }
 0x1ed   :  { %v975_v43 = vmax.f32 %v950_v40, 0.0  ;;  %1672 = vmatpush.bf16.msra.mxu0 %v4716_v58  ;;  %3896 = vmatpush.bf16.msrb.mxu2 %v4716_v58  ;;  %v3838_v58 = vld [vmem:[%s6328_s4 + $0x104] sm:$0xf0] }
 0x1ee   :  { %v3498_v10 = vor.u32 %v3838_v58, %v3497_v8  ;;  %v3846_v40 = vld [vmem:[%s6328_s4 + $0x144] sm:$0xf0]  ;;  %v3417_v8 = vld [vmem:[%s6328_s4 + $0x60] sm:$0xf] }
 0x1ef   :  { %v986_v21 = vpack.c.bf16 %v975_v43, %v974_v54  ;;  %v3530_v54 = vor.u32 %v3846_v40, %v3529_v31  ;;  %v3818_v58 = vld [vmem:[%s6328_s4 + $0x64] sm:$0xf0]  ;;  %v3435_v31 = vld [vmem:[%s6328_s4 + $0x88] sm:$0xf0] }
 0x1f0   :  { %v889_v46 = vpop.f32.mrf.mxu0  ;;  %1748 = vmatmul.bf16.vlgmr.msrb.gmra.mxu2 %v3490_v2  ;;  %1673 = vmatmul.bf16.vlgmr.msra.gmra.mxu0 %v3370_v24  ;;  %v3409_v2 = vld [vmem:[%s6328_s4 + $0x50] sm:$0xf]  ;;  %v3816_v24 = vld [vmem:[%s6328_s4 + $0x54] sm:$0xf0] }
 0x1f1   :  { %v890_v62 = vadd.f32 %v889_v46, %v4685_v1  ;;  %v952_v3 = vpop.f32.mrf.mxu1  ;;  %v3377_v1 = vld [vmem:[%s6328_s4 + $0x10] sm:$0xf]  ;;  %v3410_v43 = vor.u32 %v3816_v24, %v3409_v2  ;;  %v3523_v46 = vld [vmem:[%s6328_s4 + $0x138] sm:$0xf0] }
 0x1f2   :  { %v3378_v47 = vor.u32 %v3808_v5, %v3377_v1  ;;  %v3845_v1 = vld [vmem:[%s6328_s4 + $0x144] sm:$0xf]  ;;  %v3531_v5 = vld [vmem:[%s6328_s4 + $0x148] sm:$0xf0] }
 0x1f3   :  { %v953_v57 = vadd.f32 %v952_v3, %v890_v62  ;;  %v3813_v62 = vld [vmem:[%s6328_s4 + $0x44] sm:$0xf]  ;;  %v3403_v3 = vld [vmem:[%s6328_s4 + $0x48] sm:$0xf0]  ;;  %v3534_v53 = vor.u32 %v3845_v1, %v3531_v5  ;;  %v3449_v1 = vld [vmem:[%s6328_s4 + $0xa0] sm:$0xf] }
 0x1f4   :  { %v3826_v5 = vld [vmem:[%s6328_s4 + $0xa4] sm:$0xf0] }
 0x1f5   :  { %v976_v59 = vmax.f32 %v953_v57, 0.0 }
 0x1f7   :  { %v987_v4 = vpack.c.bf16 %v976_v59, %v976_v59  ;;  %v3406_v59 = vor.u32 %v3813_v62, %v3403_v3  ;;  %v1073_v62 = vld [vmem:[%s6329_s5 + $0x8] sm:$0xff] }
 0x1f8   :  { %v891_v45 = vpop.f32.mrf.mxu0 }
 0x1f9   :  { %v954_v61 = vpop.f32.mrf.mxu1  ;;  %v1663_v60 = vsel %vm1661_vm1, %v987_v4, 0  ;;  %v3537_v4 = vld [vmem:[%s6328_s4 + $0x150] sm:$0xf]  ;;  %v3848_v45 = vld [vmem:[%s6328_s4 + $0x154] sm:$0xf0] }
 0x1fa   :  { %1889 = vmatpush.bf16.msra.mxu1 %v1663_v60  ;;  %3897 = vmatpush.bf16.msrb.mxu3 %v1663_v60  ;;  %v3538_v61 = vor.u32 %v3848_v45, %v3537_v4  ;;  %v3418_v60 = vor.u32 %v3818_v58, %v3417_v8  ;;  %v3569_v58 = vld [vmem:[%s6328_s4 + $0x190] sm:$0xf] }
 0x1fe   :  { %1890 = vmatpush.bf16.msra.mxu1 %v986_v21  ;;  %3898 = vmatpush.bf16.msrb.mxu3 %v986_v21  ;;  %v3843_v21 = vld [vmem:[%s6328_s4 + $0x134] sm:$0xf] }
 0x1ff   :  { %v3526_v57 = vor.u32 %v3843_v21, %v3523_v46 }
 0x200   :  { %1753 = vmatmul.bf16.gmra.mxu2 %v3498_v10  ;;  %1678 = vmatmul.bf16.gmra.mxu0 %v3378_v47  ;;  %v3815_v10 = vld [vmem:[%s6328_s4 + $0x54] sm:$0xf]  ;;  %v3411_v47 = vld [vmem:[%s6328_s4 + $0x58] sm:$0xf0] }
 0x201   :  { %v3414_v9 = vor.u32 %v3815_v10, %v3411_v47 }
 0x202   :  { %1891 = vmatpush.bf16.msra.mxu1 %v985_v50  ;;  %3899 = vmatpush.bf16.msrb.mxu3 %v985_v50  ;;  %v3390_v50 = vor.u32 %v3809_v27, %v3387_v48  ;;  %v3430_v48 = vor.u32 %v3819_v35, %v3427_v44 }
 0x205   :  { %3718 = vmatmul.msk.bf16.vlgmr.msrb.gmra.mxu3 %vm1534_vm2, %v3494_v14  ;;  %3703 = vmatmul.msk.bf16.vlgmr.msra.gmra.mxu1 %vm1534_vm2, %v3374_v17  ;;  %v3425_v14 = vld [vmem:[%s6328_s4 + $0x70] sm:$0xf]  ;;  %v3820_v17 = vld [vmem:[%s6328_s4 + $0x74] sm:$0xf0] }
 0x206   :  { %v3426_v23 = vor.u32 %v3820_v17, %v3425_v14  ;;  %v1103_v14 = vld [vmem:[%s6329_s5 + $0xf8] sm:$0xff] }
 0x210   :  { %1758 = vmatmul.bf16.gmra.mxu2 %v3506_v37  ;;  %1683 = vmatmul.bf16.gmra.mxu0 %v3386_v41  ;;  %v3817_v37 = vld [vmem:[%s6328_s4 + $0x64] sm:$0xf]  ;;  %v3419_v41 = vld [vmem:[%s6328_s4 + $0x68] sm:$0xf0] }
 0x211   :  { %v3422_v29 = vor.u32 %v3817_v37, %v3419_v41  ;;  %v3563_v37 = vld [vmem:[%s6328_s4 + $0x188] sm:$0xf0] }
 0x215   :  { %3719 = vmatmul.msk.bf16.gmra.mxu3 %vm1534_vm2, %v3502_v34  ;;  %3704 = vmatmul.msk.bf16.gmra.mxu1 %vm1534_vm2, %v3382_v7  ;;  %v3433_v34 = vld [vmem:[%s6328_s4 + $0x80] sm:$0xf]  ;;  %v3822_v7 = vld [vmem:[%s6328_s4 + $0x84] sm:$0xf0] }
 0x216   :  { %v3434_v16 = vor.u32 %v3822_v7, %v3433_v34 }
 0x220   :  { %1763 = vmatmul.bf16.gmra.mxu2 %v3514_v11  ;;  %1688 = vmatmul.bf16.gmra.mxu0 %v3394_v15  ;;  %v3904_v11 = vmov 0   ;;  %v3547_v15 = vld [vmem:[%s6328_s4 + $0x168] sm:$0xf0] }
 0x221   :  { %3901 = vset.pattern.permute.xlu0 %v3904_v11  ;;  %3902 = vset.pattern.permute.xlu1 %v3904_v11  ;;  %v3550_v27 = vor.u32 %v3849_v0, %v3547_v15  ;;  %v3566_v0 = vor.u32 %v3853_v26, %v3563_v37 }
 0x222   :  { %3903 = vset.pattern.permute.xlu2 %v3904_v11  ;;  %v1104_v11 = vld [vmem:[%s6329_s5 + $0x100] sm:$0xff] }
 0x225   :  { %3720 = vmatmul.msk.bf16.gmra.mxu3 %vm1534_vm2, %v3510_v30  ;;  %3705 = vmatmul.msk.bf16.gmra.mxu1 %vm1534_vm2, %v3390_v50 }
 0x230   :  { %1768 = vmatmul.bf16.gmra.mxu2 %v3522_v55  ;;  %1693 = vmatmul.bf16.gmra.mxu0 %v3402_v32  ;;  %v3562_v32 = vor.u32 %v3854_v38, %v3561_v52 }
 0x235   :  { %3721 = vmatmul.msk.bf16.gmra.mxu3 %vm1534_vm2, %v3518_v18  ;;  %3706 = vmatmul.msk.bf16.gmra.mxu1 %vm1534_vm2, %v3398_v19  ;;  %v3555_v18 = vld [vmem:[%s6328_s4 + $0x178] sm:$0xf0]  ;;  %v3821_v19 = vld [vmem:[%s6328_s4 + $0x84] sm:$0xf] }
 0x236   :  { %v3558_v2 = vor.u32 %v3851_v33, %v3555_v18  ;;  %v3438_v24 = vor.u32 %v3821_v19, %v3435_v31  ;;  %v3577_v33 = vld [vmem:[%s6328_s4 + $0x1a0] sm:$0xf]  ;;  %v3858_v19 = vld [vmem:[%s6328_s4 + $0x1a4] sm:$0xf0]  ;;  %v3457_v31 = vld [vmem:[%s6328_s4 + $0xb0] sm:$0xf] }
 0x240   :  { %1773 = vmatmul.bf16.gmra.mxu2 %v3530_v54  ;;  %1698 = vmatmul.bf16.gmra.mxu0 %v3410_v43  ;;  %v1102_v54 = vld [vmem:[%s6329_s5 + $0xf0] sm:$0xff] }
 0x245   :  { %3722 = vmatmul.msk.bf16.gmra.mxu3 %vm1534_vm2, %v3526_v57  ;;  %3707 = vmatmul.msk.bf16.gmra.mxu1 %vm1534_vm2, %v3406_v59 }
 0x250   :  { %1778 = vmatmul.bf16.gmra.mxu2 %v3538_v61  ;;  %1703 = vmatmul.bf16.gmra.mxu0 %v3418_v60  ;;  %v3856_v61 = vld [vmem:[%s6328_s4 + $0x194] sm:$0xf0] }
 0x251   :  { %v3570_v17 = vor.u32 %v3856_v61, %v3569_v58 }
 0x255   :  { %3723 = vmatmul.msk.bf16.gmra.mxu3 %vm1534_vm2, %v3534_v53  ;;  %3708 = vmatmul.msk.bf16.gmra.mxu1 %vm1534_vm2, %v3414_v9 }
 0x260   :  { %1783 = vmatmul.bf16.gmra.mxu2 %v3546_v22  ;;  %1708 = vmatmul.bf16.gmra.mxu0 %v3426_v23  ;;  %v1074_v22 = vld [vmem:[%s6329_s5 + $0x10] sm:$0xff]  ;;  %v3450_v23 = vor.u32 %v3826_v5, %v3449_v1  ;;  %v3825_v1 = vld [vmem:[%s6328_s4 + $0xa4] sm:$0xf]  ;;  %v3451_v5 = vld [vmem:[%s6328_s4 + $0xa8] sm:$0xf0] }
 0x265   :  { %3724 = vmatmul.msk.bf16.gmra.mxu3 %vm1534_vm2, %v3542_v25  ;;  %3709 = vmatmul.msk.bf16.gmra.mxu1 %vm1534_vm2, %v3422_v29  ;;  %v3823_v29 = vld [vmem:[%s6328_s4 + $0x94] sm:$0xf] }
 0x26d   :  { %v1674_v63 = vpop.f32.mrf.mxu0 }
 0x26e   :  { %v1675_v40 = vadd.f32 %v1674_v63, %v1072_v49  ;;  %v3446_v63 = vor.u32 %v3823_v29, %v3443_v20  ;;  %v1077_v20 = vld [vmem:[%s6329_s5 + $0x28] sm:$0xff] }
 0x270   :  { %1788 = vmatmul.bf16.gmra.mxu2 %v3554_v13  ;;  %1713 = vmatmul.bf16.gmra.mxu0 %v3434_v16 }
 0x273   :  { %v1749_v30 = vpop.f32.mrf.mxu2 }
 0x274   :  { %v1750_v3 = vadd.f32 %v1749_v30, %v1102_v54 }
 0x275   :  { %3725 = vmatmul.msk.bf16.gmra.mxu3 %vm1534_vm2, %v3550_v27  ;;  %3710 = vmatmul.msk.bf16.gmra.mxu1 %vm1534_vm2, %v3430_v48  ;;  %v1676_v50 = vpop.f32.mrf.mxu0 }
 0x276   :  { %v1677_v45 = vadd.f32 %v1676_v50, %v1073_v62  ;;  %v1075_v50 = vld [vmem:[%s6329_s5 + $0x18] sm:$0xff]  ;;  %v1105_v62 = vld [vmem:[%s6329_s5 + $0x108] sm:$0xff] }
 0x27b   :  { %v1751_v55 = vpop.f32.mrf.mxu2 }
 0x27c   :  { %v1752_v6 = vadd.f32 %v1751_v55, %v1103_v14 }
 0x27d   :  { %v1679_v39 = vpop.f32.mrf.mxu0 }
 0x27e   :  { %v1680_v34 = vadd.f32 %v1679_v39, %v1074_v22 }
 0x280   :  { %1793 = vmatmul.bf16.gmra.mxu2 %v3562_v32  ;;  %1718 = vmatmul.bf16.gmra.mxu0 %v3442_v42 }
 0x282   :  { %v1893_v43 = vpop.f32.mrf.mxu1 }
 0x283   :  { %v1754_v21 = vpop.f32.mrf.mxu2  ;;  %v1894_v46 = vadd.f32 %v1893_v43, %v1675_v40  ;;  %v3828_v40 = vld [vmem:[%s6328_s4 + $0xb4] sm:$0xf0] }
 0x284   :  { %v1755_v52 = vadd.f32 %v1754_v21, %v1104_v11 }
 0x285   :  { %3726 = vmatmul.msk.bf16.gmra.mxu3 %vm1534_vm2, %v3558_v2  ;;  %v2103_v57 = vmul.f32 0.16666667, %v1894_v46  ;;  %3711 = vmatmul.msk.bf16.gmra.mxu1 %vm1534_vm2, %v3438_v24  ;;  %v1681_v59 = vpop.f32.mrf.mxu0 }
 0x286   :  { %v1682_v32 = vadd.f32 %v1681_v59, %v1075_v50  ;;  %v1076_v59 = vld [vmem:[%s6329_s5 + $0x20] sm:$0xff] }
 0x287   :  { %v2187_v4 = vadd.f32 0.5, %v2103_v57  ;;  %v3465_v50 = vld [vmem:[%s6328_s4 + $0xc0] sm:$0xf] }
 0x288   :  { %v1968_v8 = vpop.f32.mrf.mxu3 }
 0x289   :  { %v1969_v60 = vadd.f32 %v1968_v8, %v1750_v3  ;;  %v2271_v10 = vmax.f32 %v2187_v4, 0.0  ;;  %v3578_v3 = vor.u32 %v3858_v19, %v3577_v33  ;;  %v3458_v4 = vor.u32 %v3828_v40, %v3457_v31  ;;  %v3855_v8 = vld [vmem:[%s6328_s4 + $0x194] sm:$0xf]  ;;  %v3579_v31 = vld [vmem:[%s6328_s4 + $0x1a8] sm:$0xf0] }
 0x28a   :  { %v1895_v47 = vpop.f32.mrf.mxu1 }
 0x28b   :  { %v2133_v53 = vmul.f32 0.16666667, %v1969_v60  ;;  %v5041_v9 = vpop.f32.mrf.mxu2  ;;  %v1896_v12 = vadd.f32 %v1895_v47, %v1677_v45  ;;  %v2355_v56 = vmin.f32 %v2271_v10, 1.0  ;;  %v3571_v60 = vld [vmem:[%s6328_s4 + $0x198] sm:$0xf0] }
 0x28c   :  { %v1757_v10 = vadd.f32 %v5041_v9, %v1105_v62  ;;  %v3574_v22 = vor.u32 %v3855_v8, %v3571_v60  ;;  %v1108_v60 = vld [vmem:[%s6329_s5 + $0x120] sm:$0xff] }
 0x28d   :  { %v2217_v28 = vadd.f32 0.5, %v2133_v53  ;;  %v1684_v41 = vpop.f32.mrf.mxu0  ;;  %2525 = vperm.xlu0 %3901, %v2355_v56   ;;  %v2104_v25 = vmul.f32 0.16666667, %v1896_v12 }
 0x28e   :  { %v1685_v47 = vadd.f32 %v1684_v41, %v1076_v59 }
 0x28f   :  { %v2301_v7 = vmax.f32 %v2217_v28, 0.0  ;;  %v2188_v15 = vadd.f32 0.5, %v2104_v25  ;;  %v1106_v28 = vld [vmem:[%s6329_s5 + $0x110] sm:$0xff] }
 0x290   :  { %v1970_v13 = vpop.f32.mrf.mxu3  ;;  %1798 = vmatmul.bf16.gmra.mxu2 %v3570_v17  ;;  %1723 = vmatmul.bf16.gmra.mxu0 %v3450_v23  ;;  %v3454_v23 = vor.u32 %v3825_v1, %v3451_v5 }
 0x291   :  { %v1971_v16 = vadd.f32 %v1970_v13, %v1752_v6  ;;  %v2385_v30 = vmin.f32 %v2301_v7, 1.0  ;;  %v2272_v55 = vmax.f32 %v2188_v15, 0.0  ;;  %v3585_v15 = vld [vmem:[%s6328_s4 + $0x1b0] sm:$0xf] }
 0x292   :  { %v1898_v35 = vpop.f32.mrf.mxu1 }
 0x293   :  { %v2134_v44 = vmul.f32 0.16666667, %v1971_v16  ;;  %v5064_v27 = vpop.f32.mrf.mxu2  ;;  %v1899_v48 = vadd.f32 %v1898_v35, %v1680_v34  ;;  %v2356_v2 = vmin.f32 %v2272_v55, 1.0  ;;  %v3860_v35 = vld [vmem:[%s6328_s4 + $0x1b4] sm:$0xf0] }
 0x294   :  { %v1760_v34 = vadd.f32 %v5064_v27, %v1106_v28  ;;  %v3586_v33 = vor.u32 %v3860_v35, %v3585_v15 }
 0x295   :  { %3727 = vmatmul.msk.bf16.gmra.mxu3 %vm1534_vm2, %v3566_v0  ;;  %v2105_v38 = vmul.f32 0.16666667, %v1899_v48  ;;  %3712 = vmatmul.msk.bf16.gmra.mxu1 %vm1534_vm2, %v3446_v63  ;;  %v1686_v36 = vpop.f32.mrf.mxu0  ;;  %v2218_v51 = vadd.f32 0.5, %v2134_v44 }
 0x296   :  { %2675 = vperm.xlu0 %3901, %v2385_v30   ;;  %v1687_v63 = vadd.f32 %v1686_v36, %v1077_v20 }
 0x297   :  { %v2302_v49 = vmax.f32 %v2218_v51, 0.0  ;;  %v2189_v39 = vadd.f32 0.5, %v2105_v38 }
 0x298   :  { %v1973_v42 = vpop.f32.mrf.mxu3 }
 0x299   :  { %v1974_v18 = vadd.f32 %v1973_v42, %v1755_v52  ;;  %v2386_v54 = vmin.f32 %v2302_v49, 1.0  ;;  %v2273_v57 = vmax.f32 %v2189_v39, 0.0  ;;  %v3830_v52 = vld [vmem:[%s6328_s4 + $0xc4] sm:$0xf0]  ;;  %v1107_v49 = vld [vmem:[%s6329_s5 + $0x118] sm:$0xff]  ;;  %v1078_v39 = vld [vmem:[%s6329_s5 + $0x30] sm:$0xff] }
 0x29a   :  { %v1900_v24 = vpop.f32.mrf.mxu1  ;;  %v3857_v42 = vld [vmem:[%s6328_s4 + $0x1a4] sm:$0xf] }
 0x29b   :  { %v2135_v43 = vmul.f32 0.16666667, %v1974_v18  ;;  %v5083_v21 = vpop.f32.mrf.mxu2  ;;  %v1901_v46 = vadd.f32 %v1900_v24, %v1682_v32  ;;  %2680 = vperm.xlu1 %3902, %v2386_v54   ;;  %v2357_v56 = vmin.f32 %v2273_v57, 1.0  ;;  %v3466_v18 = vor.u32 %v3830_v52, %v3465_v50  ;;  %v3827_v24 = vld [vmem:[%s6328_s4 + $0xb4] sm:$0xf] }
 0x29c   :  { %v3459_v54 = vld [vmem:[%s6328_s4 + $0xb8] sm:$0xf0]  ;;  %v3582_v59 = vor.u32 %v3857_v42, %v3579_v31  ;;  %v3829_v50 = vld [vmem:[%s6328_s4 + $0xc4] sm:$0xf]  ;;  %v3467_v52 = vld [vmem:[%s6328_s4 + $0xc8] sm:$0xf0] }
 0x29d   :  { %v2219_v45 = vadd.f32 0.5, %v2135_v43  ;;  %v2106_v58 = vmul.f32 0.16666667, %v1901_v46  ;;  %v5094_v61 = vpop.f32.mrf.mxu0  ;;  %v1762_v46 = vadd.f32 %v5083_v21, %v1107_v49 }
 0x29e   :  { %2530 = vperm.xlu0 %3901, %v2356_v2  }
 0x29f   :  { %v2303_v53 = vmax.f32 %v2219_v45, 0.0  ;;  %v2190_v14 = vadd.f32 0.5, %v2106_v58  ;;  %v3462_v58 = vor.u32 %v3827_v24, %v3459_v54 }
 0x2a0   :  { %v1975_v12 = vpop.f32.mrf.mxu3  ;;  %1803 = vmatmul.bf16.gmra.mxu2 %v3578_v3  ;;  %1728 = vmatmul.bf16.gmra.mxu0 %v3458_v4  ;;  %v1690_v3 = vadd.f32 %v5094_v61, %v1078_v39  ;;  %v1079_v61 = vld [vmem:[%s6329_s5 + $0x38] sm:$0xff] }
 0x2a1   :  { %v1976_v17 = vadd.f32 %v1975_v12, %v1757_v10  ;;  %v2387_v37 = vmin.f32 %v2303_v53, 1.0  ;;  %v2274_v41 = vmax.f32 %v2190_v14, 0.0 }
 0x2a2   :  { %v1903_v26 = vpop.f32.mrf.mxu1 }
 0x2a3   :  { %v2136_v25 = vmul.f32 0.16666667, %v1976_v17  ;;  %v5109_v29 = vpop.f32.mrf.mxu2  ;;  %v1904_v9 = vadd.f32 %v1903_v26, %v1685_v47  ;;  %2685 = vperm.xlu2 %3903, %v2387_v37   ;;  %2535 = vperm.xlu1 %3902, %v2357_v56   ;;  %v2358_v44 = vmin.f32 %v2274_v41, 1.0  ;;  %v3593_v26 = vld [vmem:[%s6328_s4 + $0x1c0] sm:$0xf] }
 0x2a4   :  { %v1765_v12 = vadd.f32 %v5109_v29, %v1108_v60  ;;  %v3862_v37 = vld [vmem:[%s6328_s4 + $0x1c4] sm:$0xf0]  ;;  %v3473_v29 = vld [vmem:[%s6328_s4 + $0xd0] sm:$0xf]  ;;  %v3832_v41 = vld [vmem:[%s6328_s4 + $0xd4] sm:$0xf0] }
 0x2a5   :  { %v2220_v6 = vadd.f32 0.5, %v2136_v25  ;;  %3728 = vmatmul.msk.bf16.gmra.mxu3 %vm1534_vm2, %v3574_v22  ;;  %v2107_v7 = vmul.f32 0.16666667, %v1904_v9  ;;  %3713 = vmatmul.msk.bf16.gmra.mxu1 %vm1534_vm2, %v3454_v23  ;;  %v1691_v13 = vpop.f32.mrf.mxu0  ;;  %v3474_v15 = vor.u32 %v3832_v41, %v3473_v29  ;;  %v3864_v60 = vld [vmem:[%s6328_s4 + $0x1d4] sm:$0xf0] }
 0x2a6   :  { %v1692_v22 = vadd.f32 %v1691_v13, %v1079_v61  ;;  %v3595_v29 = vld [vmem:[%s6328_s4 + $0x1c8] sm:$0xf0]  ;;  %v3831_v41 = vld [vmem:[%s6328_s4 + $0xd4] sm:$0xf] }
 0x2a7   :  { %v2304_v16 = vmax.f32 %v2220_v6, 0.0  ;;  %v2191_v0 = vadd.f32 0.5, %v2107_v7 }
 0x2a8   :  { %v1978_v11 = vpop.f32.mrf.mxu3 }
 0x2a9   :  { %v2388_v48 = vmin.f32 %v2304_v16, 1.0  ;;  %v1979_v30 = vadd.f32 %v1978_v11, %v1760_v34  ;;  %v2275_v27 = vmax.f32 %v2191_v0, 0.0  ;;  %v1109_v0 = vld [vmem:[%s6329_s5 + $0x128] sm:$0xff]  ;;  %v1080_v11 = vld [vmem:[%s6329_s5 + $0x40] sm:$0xff] }
 0x2aa   :  { %v1905_v38 = vpop.f32.mrf.mxu1 }
 0x2ab   :  { %v2137_v36 = vmul.f32 0.16666667, %v1979_v30  ;;  %v5129_v51 = vpop.f32.mrf.mxu2  ;;  %v2359_v55 = vmin.f32 %v2275_v27, 1.0  ;;  %v1906_v32 = vadd.f32 %v1905_v38, %v1687_v63  ;;  %2690 = vperm.xlu0 %3901, %v2388_v48   ;;  %2540 = vperm.xlu1 %3902, %v2358_v44   ;;  %v3594_v63 = vor.u32 %v3862_v37, %v3593_v26  ;;  %v3859_v44 = vld [vmem:[%s6328_s4 + $0x1b4] sm:$0xf] }
 0x2ac   :  { %v3587_v27 = vld [vmem:[%s6328_s4 + $0x1b8] sm:$0xf0]  ;;  %v1767_v38 = vadd.f32 %v5129_v51, %v1109_v0  ;;  %v3861_v37 = vld [vmem:[%s6328_s4 + $0x1c4] sm:$0xf] }
 0x2ad   :  { %v2221_v19 = vadd.f32 0.5, %v2137_v36  ;;  %v2108_v40 = vmul.f32 0.16666667, %v1906_v32  ;;  %v1694_v2 = vpop.f32.mrf.mxu0  ;;  %2545 = vperm.xlu2 %3903, %v2359_v55  }
 0x2ae   :  { %v1695_v55 = vadd.f32 %v1694_v2, %v1080_v11  ;;  %v1081_v2 = vld [vmem:[%s6329_s5 + $0x48] sm:$0xff]  ;;  %v3598_v11 = vor.u32 %v3861_v37, %v3595_v29 }
 0x2af   :  { %v2305_v43 = vmax.f32 %v2221_v19, 0.0  ;;  %v2192_v62 = vadd.f32 0.5, %v2108_v40  ;;  %v1110_v19 = vld [vmem:[%s6329_s5 + $0x130] sm:$0xff] }
 0x2b0   :  { %v1980_v57 = vpop.f32.mrf.mxu3  ;;  %1808 = vmatmul.bf16.gmra.mxu2 %v3586_v33  ;;  %1733 = vmatmul.bf16.gmra.mxu0 %v3466_v18  ;;  %v3590_v33 = vor.u32 %v3859_v44, %v3587_v27  ;;  %v3470_v18 = vor.u32 %v3829_v50, %v3467_v52  ;;  %v1112_v44 = vld [vmem:[%s6329_s5 + $0x140] sm:$0xff] }
 0x2b1   :  { %v2389_v4 = vmin.f32 %v2305_v43, 1.0  ;;  %v1981_v45 = vadd.f32 %v1980_v57, %v1762_v46  ;;  %v2276_v8 = vmax.f32 %v2192_v62, 0.0 }
 0x2b2   :  { %v1908_v1 = vpop.f32.mrf.mxu1 }
 0x2b3   :  { %v2138_v5 = vmul.f32 0.16666667, %v1981_v45  ;;  %v1769_v10 = vpop.f32.mrf.mxu2  ;;  %v1909_v47 = vadd.f32 %v1908_v1, %v1690_v3  ;;  %v2360_v21 = vmin.f32 %v2276_v8, 1.0  ;;  %2695 = vperm.xlu1 %3902, %v2389_v4  }
 0x2b4   :  { %v1770_v62 = vadd.f32 %v1769_v10, %v1110_v19  ;;  %v3481_v10 = vld [vmem:[%s6328_s4 + $0xe0] sm:$0xf] }
 0x2b5   :  { %v2222_v53 = vadd.f32 0.5, %v2138_v5  ;;  %3729 = vmatmul.msk.bf16.gmra.mxu3 %vm1534_vm2, %v3582_v59  ;;  %v2109_v56 = vmul.f32 0.16666667, %v1909_v47  ;;  %3714 = vmatmul.msk.bf16.gmra.mxu1 %vm1534_vm2, %v3462_v58  ;;  %v1696_v14 = vpop.f32.mrf.mxu0  ;;  %v3601_v58 = vld [vmem:[%s6328_s4 + $0x1d0] sm:$0xf] }
 0x2b6   :  { %2550 = vperm.xlu2 %3903, %v2360_v21   ;;  %v1697_v4 = vadd.f32 %v1696_v14, %v1081_v2  ;;  %v3834_v47 = vld [vmem:[%s6328_s4 + $0xe4] sm:$0xf0] }
 0x2b7   :  { %v2193_v17 = vadd.f32 0.5, %v2109_v56  ;;  %v2306_v23 = vmax.f32 %v2222_v53, 0.0 }
 0x2b8   :  { %v1983_v28 = vpop.f32.mrf.mxu3 }
 0x2b9   :  { %v1984_v25 = vadd.f32 %v1983_v28, %v1765_v12  ;;  %v2277_v9 = vmax.f32 %v2193_v17, 0.0  ;;  %v2390_v16 = vmin.f32 %v2306_v23, 1.0  ;;  %v1111_v17 = vld [vmem:[%s6329_s5 + $0x138] sm:$0xff]  ;;  %v1082_v23 = vld [vmem:[%s6329_s5 + $0x50] sm:$0xff]  ;;  %v3482_v28 = vor.u32 %v3834_v47, %v3481_v10 }
 0x2ba   :  { %v1910_v20 = vpop.f32.mrf.mxu1 }
 0x2bb   :  { %v2139_v6 = vmul.f32 0.16666667, %v1984_v25  ;;  %v5172_v34 = vpop.f32.mrf.mxu2  ;;  %v2361_v7 = vmin.f32 %v2277_v9, 1.0  ;;  %v1911_v13 = vadd.f32 %v1910_v20, %v1692_v22  ;;  %v3602_v22 = vor.u32 %v3864_v60, %v3601_v58  ;;  %v3475_v20 = vld [vmem:[%s6328_s4 + $0xd8] sm:$0xf0] }
 0x2bc   :  { %v3603_v60 = vld [vmem:[%s6328_s4 + $0x1d8] sm:$0xf0] }
 0x2bd   :  { %v2223_v35 = vadd.f32 0.5, %v2139_v6  ;;  %v2110_v48 = vmul.f32 0.16666667, %v1911_v13  ;;  %v5183_v30 = vpop.f32.mrf.mxu0  ;;  %2555 = vperm.xlu0 %3901, %v2361_v7   ;;  %v1772_v6 = vadd.f32 %v5172_v34, %v1111_v17 }
 0x2be   :  { %2700 = vperm.xlu2 %3903, %v2390_v16   ;;  %v1700_v13 = vadd.f32 %v5183_v30, %v1082_v23  ;;  %v1083_v30 = vld [vmem:[%s6329_s5 + $0x58] sm:$0xff]  ;;  %v1114_v23 = vld [vmem:[%s6329_s5 + $0x150] sm:$0xff] }
 0x2bf   :  { %v2194_v36 = vadd.f32 0.5, %v2110_v48  ;;  %v2307_v32 = vmax.f32 %v2223_v35, 0.0  ;;  %v3478_v35 = vor.u32 %v3831_v41, %v3475_v20 }
 0x2c0   :  { %v1985_v49 = vpop.f32.mrf.mxu3  ;;  %1813 = vmatmul.bf16.gmra.mxu2 %v3594_v63  ;;  %1738 = vmatmul.bf16.gmra.mxu0 %v3474_v15 }
 0x2c1   :  { %v1986_v42 = vadd.f32 %v1985_v49, %v1767_v38  ;;  %v2278_v39 = vmax.f32 %v2194_v36, 0.0  ;;  %v2391_v51 = vmin.f32 %v2307_v32, 1.0 }
 0x2c2   :  { %v1913_v31 = vpop.f32.mrf.mxu1 }
 0x2c3   :  { %v2140_v40 = vmul.f32 0.16666667, %v1986_v42  ;;  %v5198_v24 = vpop.f32.mrf.mxu2  ;;  %v1914_v54 = vadd.f32 %v1913_v31, %v1695_v55  ;;  %v2362_v43 = vmin.f32 %v2278_v39, 1.0  ;;  %v3609_v31 = vld [vmem:[%s6328_s4 + $0x1e0] sm:$0xf] }
 0x2c4   :  { %v1775_v55 = vadd.f32 %v5198_v24, %v1112_v44 }
 0x2c5   :  { %v2224_v46 = vadd.f32 0.5, %v2140_v40  ;;  %3730 = vmatmul.msk.bf16.gmra.mxu3 %vm1534_vm2, %v3590_v33  ;;  %v2111_v3 = vmul.f32 0.16666667, %v1914_v54  ;;  %3715 = vmatmul.msk.bf16.gmra.mxu1 %vm1534_vm2, %v3470_v18  ;;  %v1701_v57 = vpop.f32.mrf.mxu0  ;;  %v3866_v40 = vld [vmem:[%s6328_s4 + $0x1e4] sm:$0xf0] }
 0x2c6   :  { %2560 = vperm.xlu1 %3902, %v2362_v43   ;;  %2705 = vperm.xlu0 %3901, %v2391_v51   ;;  %v1702_v33 = vadd.f32 %v1701_v57, %v1083_v30  ;;  %v3610_v57 = vor.u32 %v3866_v40, %v3609_v31  ;;  %v1115_v30 = vld [vmem:[%s6329_s5 + $0x158] sm:$0xff] }
 0x2c7   :  { %v2195_v59 = vadd.f32 0.5, %v2111_v3  ;;  %v2308_v45 = vmax.f32 %v2224_v46, 0.0  ;;  %v1113_v3 = vld [vmem:[%s6329_s5 + $0x148] sm:$0xff] }
 0x2c8   :  { %v1988_v8 = vpop.f32.mrf.mxu3 }
 0x2c9   :  { %v1989_v1 = vadd.f32 %v1988_v8, %v1770_v62  ;;  %v2279_v5 = vmax.f32 %v2195_v59, 0.0  ;;  %v2392_v14 = vmin.f32 %v2308_v45, 1.0  ;;  %v1084_v59 = vld [vmem:[%s6329_s5 + $0x60] sm:$0xff]  ;;  %v3863_v45 = vld [vmem:[%s6328_s4 + $0x1d4] sm:$0xf] }
 0x2ca   :  { %v1915_v21 = vpop.f32.mrf.mxu1 }
 0x2cb   :  { %v2141_v61 = vmul.f32 0.16666667, %v1989_v1  ;;  %v5217_v53 = vpop.f32.mrf.mxu2  ;;  %v2363_v12 = vmin.f32 %v2279_v5, 1.0  ;;  %v1916_v56 = vadd.f32 %v1915_v21, %v1697_v4  ;;  %v3833_v1 = vld [vmem:[%s6328_s4 + $0xe4] sm:$0xf] }
 0x2cc   :  { %v3483_v5 = vld [vmem:[%s6328_s4 + $0xe8] sm:$0xf0]  ;;  %v1777_v10 = vadd.f32 %v5217_v53, %v1113_v3 }
 0x2cd   :  { %v2225_v26 = vadd.f32 0.5, %v2141_v61  ;;  %v2112_v25 = vmul.f32 0.16666667, %v1916_v56  ;;  %v1704_v9 = vpop.f32.mrf.mxu0  ;;  %2565 = vperm.xlu2 %3903, %v2363_v12   ;;  %v1085_v53 = vld [vmem:[%s6329_s5 + $0x68] sm:$0xff] }
 0x2ce   :  { %2710 = vperm.xlu1 %3902, %v2392_v14   ;;  %v1705_v21 = vadd.f32 %v1704_v9, %v1084_v59  ;;  %v3606_v14 = vor.u32 %v3863_v45, %v3603_v60 }
 0x2cf   :  { %v2196_v7 = vadd.f32 0.5, %v2112_v25  ;;  %v2309_v16 = vmax.f32 %v2225_v26, 0.0 }
 0x2d0   :  { %v1990_v0 = vpop.f32.mrf.mxu3  ;;  %1818 = vmatmul.bf16.gmra.mxu2 %v3602_v22  ;;  %1743 = vmatmul.bf16.gmra.mxu0 %v3482_v28  ;;  %v3486_v22 = vor.u32 %v3833_v1, %v3483_v5 }
 0x2d1   :  { %v1991_v63 = vadd.f32 %v1990_v0, %v1772_v6  ;;  %v2280_v15 = vmax.f32 %v2196_v7, 0.0  ;;  %v2393_v34 = vmin.f32 %v2309_v16, 1.0 }
 0x2d2   :  { %v1918_v48 = vpop.f32.mrf.mxu1 }
 0x2d3   :  { %v2142_v27 = vmul.f32 0.16666667, %v1991_v63  ;;  %v1779_v50 = vpop.f32.mrf.mxu2  ;;  %v1919_v52 = vadd.f32 %v1918_v48, %v1700_v13  ;;  %v2364_v38 = vmin.f32 %v2280_v15, 1.0  ;;  %v3617_v15 = vld [vmem:[%s6328_s4 + $0x1f0] sm:$0xf] }
 0x2d4   :  { %v1780_v20 = vadd.f32 %v1779_v50, %v1114_v23  ;;  %v1117_v23 = vld [vmem:[%s6329_s5 + $0x168] sm:$0xff] }
 0x2d5   :  { %v2226_v36 = vadd.f32 0.5, %v2142_v27  ;;  %3731 = vmatmul.msk.bf16.gmra.mxu3 %vm1534_vm2, %v3598_v11  ;;  %v2113_v32 = vmul.f32 0.16666667, %v1919_v52  ;;  %3716 = vmatmul.msk.bf16.gmra.mxu1 %vm1534_vm2, %v3478_v35  ;;  %v1706_v49 = vpop.f32.mrf.mxu0  ;;  %v3868_v35 = vld [vmem:[%s6328_s4 + $0x1f4] sm:$0xf0] }
 0x2d6   :  { %2570 = vperm.xlu0 %3901, %v2364_v38   ;;  %2715 = vperm.xlu2 %3903, %v2393_v34   ;;  %v1707_v16 = vadd.f32 %v1706_v49, %v1085_v53  ;;  %v2471_v53 = vld [vmem:[%s6330_s0 + $0x100] sm:$0xff] }
 0x2d7   :  { %v2197_v42 = vadd.f32 0.5, %v2113_v32  ;;  %v2310_v39 = vmax.f32 %v2226_v36, 0.0  ;;  %v3618_v36 = vor.u32 %v3868_v35, %v3617_v15 }
 0x2d8   :  { %v1993_v18 = vpop.f32.mrf.mxu3 }
 0x2d9   :  { %v1994_v19 = vadd.f32 %v1993_v18, %v1775_v55  ;;  %v2281_v24 = vmax.f32 %v2197_v42, 0.0  ;;  %v2394_v62 = vmin.f32 %v2310_v39, 1.0  ;;  %v1086_v55 = vld [vmem:[%s6329_s5 + $0x70] sm:$0xff]  ;;  %v3611_v39 = vld [vmem:[%s6328_s4 + $0x1e8] sm:$0xf0] }
 0x2da   :  { %v1920_v54 = vpop.f32.mrf.mxu1 }
 0x2db   :  { %v2143_v51 = vmul.f32 0.16666667, %v1994_v19  ;;  %v5254_v43 = vpop.f32.mrf.mxu2  ;;  %v2365_v2 = vmin.f32 %v2281_v24, 1.0  ;;  %v1921_v46 = vadd.f32 %v1920_v54, %v1702_v33  ;;  %v3865_v33 = vld [vmem:[%s6328_s4 + $0x1e4] sm:$0xf] }
 0x2dc   :  { %v1782_v19 = vadd.f32 %v5254_v43, %v1115_v30  ;;  %v1087_v43 = vld [vmem:[%s6329_s5 + $0x78] sm:$0xff] }
 0x2dd   :  { %v2227_v4 = vadd.f32 0.5, %v2143_v51  ;;  %v2114_v8 = vmul.f32 0.16666667, %v1921_v46  ;;  %v1709_v58 = vpop.f32.mrf.mxu0  ;;  %2575 = vperm.xlu1 %3902, %v2365_v2   ;;  %v3614_v51 = vor.u32 %v3865_v33, %v3611_v39  ;;  %v1116_v46 = vld [vmem:[%s6329_s5 + $0x160] sm:$0xff] }
 0x2de   :  { %2720 = vperm.xlu0 %3901, %v2394_v62   ;;  %v1710_v40 = vadd.f32 %v1709_v58, %v1086_v55 }
 0x2df   :  { %v2198_v47 = vadd.f32 0.5, %v2114_v8  ;;  %v2311_v61 = vmax.f32 %v2227_v4, 0.0 }
 0x2e0   :  { %v1995_v12 = vpop.f32.mrf.mxu3  ;;  %1823 = vmatmul.bf16.gmra.mxu2 %v3610_v57 }
 0x2e1   :  { %v1996_v56 = vadd.f32 %v1995_v12, %v1777_v10  ;;  %v2282_v17 = vmax.f32 %v2198_v47, 0.0  ;;  %v2395_v29 = vmin.f32 %v2311_v61, 1.0  ;;  %v3625_v12 = vld [vmem:[%s6328_s4 + $0x200] sm:$0xf] }
 0x2e2   :  { %v1923_v28 = vpop.f32.mrf.mxu1 }
 0x2e3   :  { %v2144_v26 = vmul.f32 0.16666667, %v1996_v56  ;;  %v1784_v37 = vpop.f32.mrf.mxu2  ;;  %v1924_v25 = vadd.f32 %v1923_v28, %v1705_v21  ;;  %v2366_v41 = vmin.f32 %v2282_v17, 1.0  ;;  %v3870_v56 = vld [vmem:[%s6328_s4 + $0x204] sm:$0xf0] }
 0x2e4   :  { %v1785_v58 = vadd.f32 %v1784_v37, %v1116_v46 }
 0x2e5   :  { %v2228_v9 = vadd.f32 0.5, %v2144_v26  ;;  %3732 = vmatmul.msk.bf16.gmra.mxu3 %vm1534_vm2, %v3606_v14  ;;  %v2115_v6 = vmul.f32 0.16666667, %v1924_v25  ;;  %3717 = vmatmul.msk.bf16.gmra.mxu1 %vm1534_vm2, %v3486_v22  ;;  %v1711_v7 = vpop.f32.mrf.mxu0 }
 0x2e6   :  { %2725 = vperm.xlu1 %3902, %v2395_v29   ;;  %2580 = vperm.xlu2 %3903, %v2366_v41   ;;  %v1712_v10 = vadd.f32 %v1711_v7, %v1087_v43  ;;  %v3626_v29 = vor.u32 %v3870_v56, %v3625_v12  ;;  %v1088_v41 = vld [vmem:[%s6329_s5 + $0x80] sm:$0xff] }
 0x2e7   :  { %v2199_v13 = vadd.f32 0.5, %v2115_v6  ;;  %v2312_v0 = vmax.f32 %v2228_v9, 0.0 }
 0x2e8   :  { %v1998_v63 = vpop.f32.mrf.mxu3 }
 0x2e9   :  { %v1999_v11 = vadd.f32 %v1998_v63, %v1780_v20  ;;  %v2283_v44 = vmax.f32 %v2199_v13, 0.0  ;;  %v2396_v38 = vmin.f32 %v2312_v0, 1.0  ;;  %v3867_v13 = vld [vmem:[%s6328_s4 + $0x1f4] sm:$0xf] }
 0x2ea   :  { %v1925_v48 = vpop.f32.mrf.mxu1 }
 0x2eb   :  { %v2145_v27 = vmul.f32 0.16666667, %v1999_v11  ;;  %v1786_v50 = vpop.f32.mrf.mxu2  ;;  %v2367_v52 = vmin.f32 %v2283_v44, 1.0  ;;  %v1926_v34 = vadd.f32 %v1925_v48, %v1707_v16  ;;  %v3619_v16 = vld [vmem:[%s6328_s4 + $0x1f8] sm:$0xf0] }
 0x2ec   :  { %v1787_v7 = vadd.f32 %v1786_v50, %v1117_v23  ;;  %v3622_v50 = vor.u32 %v3867_v13, %v3619_v16 }
 0x2ed   :  { %v2229_v32 = vadd.f32 0.5, %v2145_v27  ;;  %v2116_v49 = vmul.f32 0.16666667, %v1926_v34  ;;  %v1714_v42 = vpop.f32.mrf.mxu0  ;;  %2585 = vperm.xlu0 %3901, %v2367_v52   ;;  %v1118_v34 = vld [vmem:[%s6329_s5 + $0x170] sm:$0xff] }
 0x2ee   :  { %2730 = vperm.xlu2 %3903, %v2396_v38   ;;  %v1715_v15 = vadd.f32 %v1714_v42, %v1088_v41  ;;  %v1089_v42 = vld [vmem:[%s6329_s5 + $0x88] sm:$0xff] }
 0x2ef   :  { %v2313_v18 = vmax.f32 %v2229_v32, 0.0  ;;  %v2200_v31 = vadd.f32 0.5, %v2116_v49 }
 0x2f0   :  { %v2000_v24 = vpop.f32.mrf.mxu3  ;;  %1828 = vmatmul.bf16.gmra.mxu2 %v3618_v36 }
 0x2f1   :  { %v2001_v54 = vadd.f32 %v2000_v24, %v1782_v19  ;;  %v2284_v2 = vmax.f32 %v2200_v31, 0.0  ;;  %v2397_v3 = vmin.f32 %v2313_v18, 1.0  ;;  %v2469_v31 = vld [vmem:[%s6330_s0 + $0xf0] sm:$0xff] }
 0x2f2   :  { %v1928_v62 = vpop.f32.mrf.mxu1 }
 0x2f3   :  { %v2146_v57 = vmul.f32 0.16666667, %v2001_v54  ;;  %v1789_v59 = vpop.f32.mrf.mxu2  ;;  %v1929_v4 = vadd.f32 %v1928_v62, %v1710_v40  ;;  %v2368_v45 = vmin.f32 %v2284_v2, 1.0 }
 0x2f4   :  { %v1790_v39 = vadd.f32 %v1789_v59, %v1118_v34  ;;  %v2474_v34 = vld [vmem:[%s6330_s0 + $0x118] sm:$0xff] }
 0x2f5   :  { %v2230_v8 = vadd.f32 0.5, %v2146_v57  ;;  %3733 = vmatmul.msk.bf16.gmra.mxu3 %vm1534_vm2, %v3614_v51  ;;  %v2117_v60 = vmul.f32 0.16666667, %v1929_v4  ;;  %v1716_v1 = vpop.f32.mrf.mxu0  ;;  %2735 = vperm.xlu0 %3901, %v2397_v3   ;;  %v3633_v3 = vld [vmem:[%s6328_s4 + $0x210] sm:$0xf] }
 0x2f6   :  { %2590 = vperm.xlu1 %3902, %v2368_v45   ;;  %v1717_v24 = vadd.f32 %v1716_v1, %v1089_v42  ;;  %v3872_v57 = vld [vmem:[%s6328_s4 + $0x214] sm:$0xf0] }
 0x2f7   :  { %v2201_v5 = vadd.f32 0.5, %v2117_v60  ;;  %v2314_v47 = vmax.f32 %v2230_v8, 0.0  ;;  %v1119_v8 = vld [vmem:[%s6329_s5 + $0x178] sm:$0xff] }
 0x2f8   :  { %v2003_v21 = vpop.f32.mrf.mxu3 }
 0x2f9   :  { %v2004_v61 = vadd.f32 %v2003_v21, %v1785_v58  ;;  %v2285_v14 = vmax.f32 %v2201_v5, 0.0  ;;  %v2398_v25 = vmin.f32 %v2314_v47, 1.0  ;;  %v1090_v47 = vld [vmem:[%s6329_s5 + $0x90] sm:$0xff]  ;;  %v2470_v21 = vld [vmem:[%s6330_s0 + $0xf8] sm:$0xff] }
 0x2fa   :  { %v1930_v17 = vpop.f32.mrf.mxu1 }
 0x2fb   :  { %v2147_v22 = vmul.f32 0.16666667, %v2004_v61  ;;  %v5318_v28 = vpop.f32.mrf.mxu2  ;;  %v2369_v26 = vmin.f32 %v2285_v14, 1.0  ;;  %v1931_v37 = vadd.f32 %v1930_v17, %v1712_v10  ;;  %v3634_v10 = vor.u32 %v3872_v57, %v3633_v3  ;;  %v3869_v17 = vld [vmem:[%s6328_s4 + $0x204] sm:$0xf]  ;;  %v1121_v3 = vld [vmem:[%s6329_s5 + $0x188] sm:$0xff] }
 0x2fc   :  { %v1792_v14 = vadd.f32 %v5318_v28, %v1119_v8 }
 0x2fd   :  { %v2231_v9 = vadd.f32 0.5, %v2147_v22  ;;  %v2118_v20 = vmul.f32 0.16666667, %v1931_v37  ;;  %v5326_v6 = vpop.f32.mrf.mxu0  ;;  %2595 = vperm.xlu2 %3903, %v2369_v26   ;;  %v2686_v0 = vpop.permute.xlu2 %2685  ;;  %v3627_v22 = vld [vmem:[%s6328_s4 + $0x208] sm:$0xf0] }
 0x2fe   :  { %2740 = vperm.xlu1 %3902, %v2398_v25   ;;  %v2975_v35 = vmul.f32 %v2686_v0, %v2471_v53  ;;  %v1720_v25 = vadd.f32 %v5326_v6, %v1090_v47 }
 0x2ff   :  { %v2315_v63 = vmax.f32 %v2231_v9, 0.0  ;;  %v2202_v11 = vadd.f32 0.5, %v2118_v20  ;;  %v5334_v44 = vpop.permute.xlu0 %2525  ;;  %v3630_v9 = vor.u32 %v3869_v17, %v3627_v22 }
 0x300   :  { %v2005_v48 = vpop.f32.mrf.mxu3  ;;  %1833 = vmatmul.bf16.gmra.mxu2 %v3626_v29  ;;  %3060 = vst.msk [vmem:[%s6331_s6 + $0x100] sm:$0xff] %vm3027_vm3, %v2975_v35  ;;  %v1091_v35 = vld [vmem:[%s6329_s5 + $0x98] sm:$0xff] }
 0x301   :  { %v2006_v27 = vadd.f32 %v2005_v48, %v1787_v7  ;;  %v2286_v52 = vmax.f32 %v2202_v11, 0.0  ;;  %v2399_v30 = vmin.f32 %v2315_v63, 1.0  ;;  %v1120_v7 = vld [vmem:[%s6329_s5 + $0x180] sm:$0xff] }
 0x302   :  { %v1933_v38 = vpop.f32.mrf.mxu1 }
 0x303   :  { %v2148_v36 = vmul.f32 0.16666667, %v2006_v27  ;;  %v5343_v55 = vpop.f32.mrf.mxu2  ;;  %v1934_v32 = vadd.f32 %v1933_v38, %v1715_v15  ;;  %v2370_v49 = vmin.f32 %v2286_v52, 1.0 }
 0x304   :  { %v1795_v27 = vadd.f32 %v5343_v55, %v1120_v7  ;;  %v3641_v55 = vld [vmem:[%s6328_s4 + $0x220] sm:$0xf] }
 0x305   :  { %v2232_v33 = vadd.f32 0.5, %v2148_v36  ;;  %3734 = vmatmul.msk.bf16.gmra.mxu3 %vm1534_vm2, %v3622_v50  ;;  %v2119_v18 = vmul.f32 0.16666667, %v1934_v32  ;;  %v5349_v19 = vpop.f32.mrf.mxu0  ;;  %2745 = vperm.xlu2 %3903, %v2399_v30  }
 0x306   :  { %2600 = vperm.xlu0 %3901, %v2370_v49   ;;  %v1722_v36 = vadd.f32 %v5349_v19, %v1091_v35 }
 0x307   :  { %v2203_v40 = vadd.f32 0.5, %v2119_v18  ;;  %v5354_v54 = vpop.permute.xlu2 %2545  ;;  %v2316_v51 = vmax.f32 %v2232_v33, 0.0 }
 0x308   :  { %v2008_v2 = vpop.f32.mrf.mxu3  ;;  %v2676_v46 = vpop.permute.xlu0 %2675 }
 0x309   :  { %v2009_v62 = vadd.f32 %v2008_v2, %v1790_v39  ;;  %v2287_v59 = vmax.f32 %v2203_v40, 0.0  ;;  %v2973_v4 = vmul.f32 %v2676_v46, %v2469_v31  ;;  %v2400_v5 = vmin.f32 %v2316_v51, 1.0  ;;  %v3874_v39 = vld [vmem:[%s6328_s4 + $0x224] sm:$0xf0] }
 0x30a   :  { %v1935_v45 = vpop.f32.mrf.mxu1  ;;  %v2472_v46 = vld [vmem:[%s6330_s0 + $0x108] sm:$0xff]  ;;  %v3642_v57 = vor.u32 %v3874_v39, %v3641_v55  ;;  %v1123_v39 = vld [vmem:[%s6329_s5 + $0x198] sm:$0xff] }
 0x30b   :  { %v2149_v43 = vmul.f32 0.16666667, %v2009_v62  ;;  %v5365_v58 = vpop.f32.mrf.mxu2  ;;  %v2371_v60 = vmin.f32 %v2287_v59, 1.0  ;;  %v1936_v1 = vadd.f32 %v1935_v45, %v1717_v24  ;;  %3058 = vst.msk [vmem:[%s6331_s6 + $0xf0] sm:$0xff] %vm3027_vm3, %v2973_v4  ;;  %v1092_v59 = vld [vmem:[%s6329_s5 + $0xa0] sm:$0xff] }
 0x30d   :  { %v2233_v61 = vadd.f32 0.5, %v2149_v43  ;;  %v2120_v12 = vmul.f32 0.16666667, %v1936_v1  ;;  %v5377_v56 = vpop.f32.mrf.mxu0  ;;  %2605 = vperm.xlu1 %3902, %v2371_v60   ;;  %v2681_v23 = vpop.permute.xlu1 %2680  ;;  %v3871_v60 = vld [vmem:[%s6328_s4 + $0x214] sm:$0xf] }
 0x30e   :  { %2750 = vperm.xlu0 %3901, %v2400_v5   ;;  %v2974_v29 = vmul.f32 %v2681_v23, %v2470_v21  ;;  %v3635_v1 = vld [vmem:[%s6328_s4 + $0x218] sm:$0xf0]  ;;  %v1797_v21 = vadd.f32 %v5365_v58, %v1121_v3 }
 0x30f   :  { %v2317_v26 = vmax.f32 %v2233_v61, 0.0  ;;  %v2204_v37 = vadd.f32 0.5, %v2120_v12  ;;  %v1725_v12 = vadd.f32 %v5377_v56, %v1092_v59  ;;  %v3638_v22 = vor.u32 %v3871_v60, %v3635_v1 }
 0x310   :  { %v2010_v41 = vpop.f32.mrf.mxu3  ;;  %1838 = vmatmul.bf16.gmra.mxu2 %v3634_v10  ;;  %v5387_v53 = vpop.permute.xlu2 %2550  ;;  %3059 = vst.msk [vmem:[%s6331_s6 + $0xf8] sm:$0xff] %vm3027_vm3, %v2974_v29 }
 0x311   :  { %v2011_v28 = vadd.f32 %v2010_v41, %v1792_v14  ;;  %v2288_v20 = vmax.f32 %v2204_v37, 0.0  ;;  %v2401_v16 = vmin.f32 %v2317_v26, 1.0  ;;  %v5398_v11 = vpop.permute.xlu0 %2530  ;;  %v1122_v26 = vld [vmem:[%s6329_s5 + $0x190] sm:$0xff] }
 0x312   :  { %v1938_v13 = vpop.f32.mrf.mxu1 }
 0x313   :  { %v2150_v6 = vmul.f32 0.16666667, %v2011_v28  ;;  %v5396_v0 = vpop.f32.mrf.mxu2  ;;  %v1939_v63 = vadd.f32 %v1938_v13, %v1720_v25  ;;  %v2372_v15 = vmin.f32 %v2288_v20, 1.0  ;;  %v1093_v28 = vld [vmem:[%s6329_s5 + $0xa8] sm:$0xff] }
 0x314   :  { %v1800_v7 = vadd.f32 %v5396_v0, %v1122_v26  ;;  %v3876_v0 = vld [vmem:[%s6328_s4 + $0x234] sm:$0xf0] }
 0x315   :  { %v2234_v48 = vadd.f32 0.5, %v2150_v6  ;;  %3735 = vmatmul.msk.bf16.gmra.mxu3 %vm1534_vm2, %v3630_v9  ;;  %v2121_v50 = vmul.f32 0.16666667, %v1939_v63  ;;  %v5405_v52 = vpop.f32.mrf.mxu0  ;;  %2755 = vperm.xlu1 %3902, %v2401_v16   ;;  %v5410_v38 = vpop.permute.xlu1 %2535  ;;  %v2473_v9 = vld [vmem:[%s6330_s0 + $0x110] sm:$0xff] }
 0x316   :  { %2610 = vperm.xlu2 %3903, %v2372_v15   ;;  %v1727_v63 = vadd.f32 %v5405_v52, %v1093_v28 }
 0x317   :  { %v2205_v30 = vadd.f32 0.5, %v2121_v50  ;;  %v2318_v32 = vmax.f32 %v2234_v48, 0.0 }
 0x318   :  { %v2013_v49 = vpop.f32.mrf.mxu3  ;;  %v2701_v42 = vpop.permute.xlu2 %2700 }
 0x319   :  { %v2014_v33 = vadd.f32 %v2013_v49, %v1795_v27  ;;  %v2289_v18 = vmax.f32 %v2205_v30, 0.0  ;;  %v2978_v31 = vmul.f32 %v2701_v42, %v2474_v34  ;;  %v2402_v62 = vmin.f32 %v2318_v32, 1.0  ;;  %v3649_v30 = vld [vmem:[%s6328_s4 + $0x230] sm:$0xf] }
 0x31a   :  { %v1940_v40 = vpop.f32.mrf.mxu1 }
 0x31b   :  { %v2151_v24 = vmul.f32 0.16666667, %v2014_v33  ;;  %v5419_v51 = vpop.f32.mrf.mxu2  ;;  %v2373_v2 = vmin.f32 %v2289_v18, 1.0  ;;  %v1941_v19 = vadd.f32 %v1940_v40, %v1722_v36  ;;  %3063 = vst.msk [vmem:[%s6331_s6 + $0x118] sm:$0xff] %vm3027_vm3, %v2978_v31  ;;  %v3650_v18 = vor.u32 %v3876_v0, %v3649_v30  ;;  %v1094_v31 = vld [vmem:[%s6329_s5 + $0xb0] sm:$0xff] }
 0x31c   :  { %v1802_v3 = vadd.f32 %v5419_v51, %v1123_v39  ;;  %v3651_v39 = vld [vmem:[%s6328_s4 + $0x238] sm:$0xf0] }
 0x31d   :  { %v2235_v4 = vadd.f32 0.5, %v2151_v24  ;;  %v2122_v45 = vmul.f32 0.16666667, %v1941_v19  ;;  %v5434_v43 = vpop.f32.mrf.mxu0  ;;  %2615 = vperm.xlu0 %3901, %v2373_v2   ;;  %v2691_v8 = vpop.permute.xlu0 %2690  ;;  %v3873_v2 = vld [vmem:[%s6328_s4 + $0x224] sm:$0xf] }
 0x31e   :  { %2760 = vperm.xlu2 %3903, %v2402_v62   ;;  %v2976_v5 = vmul.f32 %v2691_v8, %v2472_v46  ;;  %v5442_v10 = vpop.permute.xlu1 %2540  ;;  %v3643_v19 = vld [vmem:[%s6328_s4 + $0x228] sm:$0xf0]  ;;  %v2477_v46 = vld [vmem:[%s6330_s0 + $0x130] sm:$0xff]  ;;  %v1730_v59 = vadd.f32 %v5434_v43, %v1094_v31 }
 0x31f   :  { %v2319_v47 = vmax.f32 %v2235_v4, 0.0  ;;  %v2206_v61 = vadd.f32 0.5, %v2122_v45  ;;  %v3646_v1 = vor.u32 %v3873_v2, %v3643_v19 }
 0x320   :  { %v2015_v14 = vpop.f32.mrf.mxu3  ;;  %1843 = vmatmul.bf16.gmra.mxu2 %v3642_v57  ;;  %3061 = vst.msk [vmem:[%s6331_s6 + $0x108] sm:$0xff] %vm3027_vm3, %v2976_v5 }
 0x321   :  { %v2016_v17 = vadd.f32 %v2015_v14, %v1797_v21  ;;  %v2290_v23 = vmax.f32 %v2206_v61, 0.0  ;;  %v2403_v25 = vmin.f32 %v2319_v47, 1.0  ;;  %v1124_v61 = vld [vmem:[%s6329_s5 + $0x1a0] sm:$0xff] }
 0x322   :  { %v1943_v37 = vpop.f32.mrf.mxu1 }
 0x323   :  { %v2152_v58 = vmul.f32 0.16666667, %v2016_v17  ;;  %v5453_v29 = vpop.f32.mrf.mxu2  ;;  %v1944_v56 = vadd.f32 %v1943_v37, %v1725_v12  ;;  %v2374_v41 = vmin.f32 %v2290_v23, 1.0  ;;  %v1095_v23 = vld [vmem:[%s6329_s5 + $0xb8] sm:$0xff] }
 0x324   :  { %v1805_v37 = vadd.f32 %v5453_v29, %v1124_v61  ;;  %v3878_v29 = vld [vmem:[%s6328_s4 + $0x244] sm:$0xf0] }
 0x325   :  { %v2236_v20 = vadd.f32 0.5, %v2152_v58  ;;  %3736 = vmatmul.msk.bf16.gmra.mxu3 %vm1534_vm2, %v3638_v22  ;;  %v2123_v13 = vmul.f32 0.16666667, %v1944_v56  ;;  %2765 = vperm.xlu0 %3901, %v2403_v25   ;;  %v1731_v15 = vpop.f32.mrf.mxu0  ;;  %v1097_v61 = vld [vmem:[%s6329_s5 + $0xc8] sm:$0xff] }
 0x326   :  { %2620 = vperm.xlu1 %3902, %v2374_v41   ;;  %v2696_v16 = vpop.permute.xlu1 %2695  ;;  %v1732_v56 = vadd.f32 %v1731_v15, %v1095_v23  ;;  %v2475_v41 = vld [vmem:[%s6330_s0 + $0x120] sm:$0xff] }
 0x327   :  { %v2207_v6 = vadd.f32 0.5, %v2123_v13  ;;  %v2977_v35 = vmul.f32 %v2696_v16, %v2473_v9  ;;  %v5464_v48 = vpop.permute.xlu2 %2565  ;;  %v2320_v27 = vmax.f32 %v2236_v20, 0.0  ;;  %v3657_v13 = vld [vmem:[%s6328_s4 + $0x240] sm:$0xf] }
 0x328   :  { %v2018_v50 = vpop.f32.mrf.mxu3 }
 0x329   :  { %v2019_v34 = vadd.f32 %v2018_v50, %v1800_v7  ;;  %v2291_v36 = vmax.f32 %v2207_v6, 0.0  ;;  %3062 = vst.msk [vmem:[%s6331_s6 + $0x110] sm:$0xff] %vm3027_vm3, %v2977_v35  ;;  %v2404_v55 = vmin.f32 %v2320_v27, 1.0 }
 0x32a   :  { %v1945_v32 = vpop.f32.mrf.mxu1 }
 0x32b   :  { %v2153_v52 = vmul.f32 0.16666667, %v2019_v34  ;;  %v5476_v49 = vpop.f32.mrf.mxu2  ;;  %v2375_v42 = vmin.f32 %v2291_v36, 1.0  ;;  %v1946_v33 = vadd.f32 %v1945_v32, %v1727_v63  ;;  %v1125_v36 = vld [vmem:[%s6329_s5 + $0x1a8] sm:$0xff]  ;;  %v3658_v32 = vor.u32 %v3878_v29, %v3657_v13 }
 0x32d   :  { %v2237_v40 = vadd.f32 0.5, %v2153_v52  ;;  %v2124_v24 = vmul.f32 0.16666667, %v1946_v33  ;;  %2625 = vperm.xlu2 %3903, %v2375_v42   ;;  %v1734_v47 = vpop.f32.mrf.mxu0  ;;  %v1096_v52 = vld [vmem:[%s6329_s5 + $0xc0] sm:$0xff] }
 0x32e   :  { %2770 = vperm.xlu1 %3902, %v2404_v55   ;;  %v3875_v55 = vld [vmem:[%s6328_s4 + $0x234] sm:$0xf]  ;;  %v1735_v2 = vadd.f32 %v1734_v47, %v1096_v52  ;;  %v2478_v52 = vld [vmem:[%s6330_s0 + $0x138] sm:$0xff] }
 0x32f   :  { %v2321_v62 = vmax.f32 %v2237_v40, 0.0  ;;  %v2208_v57 = vadd.f32 0.5, %v2124_v24  ;;  %v5495_v4 = vpop.permute.xlu0 %2555  ;;  %v1807_v40 = vadd.f32 %v5476_v49, %v1125_v36  ;;  %v3877_v36 = vld [vmem:[%s6328_s4 + $0x244] sm:$0xf] }
 0x330   :  { %v2020_v45 = vpop.f32.mrf.mxu3  ;;  %1848 = vmatmul.bf16.gmra.mxu2 %v3650_v18  ;;  %v2716_v8 = vpop.permute.xlu2 %2715  ;;  %v2476_v18 = vld [vmem:[%s6330_s0 + $0x128] sm:$0xff] }
 0x331   :  { %v2021_v60 = vadd.f32 %v2020_v45, %v1802_v3  ;;  %v2292_v5 = vmax.f32 %v2208_v57, 0.0  ;;  %v2981_v21 = vmul.f32 %v2716_v8, %v2477_v46  ;;  %v2405_v14 = vmin.f32 %v2321_v62, 1.0  ;;  %v1126_v8 = vld [vmem:[%s6329_s5 + $0x1b0] sm:$0xff] }
 0x332   :  { %v1948_v12 = vpop.f32.mrf.mxu1  ;;  %v3654_v3 = vor.u32 %v3875_v55, %v3651_v39 }
 0x333   :  { %v2154_v51 = vmul.f32 0.16666667, %v2021_v60  ;;  %v5500_v17 = vpop.f32.mrf.mxu2  ;;  %v1949_v43 = vadd.f32 %v1948_v12, %v1730_v59  ;;  %v2376_v22 = vmin.f32 %v2292_v5, 1.0  ;;  %3066 = vst.msk [vmem:[%s6331_s6 + $0x130] sm:$0xff] %vm3027_vm3, %v2981_v21 }
 0x335   :  { %v2238_v26 = vadd.f32 0.5, %v2154_v51  ;;  %3737 = vmatmul.msk.bf16.gmra.mxu3 %vm1534_vm2, %v3646_v1  ;;  %v2125_v25 = vmul.f32 0.16666667, %v1949_v43  ;;  %2775 = vperm.xlu2 %3903, %v2405_v14   ;;  %v1736_v30 = vpop.f32.mrf.mxu0  ;;  %v1810_v14 = vadd.f32 %v5500_v17, %v1126_v8  ;;  %v3880_v17 = vld [vmem:[%s6328_s4 + $0x254] sm:$0xf0] }
 0x336   :  { %2630 = vperm.xlu0 %3901, %v2376_v22   ;;  %v1737_v23 = vadd.f32 %v1736_v30, %v1097_v61 }
 0x337   :  { %v2209_v58 = vadd.f32 0.5, %v2125_v25  ;;  %v2322_v28 = vmax.f32 %v2238_v26, 0.0  ;;  %v2480_v26 = vld [vmem:[%s6330_s0 + $0x148] sm:$0xff] }
 0x338   :  { %v2023_v9 = vpop.f32.mrf.mxu3  ;;  %v5514_v20 = vpop.permute.xlu1 %2560 }
 0x339   :  { %v2024_v7 = vadd.f32 %v2023_v9, %v1805_v37  ;;  %v2293_v16 = vmax.f32 %v2209_v58, 0.0  ;;  %v2706_v6 = vpop.permute.xlu0 %2705  ;;  %v2406_v0 = vmin.f32 %v2322_v28, 1.0 }
 0x33a   :  { %v1950_v63 = vpop.f32.mrf.mxu1  ;;  %v2979_v15 = vmul.f32 %v2706_v6, %v2475_v41  ;;  %v3665_v41 = vld [vmem:[%s6328_s4 + $0x250] sm:$0xf] }
 0x33b   :  { %v2155_v35 = vmul.f32 0.16666667, %v2024_v7  ;;  %v5522_v27 = vpop.f32.mrf.mxu2  ;;  %v2377_v50 = vmin.f32 %v2293_v16, 1.0  ;;  %v1951_v34 = vadd.f32 %v1950_v63, %v1732_v56 }
 0x33c   :  { %3064 = vst.msk [vmem:[%s6331_s6 + $0x120] sm:$0xff] %vm3027_vm3, %v2979_v15 }
 0x33d   :  { %v2239_v42 = vadd.f32 0.5, %v2155_v35  ;;  %v2126_v33 = vmul.f32 0.16666667, %v1951_v34  ;;  %2635 = vperm.xlu1 %3902, %v2377_v50   ;;  %v1739_v43 = vpop.f32.mrf.mxu0  ;;  %v1127_v35 = vld [vmem:[%s6329_s5 + $0x1b8] sm:$0xff]  ;;  %v3666_v50 = vor.u32 %v3880_v17, %v3665_v41  ;;  %v1098_v34 = vld [vmem:[%s6329_s5 + $0xd0] sm:$0xff] }
 0x33e   :  { %2780 = vperm.xlu0 %3901, %v2406_v0   ;;  %v1740_v39 = vadd.f32 %v1739_v43, %v1098_v34  ;;  %v3879_v34 = vld [vmem:[%s6328_s4 + $0x254] sm:$0xf] }
 0x33f   :  { %v2323_v31 = vmax.f32 %v2239_v42, 0.0  ;;  %v2210_v24 = vadd.f32 0.5, %v2126_v33  ;;  %v1812_v33 = vadd.f32 %v5522_v27, %v1127_v35 }
 0x340   :  { %v2025_v19 = vpop.f32.mrf.mxu3  ;;  %1853 = vmatmul.bf16.gmra.mxu2 %v3658_v32  ;;  %v2711_v46 = vpop.permute.xlu1 %2710  ;;  %v3659_v32 = vld [vmem:[%s6328_s4 + $0x248] sm:$0xf0] }
 0x341   :  { %v2026_v62 = vadd.f32 %v2025_v19, %v1807_v40  ;;  %v2294_v57 = vmax.f32 %v2210_v24, 0.0  ;;  %v2980_v59 = vmul.f32 %v2711_v46, %v2476_v18  ;;  %v5544_v45 = vpop.permute.xlu2 %2580  ;;  %v2407_v1 = vmin.f32 %v2323_v31, 1.0 }
 0x342   :  { %v1953_v60 = vpop.f32.mrf.mxu1  ;;  %v3662_v19 = vor.u32 %v3877_v36, %v3659_v32  ;;  %v3667_v32 = vld [vmem:[%s6328_s4 + $0x258] sm:$0xf0] }
 0x343   :  { %v2156_v5 = vmul.f32 0.16666667, %v2026_v62  ;;  %v5549_v21 = vpop.f32.mrf.mxu2  ;;  %v1954_v49 = vadd.f32 %v1953_v60, %v1735_v2  ;;  %v2378_v47 = vmin.f32 %v2294_v57, 1.0  ;;  %3065 = vst.msk [vmem:[%s6331_s6 + $0x128] sm:$0xff] %vm3027_vm3, %v2980_v59 }
 0x345   :  { %v2240_v12 = vadd.f32 0.5, %v2156_v5  ;;  %3738 = vmatmul.msk.bf16.gmra.mxu3 %vm1534_vm2, %v3654_v3  ;;  %v2127_v51 = vmul.f32 0.16666667, %v1954_v49  ;;  %2785 = vperm.xlu1 %3902, %v2407_v1   ;;  %v1741_v18 = vpop.f32.mrf.mxu0  ;;  %v1128_v3 = vld [vmem:[%s6329_s5 + $0x1c0] sm:$0xff]  ;;  %v1099_v5 = vld [vmem:[%s6329_s5 + $0xd8] sm:$0xff] }
 0x346   :  { %2640 = vperm.xlu2 %3903, %v2378_v47   ;;  %v1815_v47 = vadd.f32 %v5549_v21, %v1128_v3  ;;  %v3882_v21 = vld [vmem:[%s6328_s4 + $0x264] sm:$0xf0] }
 0x347   :  { %v2211_v22 = vadd.f32 0.5, %v2127_v51  ;;  %v2324_v37 = vmax.f32 %v2240_v12, 0.0  ;;  %v2479_v12 = vld [vmem:[%s6330_s0 + $0x140] sm:$0xff]  ;;  %v1742_v51 = vadd.f32 %v1741_v18, %v1099_v5  ;;  %v1101_v5 = vld [vmem:[%s6329_s5 + $0xe8] sm:$0xff] }
 0x348   :  { %v2028_v25 = vpop.f32.mrf.mxu3  ;;  %v5563_v58 = vpop.permute.xlu0 %2570 }
 0x349   :  { %v2029_v56 = vadd.f32 %v2028_v25, %v1810_v14  ;;  %v2295_v28 = vmax.f32 %v2211_v22, 0.0  ;;  %v2731_v9 = vpop.permute.xlu2 %2730  ;;  %v2408_v15 = vmin.f32 %v2324_v37, 1.0  ;;  %v3673_v25 = vld [vmem:[%s6328_s4 + $0x260] sm:$0xf] }
 0x34a   :  { %v1955_v7 = vpop.f32.mrf.mxu1  ;;  %v2984_v13 = vmul.f32 %v2731_v9, %v2480_v26  ;;  %v3674_v35 = vor.u32 %v3882_v21, %v3673_v25 }
 0x34b   :  { %v2157_v29 = vmul.f32 0.16666667, %v2029_v56  ;;  %v5571_v16 = vpop.f32.mrf.mxu2  ;;  %v2379_v6 = vmin.f32 %v2295_v28, 1.0  ;;  %v1956_v63 = vadd.f32 %v1955_v7, %v1737_v23  ;;  %v1129_v7 = vld [vmem:[%s6329_s5 + $0x1c8] sm:$0xff] }
 0x34c   :  { %3069 = vst.msk [vmem:[%s6331_s6 + $0x148] sm:$0xff] %vm3027_vm3, %v2984_v13  ;;  %v1817_v36 = vadd.f32 %v5571_v16, %v1129_v7  ;;  %v3884_v7 = vld [vmem:[%s6328_s4 + $0x274] sm:$0xf0] }
 0x34d   :  { %v2241_v30 = vadd.f32 0.5, %v2157_v29  ;;  %v2128_v0 = vmul.f32 0.16666667, %v1956_v63  ;;  %2645 = vperm.xlu0 %3901, %v2379_v6   ;;  %v1744_v28 = vpop.f32.mrf.mxu0  ;;  %v1100_v63 = vld [vmem:[%s6329_s5 + $0xe0] sm:$0xff] }
 0x34e   :  { %2790 = vperm.xlu2 %3903, %v2408_v15  }
 0x34f   :  { %v2325_v42 = vmax.f32 %v2241_v30, 0.0  ;;  %v2212_v55 = vadd.f32 0.5, %v2128_v0  ;;  %v5593_v31 = vpop.permute.xlu1 %2575  ;;  %v2483_v0 = vld [vmem:[%s6330_s0 + $0x160] sm:$0xff] }
 0x350   :  { %v2030_v40 = vpop.f32.mrf.mxu3  ;;  %1858 = vmatmul.bf16.gmra.mxu2 %v3666_v50  ;;  %v2721_v24 = vpop.permute.xlu0 %2720 }
 0x351   :  { %v2031_v2 = vadd.f32 %v2030_v40, %v1812_v33  ;;  %v2296_v46 = vmax.f32 %v2212_v55, 0.0  ;;  %v2982_v62 = vmul.f32 %v2721_v24, %v2478_v52  ;;  %v2409_v59 = vmin.f32 %v2325_v42, 1.0  ;;  %v2439_v52 = vld [vmem:[%s6330_s0] sm:$0xff]  ;;  %v2440_v42 = vld [vmem:[%s6330_s0 + $0x8] sm:$0xff] }
 0x352   :  { %v1958_v57 = vpop.f32.mrf.mxu1  ;;  %v1745_v33 = vadd.f32 %v1744_v28, %v1100_v63  ;;  %v2944_v18 = vmul.f32 %v5398_v11, %v2440_v42  ;;  %v2441_v42 = vld [vmem:[%s6330_s0 + $0x10] sm:$0xff] }
 0x353   :  { %v2158_v8 = vmul.f32 0.16666667, %v2031_v2  ;;  %v5598_v27 = vpop.f32.mrf.mxu2  ;;  %v1959_v60 = vadd.f32 %v1958_v57, %v1740_v39  ;;  %v2380_v1 = vmin.f32 %v2296_v46, 1.0  ;;  %3067 = vst.msk [vmem:[%s6331_s6 + $0x138] sm:$0xff] %vm3027_vm3, %v2982_v62  ;;  %v2943_v39 = vmul.f32 %v5334_v44, %v2439_v52  ;;  %v1130_v44 = vld [vmem:[%s6329_s5 + $0x1d0] sm:$0xff] }
 0x354   :  { %v3670_v62 = vor.u32 %v3879_v34, %v3667_v32  ;;  %3029 = vst.msk [vmem:[%s6331_s6 + $0x8] sm:$0xff] %vm3027_vm3, %v2944_v18  ;;  %v2482_v32 = vld [vmem:[%s6330_s0 + $0x158] sm:$0xff]  ;;  %v3675_v52 = vld [vmem:[%s6328_s4 + $0x268] sm:$0xf0] }
 0x355   :  { %v2242_v49 = vadd.f32 0.5, %v2158_v8  ;;  %3739 = vmatmul.msk.bf16.gmra.mxu3 %vm1534_vm2, %v3662_v19  ;;  %v2129_v61 = vmul.f32 0.16666667, %v1959_v60  ;;  %2795 = vperm.xlu0 %3901, %v2409_v59   ;;  %3028 = vst.msk [vmem:[%s6331_s6] sm:$0xff] %vm3027_vm3, %v2943_v39  ;;  %v2945_v39 = vmul.f32 %v5410_v38, %v2441_v42  ;;  %v1132_v38 = vld [vmem:[%s6329_s5 + $0x1e0] sm:$0xff] }
 0x356   :  { %2650 = vperm.xlu1 %3902, %v2380_v1   ;;  %v2447_v42 = vld [vmem:[%s6330_s0 + $0x40] sm:$0xff] }
 0x357   :  { %v2213_v14 = vadd.f32 0.5, %v2129_v61  ;;  %v5612_v43 = vpop.permute.xlu2 %2595  ;;  %v2326_v22 = vmax.f32 %v2242_v49, 0.0  ;;  %v1746_v49 = vpop.f32.mrf.mxu0  ;;  %v1820_v61 = vadd.f32 %v5598_v27, %v1130_v44  ;;  %3030 = vst.msk [vmem:[%s6331_s6 + $0x10] sm:$0xff] %vm3027_vm3, %v2945_v39 }
 0x358   :  { %v2033_v23 = vpop.f32.mrf.mxu3  ;;  %v2726_v26 = vpop.permute.xlu1 %2725 }
 0x359   :  { %v2034_v37 = vadd.f32 %v2033_v23, %v1815_v47  ;;  %v2297_v56 = vmax.f32 %v2213_v14, 0.0  ;;  %v2983_v41 = vmul.f32 %v2726_v26, %v2479_v12  ;;  %v2410_v15 = vmin.f32 %v2326_v22, 1.0  ;;  %v2481_v14 = vld [vmem:[%s6330_s0 + $0x150] sm:$0xff]  ;;  %v2444_v22 = vld [vmem:[%s6330_s0 + $0x28] sm:$0xff] }
 0x35a   :  { %v1960_v17 = vpop.f32.mrf.mxu1  ;;  %v2948_v26 = vmul.f32 %v5387_v53, %v2444_v22 }
 0x35b   :  { %v2159_v9 = vmul.f32 0.16666667, %v2034_v37  ;;  %v5623_v13 = vpop.f32.mrf.mxu2  ;;  %v2381_v29 = vmin.f32 %v2297_v56, 1.0  ;;  %v1961_v6 = vadd.f32 %v1960_v17, %v1742_v51  ;;  %3068 = vst.msk [vmem:[%s6331_s6 + $0x140] sm:$0xff] %vm3027_vm3, %v2983_v41  ;;  %v2443_v51 = vld [vmem:[%s6330_s0 + $0x20] sm:$0xff]  ;;  %v1747_v37 = vadd.f32 %v1746_v49, %v1101_v5  ;;  %v2486_v5 = vld [vmem:[%s6330_s0 + $0x178] sm:$0xff] }
 0x35c   :  { %v2947_v23 = vmul.f32 %v5354_v54, %v2443_v51  ;;  %3033 = vst.msk [vmem:[%s6331_s6 + $0x28] sm:$0xff] %vm3027_vm3, %v2948_v26  ;;  %v3886_v51 = vld [vmem:[%s6328_s4 + $0x284] sm:$0xf0] }
 0x35d   :  { %v2243_v50 = vadd.f32 0.5, %v2159_v9  ;;  %v2130_v30 = vmul.f32 0.16666667, %v1961_v6  ;;  %2655 = vperm.xlu2 %3903, %v2381_v29   ;;  %v3681_v9 = vld [vmem:[%s6328_s4 + $0x270] sm:$0xf] }
 0x35e   :  { %2800 = vperm.xlu1 %3902, %v2410_v15   ;;  %3032 = vst.msk [vmem:[%s6331_s6 + $0x20] sm:$0xff] %vm3027_vm3, %v2947_v23 }
 0x35f   :  { %v2327_v55 = vmax.f32 %v2243_v50, 0.0  ;;  %v2214_v16 = vadd.f32 0.5, %v2130_v30  ;;  %v5650_v40 = vpop.permute.xlu0 %2585  ;;  %v2746_v24 = vpop.permute.xlu2 %2745  ;;  %v3682_v50 = vor.u32 %v3884_v7, %v3681_v9 }
 0x360   :  { %v2035_v2 = vpop.f32.mrf.mxu3  ;;  %1863 = vmatmul.bf16.gmra.mxu2 %v3674_v35  ;;  %v2987_v19 = vmul.f32 %v2746_v24, %v2483_v0  ;;  %v1131_v35 = vld [vmem:[%s6329_s5 + $0x1d8] sm:$0xff]  ;;  %v3881_v0 = vld [vmem:[%s6328_s4 + $0x264] sm:$0xf] }
 0x361   :  { %v2036_v46 = vadd.f32 %v2035_v2, %v1817_v36  ;;  %v2298_v3 = vmax.f32 %v2214_v16, 0.0  ;;  %v2411_v57 = vmin.f32 %v2327_v55, 1.0  ;;  %v1822_v55 = vadd.f32 %v5623_v13, %v1131_v35 }
 0x362   :  { %v1963_v11 = vpop.f32.mrf.mxu1  ;;  %3072 = vst.msk [vmem:[%s6331_s6 + $0x160] sm:$0xff] %vm3027_vm3, %v2987_v19 }
 0x363   :  { %v2160_v59 = vmul.f32 0.16666667, %v2036_v46  ;;  %v5663_v8 = vpop.f32.mrf.mxu2  ;;  %v1964_v60 = vadd.f32 %v1963_v11, %v1745_v33  ;;  %v2382_v1 = vmin.f32 %v2298_v3, 1.0  ;;  %v2442_v33 = vld [vmem:[%s6330_s0 + $0x18] sm:$0xff] }
 0x364   :  { %v2946_v18 = vmul.f32 %v5442_v10, %v2442_v33 }
 0x365   :  { %v2244_v47 = vadd.f32 0.5, %v2160_v59  ;;  %3740 = vmatmul.msk.bf16.gmra.mxu3 %vm1534_vm2, %v3670_v62  ;;  %v2131_v12 = vmul.f32 0.16666667, %v1964_v60  ;;  %2805 = vperm.xlu2 %3903, %v2411_v57   ;;  %v3678_v62 = vor.u32 %v3881_v0, %v3675_v52 }
 0x366   :  { %2660 = vperm.xlu0 %3901, %v2382_v1   ;;  %3031 = vst.msk [vmem:[%s6331_s6 + $0x18] sm:$0xff] %vm3027_vm3, %v2946_v18  ;;  %v1825_v1 = vadd.f32 %v5663_v8, %v1132_v38  ;;  %v2951_v18 = vmul.f32 %v5464_v48, %v2447_v42  ;;  %v1135_v48 = vld [vmem:[%s6329_s5 + $0x1f8] sm:$0xff] }
 0x367   :  { %v2215_v27 = vadd.f32 0.5, %v2131_v12  ;;  %v2736_v25 = vpop.permute.xlu0 %2735  ;;  %v2328_v21 = vmax.f32 %v2244_v47, 0.0 }
 0x368   :  { %v2038_v56 = vpop.f32.mrf.mxu3  ;;  %v5685_v41 = vpop.permute.xlu1 %2590  ;;  %v2985_v17 = vmul.f32 %v2736_v25, %v2481_v14  ;;  %v3689_v14 = vld [vmem:[%s6328_s4 + $0x280] sm:$0xf]  ;;  %3036 = vst.msk [vmem:[%s6331_s6 + $0x40] sm:$0xff] %vm3027_vm3, %v2951_v18 }
 0x369   :  { %v2039_v28 = vadd.f32 %v2038_v56, %v1820_v61  ;;  %v2299_v54 = vmax.f32 %v2215_v27, 0.0  ;;  %v2412_v15 = vmin.f32 %v2328_v21, 1.0  ;;  %v3690_v25 = vor.u32 %v3886_v51, %v3689_v14  ;;  %v3883_v56 = vld [vmem:[%s6328_s4 + $0x274] sm:$0xf] }
 0x36a   :  { %v1965_v53 = vpop.f32.mrf.mxu1  ;;  %3070 = vst.msk [vmem:[%s6331_s6 + $0x150] sm:$0xff] %vm3027_vm3, %v2985_v17  ;;  %v3683_v17 = vld [vmem:[%s6328_s4 + $0x278] sm:$0xf0] }
 0x36b   :  { %v2161_v29 = vmul.f32 0.16666667, %v2039_v28  ;;  %v5701_v6 = vpop.f32.mrf.mxu2  ;;  %v1966_v63 = vadd.f32 %v1965_v53, %v1747_v37  ;;  %v2383_v34 = vmin.f32 %v2299_v54, 1.0  ;;  %v1133_v37 = vld [vmem:[%s6329_s5 + $0x1e8] sm:$0xff]  ;;  %v3686_v35 = vor.u32 %v3883_v56, %v3683_v17  ;;  %v2450_v17 = vld [vmem:[%s6330_s0 + $0x58] sm:$0xff] }
 0x36c   :  { %v2484_v28 = vld [vmem:[%s6330_s0 + $0x168] sm:$0xff]  ;;  %v1827_v7 = vadd.f32 %v5701_v6, %v1133_v37 }
 0x36d   :  { %v2245_v30 = vadd.f32 0.5, %v2161_v29  ;;  %v2132_v36 = vmul.f32 0.16666667, %v1966_v63  ;;  %2665 = vperm.xlu1 %3902, %v2383_v34   ;;  %v1134_v34 = vld [vmem:[%s6329_s5 + $0x1f0] sm:$0xff] }
 0x36e   :  { %2810 = vperm.xlu0 %3901, %v2412_v15  }
 0x36f   :  { %v2216_v16 = vadd.f32 0.5, %v2132_v36  ;;  %v2329_v24 = vmax.f32 %v2245_v30, 0.0 }
 0x370   :  { %v2040_v2 = vpop.f32.mrf.mxu3  ;;  %1868 = vmatmul.bf16.gmra.mxu2 %v3682_v50  ;;  %v2741_v19 = vpop.permute.xlu1 %2740 }
 0x371   :  { %v2041_v46 = vadd.f32 %v2040_v2, %v1822_v55  ;;  %v2300_v3 = vmax.f32 %v2216_v16, 0.0  ;;  %v2986_v44 = vmul.f32 %v2741_v19, %v2482_v32  ;;  %v5732_v11 = vpop.permute.xlu2 %2610  ;;  %v2413_v57 = vmin.f32 %v2329_v24, 1.0  ;;  %v2485_v32 = vld [vmem:[%s6330_s0 + $0x170] sm:$0xff] }
 0x372   :  { %v3697_v19 = vld [vmem:[%s6328_s4 + $0x290] sm:$0xf] }
 0x373   :  { %v2162_v10 = vmul.f32 0.16666667, %v2041_v46  ;;  %v1829_v13 = vpop.f32.mrf.mxu2  ;;  %v2384_v59 = vmin.f32 %v2300_v3, 1.0  ;;  %3071 = vst.msk [vmem:[%s6331_s6 + $0x158] sm:$0xff] %vm3027_vm3, %v2986_v44  ;;  %v3888_v46 = vld [vmem:[%s6328_s4 + $0x294] sm:$0xf0] }
 0x374   :  { %v1830_v36 = vadd.f32 %v1829_v13, %v1134_v34  ;;  %v3698_v44 = vor.u32 %v3888_v46, %v3697_v19  ;;  %v3885_v13 = vld [vmem:[%s6328_s4 + $0x284] sm:$0xf]  ;;  %v1138_v46 = vld [vmem:[%s6329_s5 + $0x210] sm:$0xff] }
 0x375   :  { %v2246_v60 = vadd.f32 0.5, %v2162_v10  ;;  %3741 = vmatmul.msk.bf16.gmra.mxu3 %vm1534_vm2, %v3678_v62  ;;  %2815 = vperm.xlu1 %3902, %v2413_v57   ;;  %v2489_v10 = vld [vmem:[%s6330_s0 + $0x190] sm:$0xff]  ;;  %v3691_v57 = vld [vmem:[%s6328_s4 + $0x288] sm:$0xf0] }
 0x376   :  { %2670 = vperm.xlu2 %3903, %v2384_v59  }
 0x377   :  { %v2330_v49 = vmax.f32 %v2246_v60, 0.0 }
 0x378   :  { %v2043_v47 = vpop.f32.mrf.mxu3  ;;  %v5750_v61 = vpop.permute.xlu0 %2600 }
 0x379   :  { %v2044_v12 = vadd.f32 %v2043_v47, %v1825_v1  ;;  %v2761_v8 = vpop.permute.xlu2 %2760  ;;  %v2414_v27 = vmin.f32 %v2330_v49, 1.0  ;;  %v2445_v1 = vld [vmem:[%s6330_s0 + $0x30] sm:$0xff] }
 0x37a   :  { %v2990_v22 = vmul.f32 %v2761_v8, %v2486_v5  ;;  %v2446_v5 = vld [vmem:[%s6330_s0 + $0x38] sm:$0xff]  ;;  %v2949_v14 = vmul.f32 %v5495_v4, %v2445_v1 }
 0x37b   :  { %v2163_v23 = vmul.f32 0.16666667, %v2044_v12  ;;  %v1831_v26 = vpop.f32.mrf.mxu2  ;;  %v2950_v51 = vmul.f32 %v5514_v20, %v2446_v5 }
 0x37c   :  { %3075 = vst.msk [vmem:[%s6331_s6 + $0x178] sm:$0xff] %vm3027_vm3, %v2990_v22  ;;  %v1832_v60 = vadd.f32 %v1831_v26, %v1135_v48  ;;  %v3694_v26 = vor.u32 %v3885_v13, %v3691_v57 }
 0x37d   :  { %v2247_v21 = vadd.f32 0.5, %v2163_v23  ;;  %3034 = vst.msk [vmem:[%s6331_s6 + $0x30] sm:$0xff] %vm3027_vm3, %v2949_v14 }
 0x37e   :  { %2820 = vperm.xlu2 %3903, %v2414_v27   ;;  %v1136_v27 = vld [vmem:[%s6329_s5 + $0x200] sm:$0xff]  ;;  %3035 = vst.msk [vmem:[%s6331_s6 + $0x38] sm:$0xff] %vm3027_vm3, %v2950_v51 }
 0x37f   :  { %v2331_v9 = vmax.f32 %v2247_v21, 0.0  ;;  %v5775_v54 = vpop.permute.xlu1 %2605  ;;  %v2487_v21 = vld [vmem:[%s6330_s0 + $0x180] sm:$0xff] }
 0x380   :  { %v2045_v53 = vpop.f32.mrf.mxu3  ;;  %1873 = vmatmul.bf16.gmra.mxu2 %v3690_v25  ;;  %v2751_v29 = vpop.permute.xlu0 %2750 }
 0x381   :  { %v2415_v63 = vmin.f32 %v2331_v9, 1.0  ;;  %v2046_v15 = vadd.f32 %v2045_v53, %v1827_v7  ;;  %v2988_v50 = vmul.f32 %v2751_v29, %v2484_v28  ;;  %v2954_v7 = vmul.f32 %v5544_v45, %v2450_v17  ;;  %v1137_v45 = vld [vmem:[%s6329_s5 + $0x208] sm:$0xff]  ;;  %v2454_v17 = vld [vmem:[%s6330_s0 + $0x78] sm:$0xff] }
 0x383   :  { %v2164_v30 = vmul.f32 0.16666667, %v2046_v15  ;;  %v1834_v0 = vpop.f32.mrf.mxu2  ;;  %2825 = vperm.xlu0 %3901, %v2415_v63   ;;  %3073 = vst.msk [vmem:[%s6331_s6 + $0x168] sm:$0xff] %vm3027_vm3, %v2988_v50 }
 0x384   :  { %v1835_v20 = vadd.f32 %v1834_v0, %v1136_v27  ;;  %3039 = vst.msk [vmem:[%s6331_s6 + $0x58] sm:$0xff] %vm3027_vm3, %v2954_v7  ;;  %v3699_v0 = vld [vmem:[%s6328_s4 + $0x298] sm:$0xf0] }
 0x385   :  { %v2248_v6 = vadd.f32 0.5, %v2164_v30  ;;  %3742 = vmatmul.msk.bf16.gmra.mxu3 %vm1534_vm2, %v3686_v35  ;;  %v3887_v30 = vld [vmem:[%s6328_s4 + $0x294] sm:$0xf] }
 0x387   :  { %v2332_v52 = vmax.f32 %v2248_v6, 0.0  ;;  %v2756_v33 = vpop.permute.xlu1 %2755  ;;  %v5791_v55 = vpop.permute.xlu2 %2625  ;;  %v2488_v6 = vld [vmem:[%s6330_s0 + $0x188] sm:$0xff] }
 0x388   :  { %v2048_v39 = vpop.f32.mrf.mxu3  ;;  %v2989_v16 = vmul.f32 %v2756_v33, %v2485_v32 }
 0x389   :  { %v2416_v24 = vmin.f32 %v2332_v52, 1.0  ;;  %v2049_v2 = vadd.f32 %v2048_v39, %v1830_v36  ;;  %v2448_v52 = vld [vmem:[%s6330_s0 + $0x48] sm:$0xff] }
 0x38a   :  { %3074 = vst.msk [vmem:[%s6331_s6 + $0x170] sm:$0xff] %vm3027_vm3, %v2989_v16  ;;  %v2952_v33 = vmul.f32 %v5563_v58, %v2448_v52 }
 0x38b   :  { %v2165_v62 = vmul.f32 0.16666667, %v2049_v2  ;;  %v1836_v3 = vpop.f32.mrf.mxu2  ;;  %2830 = vperm.xlu1 %3902, %v2416_v24   ;;  %v3702_v24 = vor.u32 %v3887_v30, %v3699_v0  ;;  %v2462_v30 = vld [vmem:[%s6330_s0 + $0xb8] sm:$0xff]  ;;  %v2460_v0 = vld [vmem:[%s6330_s0 + $0xa8] sm:$0xff] }
 0x38c   :  { %v1837_v32 = vadd.f32 %v1836_v3, %v1137_v45  ;;  %3037 = vst.msk [vmem:[%s6331_s6 + $0x48] sm:$0xff] %vm3027_vm3, %v2952_v33  ;;  %v2490_v33 = vld [vmem:[%s6330_s0 + $0x198] sm:$0xff] }
 0x38d   :  { %v2249_v38 = vadd.f32 0.5, %v2165_v62 }
 0x38f   :  { %v2333_v59 = vmax.f32 %v2249_v38, 0.0  ;;  %v5826_v49 = vpop.permute.xlu0 %2615  ;;  %v2776_v47 = vpop.permute.xlu2 %2775  ;;  %v2492_v38 = vld [vmem:[%s6330_s0 + $0x1a8] sm:$0xff] }
 0x390   :  { %v2050_v12 = vpop.f32.mrf.mxu3  ;;  %1878 = vmatmul.bf16.gmra.mxu2 %v3698_v44  ;;  %v2993_v8 = vmul.f32 %v2776_v47, %v2489_v10  ;;  %v1139_v47 = vld [vmem:[%s6329_s5 + $0x218] sm:$0xff] }
 0x391   :  { %v2417_v22 = vmin.f32 %v2333_v59, 1.0  ;;  %v2051_v23 = vadd.f32 %v2050_v12, %v1832_v60 }
 0x392   :  { %3078 = vst.msk [vmem:[%s6331_s6 + $0x190] sm:$0xff] %vm3027_vm3, %v2993_v8 }
 0x393   :  { %v2166_v37 = vmul.f32 0.16666667, %v2051_v23  ;;  %v1839_v25 = vpop.f32.mrf.mxu2  ;;  %2835 = vperm.xlu2 %3903, %v2417_v22   ;;  %v2449_v22 = vld [vmem:[%s6330_s0 + $0x50] sm:$0xff] }
 0x394   :  { %v1840_v48 = vadd.f32 %v1839_v25, %v1138_v46  ;;  %v2453_v23 = vld [vmem:[%s6330_s0 + $0x70] sm:$0xff]  ;;  %v2953_v25 = vmul.f32 %v5593_v31, %v2449_v22 }
 0x395   :  { %v2250_v4 = vadd.f32 0.5, %v2166_v37  ;;  %3743 = vmatmul.msk.bf16.gmra.mxu3 %vm1534_vm2, %v3694_v26  ;;  %v2451_v26 = vld [vmem:[%s6330_s0 + $0x60] sm:$0xff] }
 0x396   :  { %3038 = vst.msk [vmem:[%s6331_s6 + $0x50] sm:$0xff] %vm3027_vm3, %v2953_v25  ;;  %v2464_v25 = vld [vmem:[%s6330_s0 + $0xc8] sm:$0xff] }
 0x397   :  { %v2334_v56 = vmax.f32 %v2250_v4, 0.0  ;;  %v2766_v28 = vpop.permute.xlu0 %2765  ;;  %v2957_v4 = vmul.f32 %v5612_v43, %v2453_v23  ;;  %v2455_v43 = vld [vmem:[%s6330_s0 + $0x80] sm:$0xff] }
 0x398   :  { %v2053_v9 = vpop.f32.mrf.mxu3  ;;  %v5853_v53 = vpop.permute.xlu1 %2620  ;;  %v2991_v29 = vmul.f32 %v2766_v28, %v2487_v21  ;;  %v2452_v21 = vld [vmem:[%s6330_s0 + $0x68] sm:$0xff] }
 0x399   :  { %v2418_v63 = vmin.f32 %v2334_v56, 1.0  ;;  %v2054_v15 = vadd.f32 %v2053_v9, %v1835_v20  ;;  %v2955_v20 = vmul.f32 %v5650_v40, %v2451_v26  ;;  %v2456_v56 = vld [vmem:[%s6330_s0 + $0x88] sm:$0xff]  ;;  %v2956_v31 = vmul.f32 %v5685_v41, %v2452_v21  ;;  %v1140_v40 = vld [vmem:[%s6329_s5 + $0x220] sm:$0xff]  ;;  %3042 = vst.msk [vmem:[%s6331_s6 + $0x70] sm:$0xff] %vm3027_vm3, %v2957_v4 }
 0x39a   :  { %3076 = vst.msk [vmem:[%s6331_s6 + $0x180] sm:$0xff] %vm3027_vm3, %v2991_v29  ;;  %v2960_v7 = vmul.f32 %v5732_v11, %v2456_v56  ;;  %v2459_v29 = vld [vmem:[%s6330_s0 + $0xa0] sm:$0xff]  ;;  %v2959_v11 = vmul.f32 %v5775_v54, %v2455_v43 }
 0x39b   :  { %v2167_v35 = vmul.f32 0.16666667, %v2054_v15  ;;  %v1841_v50 = vpop.f32.mrf.mxu2  ;;  %2840 = vperm.xlu0 %3901, %v2418_v63   ;;  %v2958_v15 = vmul.f32 %v5750_v61, %v2454_v17  ;;  %3040 = vst.msk [vmem:[%s6331_s6 + $0x60] sm:$0xff] %vm3027_vm3, %v2955_v20  ;;  %v2963_v61 = vmul.f32 %v5791_v55, %v2459_v29 }
 0x39c   :  { %v1842_v8 = vadd.f32 %v1841_v50, %v1139_v47  ;;  %v2458_v50 = vld [vmem:[%s6330_s0 + $0x98] sm:$0xff]  ;;  %3041 = vst.msk [vmem:[%s6331_s6 + $0x68] sm:$0xff] %vm3027_vm3, %v2956_v31 }
 0x39d   :  { %v2251_v34 = vadd.f32 0.5, %v2167_v35  ;;  %v2457_v35 = vld [vmem:[%s6330_s0 + $0x90] sm:$0xff]  ;;  %3045 = vst.msk [vmem:[%s6331_s6 + $0x88] sm:$0xff] %vm3027_vm3, %v2960_v7  ;;  %v2962_v55 = vmul.f32 %v5853_v53, %v2458_v50  ;;  %v1143_v7 = vld [vmem:[%s6329_s5 + $0x238] sm:$0xff] }
 0x39e   :  { %v2961_v54 = vmul.f32 %v5826_v49, %v2457_v35  ;;  %3043 = vst.msk [vmem:[%s6331_s6 + $0x78] sm:$0xff] %vm3027_vm3, %v2958_v15  ;;  %v2468_v35 = vld [vmem:[%s6330_s0 + $0xe8] sm:$0xff] }
 0x39f   :  { %v2335_v36 = vmax.f32 %v2251_v34, 0.0  ;;  %3044 = vst.msk [vmem:[%s6331_s6 + $0x80] sm:$0xff] %vm3027_vm3, %v2959_v11 }
 0x3a0   :  { %v2055_v42 = vpop.f32.mrf.mxu3  ;;  %v2771_v39 = vpop.permute.xlu1 %2770  ;;  %3048 = vst.msk [vmem:[%s6331_s6 + $0xa0] sm:$0xff] %vm3027_vm3, %v2963_v61 }
 0x3a1   :  { %v2419_v18 = vmin.f32 %v2335_v36, 1.0  ;;  %v2056_v16 = vadd.f32 %v2055_v42, %v1837_v32  ;;  %v2992_v2 = vmul.f32 %v2771_v39, %v2488_v6  ;;  %v5879_v19 = vpop.permute.xlu2 %2640  ;;  %v2461_v36 = vld [vmem:[%s6330_s0 + $0xb0] sm:$0xff]  ;;  %3046 = vst.msk [vmem:[%s6331_s6 + $0x90] sm:$0xff] %vm3027_vm3, %v2961_v54  ;;  %v1144_v54 = vld [vmem:[%s6329_s5 + $0x240] sm:$0xff] }
 0x3a2   :  { %v2966_v49 = vmul.f32 %v5879_v19, %v2462_v30  ;;  %v2465_v19 = vld [vmem:[%s6330_s0 + $0xd0] sm:$0xff]  ;;  %3047 = vst.msk [vmem:[%s6331_s6 + $0x98] sm:$0xff] %vm3027_vm3, %v2962_v55 }
 0x3a3   :  { %v2168_v62 = vmul.f32 0.16666667, %v2056_v16  ;;  %v1844_v3 = vpop.f32.mrf.mxu2  ;;  %2845 = vperm.xlu1 %3902, %v2419_v18   ;;  %3077 = vst.msk [vmem:[%s6331_s6 + $0x188] sm:$0xff] %vm3027_vm3, %v2992_v2 }
 0x3a4   :  { %v1845_v34 = vadd.f32 %v1844_v3, %v1140_v40  ;;  %3051 = vst.msk [vmem:[%s6331_s6 + $0xb8] sm:$0xff] %vm3027_vm3, %v2966_v49  ;;  %v2498_v49 = vld [vmem:[%s6330_s0 + $0x1d8] sm:$0xff] }
 0x3a5   :  { %v2252_v58 = vadd.f32 0.5, %v2168_v62  ;;  %3744 = vmatmul.msk.bf16.gmra.mxu3 %vm1534_vm2, %v3702_v24  ;;  %v2491_v24 = vld [vmem:[%s6330_s0 + $0x1a0] sm:$0xff] }
 0x3a7   :  { %v2336_v44 = vmax.f32 %v2252_v58, 0.0  ;;  %v1141_v58 = vld [vmem:[%s6329_s5 + $0x228] sm:$0xff] }
 0x3a8   :  { %v2058_v10 = vpop.f32.mrf.mxu3  ;;  %v2631_v14 = vpop.permute.xlu0 %2630 }
 0x3a9   :  { %v2420_v13 = vmin.f32 %v2336_v44, 1.0  ;;  %v2059_v57 = vadd.f32 %v2058_v10, %v1840_v48  ;;  %v2791_v59 = vpop.permute.xlu2 %2790  ;;  %v2964_v18 = vmul.f32 %v2631_v14, %v2460_v0  ;;  %v2463_v10 = vld [vmem:[%s6330_s0 + $0xc0] sm:$0xff] }
 0x3aa   :  { %v2996_v60 = vmul.f32 %v2791_v59, %v2492_v38 }
 0x3ab   :  { %v2169_v1 = vmul.f32 0.16666667, %v2059_v57  ;;  %v5896_v5 = vpop.f32.mrf.mxu2  ;;  %2850 = vperm.xlu2 %3903, %v2420_v13   ;;  %3049 = vst.msk [vmem:[%s6331_s6 + $0xa8] sm:$0xff] %vm3027_vm3, %v2964_v18  ;;  %v2495_v13 = vld [vmem:[%s6330_s0 + $0x1c0] sm:$0xff] }
 0x3ac   :  { %3081 = vst.msk [vmem:[%s6331_s6 + $0x1a8] sm:$0xff] %vm3027_vm3, %v2996_v60  ;;  %v1847_v59 = vadd.f32 %v5896_v5, %v1141_v58  ;;  %v1142_v5 = vld [vmem:[%s6329_s5 + $0x230] sm:$0xff]  ;;  %v2467_v58 = vld [vmem:[%s6330_s0 + $0xe0] sm:$0xff] }
 0x3ad   :  { %v2253_v12 = vadd.f32 0.5, %v2169_v1 }
 0x3af   :  { %v2337_v51 = vmax.f32 %v2253_v12, 0.0  ;;  %v2636_v27 = vpop.permute.xlu1 %2635 }
 0x3b0   :  { %v2060_v37 = vpop.f32.mrf.mxu3  ;;  %v2781_v32 = vpop.permute.xlu0 %2780  ;;  %v2965_v2 = vmul.f32 %v2636_v27, %v2461_v36 }
 0x3b1   :  { %v2421_v28 = vmin.f32 %v2337_v51, 1.0  ;;  %v2061_v9 = vadd.f32 %v2060_v37, %v1842_v8  ;;  %v2994_v3 = vmul.f32 %v2781_v32, %v2490_v33  ;;  %v2493_v37 = vld [vmem:[%s6330_s0 + $0x1b0] sm:$0xff] }
 0x3b2   :  { %3050 = vst.msk [vmem:[%s6331_s6 + $0xb0] sm:$0xff] %vm3027_vm3, %v2965_v2 }
 0x3b3   :  { %v2170_v41 = vmul.f32 0.16666667, %v2061_v9  ;;  %v5941_v63 = vpop.f32.mrf.mxu2  ;;  %2855 = vperm.xlu0 %3901, %v2421_v28   ;;  %3079 = vst.msk [vmem:[%s6331_s6 + $0x198] sm:$0xff] %vm3027_vm3, %v2994_v3 }
 0x3b4   :  { %v1850_v27 = vadd.f32 %v5941_v63, %v1142_v5 }
 0x3b5   :  { %v2254_v45 = vadd.f32 0.5, %v2170_v41  ;;  %v2494_v41 = vld [vmem:[%s6330_s0 + $0x1b8] sm:$0xff] }
 0x3b7   :  { %v2338_v6 = vmax.f32 %v2254_v45, 0.0  ;;  %v2656_v52 = vpop.permute.xlu2 %2655  ;;  %v2786_v16 = vpop.permute.xlu1 %2785 }
 0x3b8   :  { %v2063_v42 = vpop.f32.mrf.mxu3  ;;  %v2995_v48 = vmul.f32 %v2786_v16, %v2491_v24  ;;  %v2969_v38 = vmul.f32 %v2656_v52, %v2465_v19  ;;  %v2466_v52 = vld [vmem:[%s6330_s0 + $0xd8] sm:$0xff] }
 0x3b9   :  { %v2422_v39 = vmin.f32 %v2338_v6, 1.0  ;;  %v2064_v53 = vadd.f32 %v2063_v42, %v1845_v34 }
 0x3ba   :  { %3080 = vst.msk [vmem:[%s6331_s6 + $0x1a0] sm:$0xff] %vm3027_vm3, %v2995_v48 }
 0x3bb   :  { %v2171_v46 = vmul.f32 0.16666667, %v2064_v53  ;;  %v1851_v62 = vpop.f32.mrf.mxu2  ;;  %2860 = vperm.xlu1 %3902, %v2422_v39   ;;  %3054 = vst.msk [vmem:[%s6331_s6 + $0xd0] sm:$0xff] %vm3027_vm3, %v2969_v38  ;;  %v2496_v38 = vld [vmem:[%s6330_s0 + $0x1c8] sm:$0xff] }
 0x3bc   :  { %v1852_v15 = vadd.f32 %v1851_v62, %v1143_v7 }
 0x3bd   :  { %v2255_v44 = vadd.f32 0.5, %v2171_v46  ;;  %v1145_v46 = vld [vmem:[%s6329_s5 + $0x248] sm:$0xff] }
 0x3bf   :  { %v2339_v57 = vmax.f32 %v2255_v44, 0.0  ;;  %v2646_v60 = vpop.permute.xlu0 %2645  ;;  %v2806_v1 = vpop.permute.xlu2 %2805 }
 0x3c0   :  { %v2065_v47 = vpop.f32.mrf.mxu3  ;;  %v2967_v12 = vmul.f32 %v2646_v60, %v2463_v10  ;;  %v2999_v14 = vmul.f32 %v2806_v1, %v2495_v13 }
 0x3c1   :  { %v2423_v51 = vmin.f32 %v2339_v57, 1.0  ;;  %v2066_v8 = vadd.f32 %v2065_v47, %v1847_v59  ;;  %v1146_v47 = vld [vmem:[%s6329_s5 + $0x250] sm:$0xff] }
 0x3c2   :  { %3052 = vst.msk [vmem:[%s6331_s6 + $0xc0] sm:$0xff] %vm3027_vm3, %v2967_v12 }
 0x3c3   :  { %v2172_v22 = vmul.f32 0.16666667, %v2066_v8  ;;  %v1854_v23 = vpop.f32.mrf.mxu2  ;;  %2865 = vperm.xlu2 %3903, %v2423_v51   ;;  %3084 = vst.msk [vmem:[%s6331_s6 + $0x1c0] sm:$0xff] %vm3027_vm3, %v2999_v14 }
 0x3c4   :  { %v1855_v32 = vadd.f32 %v1854_v23, %v1144_v54 }
 0x3c5   :  { %v2256_v26 = vadd.f32 0.5, %v2172_v22  ;;  %v2497_v22 = vld [vmem:[%s6330_s0 + $0x1d0] sm:$0xff] }
 0x3c7   :  { %v2340_v4 = vmax.f32 %v2256_v26, 0.0  ;;  %v2796_v20 = vpop.permute.xlu0 %2795 }
 0x3c8   :  { %v2068_v21 = vpop.f32.mrf.mxu3  ;;  %v2651_v56 = vpop.permute.xlu1 %2650  ;;  %v2997_v17 = vmul.f32 %v2796_v20, %v2493_v37 }
 0x3c9   :  { %v2424_v28 = vmin.f32 %v2340_v4, 1.0  ;;  %v2069_v9 = vadd.f32 %v2068_v21, %v1850_v27  ;;  %v2968_v31 = vmul.f32 %v2651_v56, %v2464_v25  ;;  %v2501_v21 = vld [vmem:[%s6330_s0 + $0x1f0] sm:$0xff]  ;;  %v1147_v56 = vld [vmem:[%s6329_s5 + $0x258] sm:$0xff] }
 0x3ca   :  { %3082 = vst.msk [vmem:[%s6331_s6 + $0x1b0] sm:$0xff] %vm3027_vm3, %v2997_v17 }
 0x3cb   :  { %v2173_v43 = vmul.f32 0.16666667, %v2069_v9  ;;  %v1856_v40 = vpop.f32.mrf.mxu2  ;;  %2870 = vperm.xlu0 %3901, %v2424_v28   ;;  %3053 = vst.msk [vmem:[%s6331_s6 + $0xc8] sm:$0xff] %vm3027_vm3, %v2968_v31 }
 0x3cc   :  { %v1857_v44 = vadd.f32 %v1856_v40, %v1145_v46 }
 0x3cd   :  { %v2257_v29 = vadd.f32 0.5, %v2173_v43 }
 0x3cf   :  { %v2341_v63 = vmax.f32 %v2257_v29, 0.0 }
 0x3d0   :  { %v2070_v11 = vpop.f32.mrf.mxu3  ;;  %v2801_v50 = vpop.permute.xlu1 %2800 }
 0x3d1   :  { %v2425_v45 = vmin.f32 %v2341_v63, 1.0  ;;  %v2071_v34 = vadd.f32 %v2070_v11, %v1852_v15  ;;  %v2998_v61 = vmul.f32 %v2801_v50, %v2494_v41  ;;  %v2671_v30 = vpop.permute.xlu2 %2670  ;;  %v1148_v63 = vld [vmem:[%s6329_s5 + $0x260] sm:$0xff] }
 0x3d2   :  { %v2972_v0 = vmul.f32 %v2671_v30, %v2468_v35  ;;  %v2499_v35 = vld [vmem:[%s6330_s0 + $0x1e0] sm:$0xff] }
 0x3d3   :  { %v2174_v6 = vmul.f32 0.16666667, %v2071_v34  ;;  %v1859_v55 = vpop.f32.mrf.mxu2  ;;  %2875 = vperm.xlu1 %3902, %v2425_v45   ;;  %3083 = vst.msk [vmem:[%s6331_s6 + $0x1b8] sm:$0xff] %vm3027_vm3, %v2998_v61 }
 0x3d4   :  { %3057 = vst.msk [vmem:[%s6331_s6 + $0xe8] sm:$0xff] %vm3027_vm3, %v2972_v0  ;;  %v1860_v8 = vadd.f32 %v1859_v55, %v1146_v47 }
 0x3d5   :  { %v2258_v36 = vadd.f32 0.5, %v2174_v6 }
 0x3d7   :  { %v2342_v42 = vmax.f32 %v2258_v36, 0.0  ;;  %v2500_v36 = vld [vmem:[%s6330_s0 + $0x1e8] sm:$0xff] }
 0x3d8   :  { %v2073_v33 = vpop.f32.mrf.mxu3  ;;  %v2661_v39 = vpop.permute.xlu0 %2660 }
 0x3d9   :  { %v2426_v53 = vmin.f32 %v2342_v42, 1.0  ;;  %v2074_v18 = vadd.f32 %v2073_v33, %v1855_v32  ;;  %v2970_v16 = vmul.f32 %v2661_v39, %v2466_v52  ;;  %v2821_v24 = vpop.permute.xlu2 %2820  ;;  %v1149_v32 = vld [vmem:[%s6329_s5 + $0x268] sm:$0xff] }
 0x3da   :  { %v3002_v2 = vmul.f32 %v2821_v24, %v2498_v49  ;;  %v1150_v24 = vld [vmem:[%s6329_s5 + $0x270] sm:$0xff] }
 0x3db   :  { %v2175_v19 = vmul.f32 0.16666667, %v2074_v18  ;;  %2880 = vperm.xlu2 %3903, %v2426_v53   ;;  %3055 = vst.msk [vmem:[%s6331_s6 + $0xd8] sm:$0xff] %vm3027_vm3, %v2970_v16  ;;  %v1861_v62 = vpop.f32.mrf.mxu2 }
 0x3dc   :  { %3087 = vst.msk [vmem:[%s6331_s6 + $0x1d8] sm:$0xff] %vm3027_vm3, %v3002_v2  ;;  %v1862_v43 = vadd.f32 %v1861_v62, %v1147_v56 }
 0x3dd   :  { %v2259_v3 = vadd.f32 0.5, %v2175_v19  ;;  %v2504_v19 = vld [vmem:[%s6330_s0 + $0x208] sm:$0xff] }
 0x3df   :  { %v2343_v48 = vmax.f32 %v2259_v3, 0.0  ;;  %v2666_v13 = vpop.permute.xlu1 %2665 }
 0x3e0   :  { %v2075_v10 = vpop.f32.mrf.mxu3  ;;  %v2971_v60 = vmul.f32 %v2666_v13, %v2467_v58  ;;  %v2811_v1 = vpop.permute.xlu0 %2810 }
 0x3e1   :  { %v2427_v57 = vmin.f32 %v2343_v48, 1.0  ;;  %v2076_v59 = vadd.f32 %v2075_v10, %v1857_v44  ;;  %v3000_v12 = vmul.f32 %v2811_v1, %v2496_v38 }
 0x3e2   :  { %3056 = vst.msk [vmem:[%s6331_s6 + $0xe0] sm:$0xff] %vm3027_vm3, %v2971_v60  ;;  %v1151_v60 = vld [vmem:[%s6329_s5 + $0x278] sm:$0xff] }
 0x3e3   :  { %v2176_v14 = vmul.f32 0.16666667, %v2076_v59  ;;  %2885 = vperm.xlu0 %3901, %v2427_v57   ;;  %3085 = vst.msk [vmem:[%s6331_s6 + $0x1c8] sm:$0xff] %vm3027_vm3, %v3000_v12  ;;  %v1864_v5 = vpop.f32.mrf.mxu2  ;;  %v2502_v59 = vld [vmem:[%s6330_s0 + $0x1f8] sm:$0xff] }
 0x3e4   :  { %v1865_v50 = vadd.f32 %v1864_v5, %v1148_v63 }
 0x3e5   :  { %v2260_v51 = vadd.f32 0.5, %v2176_v14 }
 0x3e7   :  { %v2344_v23 = vmax.f32 %v2260_v51, 0.0  ;;  %v2816_v27 = vpop.permute.xlu1 %2815 }
 0x3e8   :  { %v2078_v26 = vpop.f32.mrf.mxu3  ;;  %v3001_v4 = vmul.f32 %v2816_v27, %v2497_v22 }
 0x3e9   :  { %v2428_v37 = vmin.f32 %v2344_v23, 1.0  ;;  %v2079_v25 = vadd.f32 %v2078_v26, %v1860_v8  ;;  %v1152_v26 = vld [vmem:[%s6329_s5 + $0x280] sm:$0xff] }
 0x3ea   :  { %3086 = vst.msk [vmem:[%s6331_s6 + $0x1d0] sm:$0xff] %vm3027_vm3, %v3001_v4 }
 0x3eb   :  { %v2177_v20 = vmul.f32 0.16666667, %v2079_v25  ;;  %2890 = vperm.xlu1 %3902, %v2428_v37   ;;  %v1866_v7 = vpop.f32.mrf.mxu2  ;;  %v2503_v37 = vld [vmem:[%s6330_s0 + $0x200] sm:$0xff] }
 0x3ec   :  { %v1867_v39 = vadd.f32 %v1866_v7, %v1149_v32  ;;  %v1153_v7 = vld [vmem:[%s6329_s5 + $0x288] sm:$0xff] }
 0x3ed   :  { %v2261_v17 = vadd.f32 0.5, %v2177_v20  ;;  %v2836_v28 = vpop.permute.xlu2 %2835 }
 0x3ee   :  { %v3005_v9 = vmul.f32 %v2836_v28, %v2501_v21 }
 0x3ef   :  { %v2345_v31 = vmax.f32 %v2261_v17, 0.0 }
 0x3f0   :  { %v2080_v40 = vpop.f32.mrf.mxu3  ;;  %3090 = vst.msk [vmem:[%s6331_s6 + $0x1f0] sm:$0xff] %vm3027_vm3, %v3005_v9 }
 0x3f1   :  { %v2429_v29 = vmin.f32 %v2345_v31, 1.0  ;;  %v2081_v41 = vadd.f32 %v2080_v40, %v1862_v43  ;;  %v2507_v40 = vld [vmem:[%s6330_s0 + $0x220] sm:$0xff] }
 0x3f3   :  { %v2178_v15 = vmul.f32 0.16666667, %v2081_v41  ;;  %2895 = vperm.xlu2 %3903, %v2429_v29   ;;  %v1869_v6 = vpop.f32.mrf.mxu2 }
 0x3f4   :  { %v1870_v3 = vadd.f32 %v1869_v6, %v1150_v24 }
 0x3f5   :  { %v2262_v11 = vadd.f32 0.5, %v2178_v15  ;;  %v2826_v45 = vpop.permute.xlu0 %2825 }
 0x3f6   :  { %v3003_v34 = vmul.f32 %v2826_v45, %v2499_v35 }
 0x3f7   :  { %v2346_v61 = vmax.f32 %v2262_v11, 0.0 }
 0x3f8   :  { %v2083_v30 = vpop.f32.mrf.mxu3  ;;  %3088 = vst.msk [vmem:[%s6331_s6 + $0x1e0] sm:$0xff] %vm3027_vm3, %v3003_v34  ;;  %v1154_v34 = vld [vmem:[%s6329_s5 + $0x290] sm:$0xff] }
 0x3f9   :  { %v2430_v54 = vmin.f32 %v2346_v61, 1.0  ;;  %v2084_v0 = vadd.f32 %v2083_v30, %v1865_v50 }
 0x3fb   :  { %v2179_v55 = vmul.f32 0.16666667, %v2084_v0  ;;  %2900 = vperm.xlu0 %3901, %v2430_v54   ;;  %v1871_v46 = vpop.f32.mrf.mxu2  ;;  %v2505_v54 = vld [vmem:[%s6330_s0 + $0x210] sm:$0xff] }
 0x3fc   :  { %v1872_v8 = vadd.f32 %v1871_v46, %v1151_v60  ;;  %v2508_v60 = vld [vmem:[%s6330_s0 + $0x228] sm:$0xff] }
 0x3fd   :  { %v2263_v52 = vadd.f32 0.5, %v2179_v55  ;;  %v2831_v42 = vpop.permute.xlu1 %2830 }
 0x3fe   :  { %v3004_v49 = vmul.f32 %v2831_v42, %v2500_v36 }
 0x3ff   :  { %v2347_v33 = vmax.f32 %v2263_v52, 0.0 }
 0x400   :  { %v2085_v53 = vpop.f32.mrf.mxu3  ;;  %3089 = vst.msk [vmem:[%s6331_s6 + $0x1e8] sm:$0xff] %vm3027_vm3, %v3004_v49 }
 0x401   :  { %v2431_v18 = vmin.f32 %v2347_v33, 1.0  ;;  %v2086_v16 = vadd.f32 %v2085_v53, %v1867_v39  ;;  %v2506_v39 = vld [vmem:[%s6330_s0 + $0x218] sm:$0xff] }
 0x402   :  { %v1155_v53 = vld [vmem:[%s6329_s5 + $0x298] sm:$0xff] }
 0x403   :  { %v2180_v2 = vmul.f32 0.16666667, %v2086_v16  ;;  %2905 = vperm.xlu1 %3902, %v2431_v18   ;;  %v1874_v12 = vpop.f32.mrf.mxu2 }
 0x404   :  { %v1875_v4 = vadd.f32 %v1874_v12, %v1152_v26  ;;  %v2509_v12 = vld [vmem:[%s6330_s0 + $0x230] sm:$0xff] }
 0x405   :  { %v2264_v62 = vadd.f32 0.5, %v2180_v2  ;;  %v2851_v58 = vpop.permute.xlu2 %2850 }
 0x406   :  { %v3008_v48 = vmul.f32 %v2851_v58, %v2504_v19 }
 0x407   :  { %v2348_v44 = vmax.f32 %v2264_v62, 0.0 }
 0x408   :  { %v2088_v38 = vpop.f32.mrf.mxu3  ;;  %3093 = vst.msk [vmem:[%s6331_s6 + $0x208] sm:$0xff] %vm3027_vm3, %v3008_v48 }
 0x409   :  { %v2432_v10 = vmin.f32 %v2348_v44, 1.0  ;;  %v2089_v13 = vadd.f32 %v2088_v38, %v1870_v3  ;;  %v2510_v44 = vld [vmem:[%s6330_s0 + $0x238] sm:$0xff] }
 0x40b   :  { %v2181_v57 = vmul.f32 0.16666667, %v2089_v13  ;;  %2910 = vperm.xlu2 %3903, %v2432_v10   ;;  %v1876_v28 = vpop.f32.mrf.mxu2 }
 0x40c   :  { %v1877_v35 = vadd.f32 %v1876_v28, %v1153_v7  ;;  %v2519_v7 = vld [vmem:[%s6330_s0 + $0x280] sm:$0xff] }
 0x40d   :  { %v2265_v1 = vadd.f32 0.5, %v2181_v57  ;;  %v2841_v47 = vpop.permute.xlu0 %2840 }
 0x40e   :  { %v3006_v14 = vmul.f32 %v2841_v47, %v2502_v59 }
 0x40f   :  { %v2349_v51 = vmax.f32 %v2265_v1, 0.0 }
 0x410   :  { %v2090_v5 = vpop.f32.mrf.mxu3  ;;  %3091 = vst.msk [vmem:[%s6331_s6 + $0x1f8] sm:$0xff] %vm3027_vm3, %v3006_v14 }
 0x411   :  { %v2433_v22 = vmin.f32 %v2349_v51, 1.0  ;;  %v2091_v23 = vadd.f32 %v2090_v5, %v1872_v8  ;;  %v2513_v8 = vld [vmem:[%s6330_s0 + $0x250] sm:$0xff] }
 0x413   :  { %v2182_v27 = vmul.f32 0.16666667, %v2091_v23  ;;  %2915 = vperm.xlu0 %3901, %v2433_v22   ;;  %v1879_v61 = vpop.f32.mrf.mxu2  ;;  %v2511_v23 = vld [vmem:[%s6330_s0 + $0x240] sm:$0xff] }
 0x414   :  { %v1880_v6 = vadd.f32 %v1879_v61, %v1154_v34  ;;  %v2522_v34 = vld [vmem:[%s6330_s0 + $0x298] sm:$0xff] }
 0x415   :  { %v2266_v25 = vadd.f32 0.5, %v2182_v27  ;;  %v2846_v20 = vpop.permute.xlu1 %2845 }
 0x416   :  { %v3007_v21 = vmul.f32 %v2846_v20, %v2503_v37  ;;  %v2512_v37 = vld [vmem:[%s6330_s0 + $0x248] sm:$0xff] }
 0x417   :  { %v2350_v56 = vmax.f32 %v2266_v25, 0.0  ;;  %v2516_v20 = vld [vmem:[%s6330_s0 + $0x268] sm:$0xff] }
 0x418   :  { %v2093_v17 = vpop.f32.mrf.mxu3  ;;  %3092 = vst.msk [vmem:[%s6331_s6 + $0x200] sm:$0xff] %vm3027_vm3, %v3007_v21 }
 0x419   :  { %v2434_v9 = vmin.f32 %v2350_v56, 1.0  ;;  %v2094_v31 = vadd.f32 %v2093_v17, %v1875_v4  ;;  %v2514_v17 = vld [vmem:[%s6330_s0 + $0x258] sm:$0xff] }
 0x41b   :  { %v2183_v43 = vmul.f32 0.16666667, %v2094_v31  ;;  %2920 = vperm.xlu1 %3902, %v2434_v9   ;;  %v1881_v18 = vpop.f32.mrf.mxu2  ;;  %v2515_v31 = vld [vmem:[%s6330_s0 + $0x260] sm:$0xff] }
 0x41c   :  { %v1882_v46 = vadd.f32 %v1881_v18, %v1155_v53 }
 0x41d   :  { %v2267_v29 = vadd.f32 0.5, %v2183_v43  ;;  %v2866_v41 = vpop.permute.xlu2 %2865 }
 0x41e   :  { %v3011_v63 = vmul.f32 %v2866_v41, %v2507_v40 }
 0x41f   :  { %v2351_v15 = vmax.f32 %v2267_v29, 0.0 }
 0x420   :  { %v2095_v11 = vpop.f32.mrf.mxu3  ;;  %3096 = vst.msk [vmem:[%s6331_s6 + $0x220] sm:$0xff] %vm3027_vm3, %v3011_v63  ;;  %v2517_v63 = vld [vmem:[%s6330_s0 + $0x270] sm:$0xff] }
 0x421   :  { %v2435_v50 = vmin.f32 %v2351_v15, 1.0  ;;  %v2096_v45 = vadd.f32 %v2095_v11, %v1877_v35  ;;  %v2518_v11 = vld [vmem:[%s6330_s0 + $0x278] sm:$0xff] }
 0x423   :  { %v2184_v30 = vmul.f32 0.16666667, %v2096_v45  ;;  %2925 = vperm.xlu2 %3903, %v2435_v50  }
 0x425   :  { %v2268_v0 = vadd.f32 0.5, %v2184_v30  ;;  %v2856_v55 = vpop.permute.xlu0 %2855 }
 0x426   :  { %v3009_v36 = vmul.f32 %v2856_v55, %v2505_v54  ;;  %v2520_v54 = vld [vmem:[%s6330_s0 + $0x288] sm:$0xff]  ;;  %v2521_v55 = vld [vmem:[%s6330_s0 + $0x290] sm:$0xff] }
 0x427   :  { %v2352_v32 = vmax.f32 %v2268_v0, 0.0 }
 0x428   :  { %v2098_v52 = vpop.f32.mrf.mxu3  ;;  %3094 = vst.msk [vmem:[%s6331_s6 + $0x210] sm:$0xff] %vm3027_vm3, %v3009_v36 }
 0x429   :  { %v2436_v42 = vmin.f32 %v2352_v32, 1.0  ;;  %v2099_v49 = vadd.f32 %v2098_v52, %v1880_v6 }
 0x42b   :  { %v2185_v33 = vmul.f32 0.16666667, %v2099_v49  ;;  %2930 = vperm.xlu0 %3901, %v2436_v42  }
 0x42d   :  { %v2269_v16 = vadd.f32 0.5, %v2185_v33  ;;  %v2861_v24 = vpop.permute.xlu1 %2860 }
 0x42e   :  { %v3010_v2 = vmul.f32 %v2861_v24, %v2506_v39 }
 0x42f   :  { %v2353_v19 = vmax.f32 %v2269_v16, 0.0 }
 0x430   :  { %v2100_v62 = vpop.f32.mrf.mxu3  ;;  %3095 = vst.msk [vmem:[%s6331_s6 + $0x218] sm:$0xff] %vm3027_vm3, %v3010_v2 }
 0x431   :  { %v2437_v3 = vmin.f32 %v2353_v19, 1.0  ;;  %v2101_v58 = vadd.f32 %v2100_v62, %v1882_v46 }
 0x433   :  { %v2186_v48 = vmul.f32 0.16666667, %v2101_v58  ;;  %2935 = vperm.xlu1 %3902, %v2437_v3  }
 0x435   :  { %v2270_v38 = vadd.f32 0.5, %v2186_v48  ;;  %v2881_v10 = vpop.permute.xlu2 %2880 }
 0x436   :  { %v3014_v13 = vmul.f32 %v2881_v10, %v2510_v44 }
 0x437   :  { %v2354_v57 = vmax.f32 %v2270_v38, 0.0 }
 0x438   :  { %3099 = vst.msk [vmem:[%s6331_s6 + $0x238] sm:$0xff] %vm3027_vm3, %v3014_v13 }
 0x439   :  { %v2438_v59 = vmin.f32 %v2354_v57, 1.0 }
 0x43b   :  { %2940 = vperm.xlu2 %3903, %v2438_v59  }
 0x43d   :  { %v2871_v1 = vpop.permute.xlu0 %2870 }
 0x43e   :  { %v3012_v47 = vmul.f32 %v2871_v1, %v2508_v60 }
 0x440   :  { %3097 = vst.msk [vmem:[%s6331_s6 + $0x228] sm:$0xff] %vm3027_vm3, %v3012_v47 }
 0x445   :  { %v2876_v14 = vpop.permute.xlu1 %2875 }
 0x446   :  { %v3013_v51 = vmul.f32 %v2876_v14, %v2509_v12 }
 0x448   :  { %3098 = vst.msk [vmem:[%s6331_s6 + $0x230] sm:$0xff] %vm3027_vm3, %v3013_v51 }
 0x44d   :  { %v2896_v5 = vpop.permute.xlu2 %2895 }
 0x44e   :  { %v3017_v22 = vmul.f32 %v2896_v5, %v2513_v8 }
 0x450   :  { %3102 = vst.msk [vmem:[%s6331_s6 + $0x250] sm:$0xff] %vm3027_vm3, %v3017_v22 }
 0x455   :  { %v2886_v26 = vpop.permute.xlu0 %2885 }
 0x456   :  { %v3015_v27 = vmul.f32 %v2886_v26, %v2511_v23 }
 0x458   :  { %3100 = vst.msk [vmem:[%s6331_s6 + $0x240] sm:$0xff] %vm3027_vm3, %v3015_v27 }
 0x45d   :  { %v2891_v25 = vpop.permute.xlu1 %2890 }
 0x45e   :  { %v3016_v4 = vmul.f32 %v2891_v25, %v2512_v37 }
 0x460   :  { %3101 = vst.msk [vmem:[%s6331_s6 + $0x248] sm:$0xff] %vm3027_vm3, %v3016_v4 }
 0x465   :  { %v2911_v21 = vpop.permute.xlu2 %2910 }
 0x466   :  { %v3020_v56 = vmul.f32 %v2911_v21, %v2516_v20 }
 0x468   :  { %3105 = vst.msk [vmem:[%s6331_s6 + $0x268] sm:$0xff] %vm3027_vm3, %v3020_v56 }
 0x46d   :  { %v2901_v28 = vpop.permute.xlu0 %2900 }
 0x46e   :  { %v3018_v9 = vmul.f32 %v2901_v28, %v2514_v17 }
 0x470   :  { %3103 = vst.msk [vmem:[%s6331_s6 + $0x258] sm:$0xff] %vm3027_vm3, %v3018_v9 }
 0x475   :  { %v2906_v43 = vpop.permute.xlu1 %2905 }
 0x476   :  { %v3019_v40 = vmul.f32 %v2906_v43, %v2515_v31 }
 0x478   :  { %3104 = vst.msk [vmem:[%s6331_s6 + $0x260] sm:$0xff] %vm3027_vm3, %v3019_v40 }
 0x47d   :  { %v2926_v29 = vpop.permute.xlu2 %2925 }
 0x47e   :  { %v3023_v41 = vmul.f32 %v2926_v29, %v2519_v7 }
 0x480   :  { %3108 = vst.msk [vmem:[%s6331_s6 + $0x280] sm:$0xff] %vm3027_vm3, %v3023_v41 }
 0x485   :  { %v2916_v15 = vpop.permute.xlu0 %2915 }
 0x486   :  { %v3021_v35 = vmul.f32 %v2916_v15, %v2517_v63 }
 0x488   :  { %3106 = vst.msk [vmem:[%s6331_s6 + $0x270] sm:$0xff] %vm3027_vm3, %v3021_v35 }
 0x48d   :  { %v2921_v50 = vpop.permute.xlu1 %2920 }
 0x48e   :  { %v3022_v45 = vmul.f32 %v2921_v50, %v2518_v11 }
 0x490   :  { %3107 = vst.msk [vmem:[%s6331_s6 + $0x278] sm:$0xff] %vm3027_vm3, %v3022_v45 }
 0x495   :  { %v2941_v61 = vpop.permute.xlu2 %2940 }
 0x496   :  { %v3026_v30 = vmul.f32 %v2941_v61, %v2522_v34 }
 0x498   :  { %3111 = vst.msk [vmem:[%s6331_s6 + $0x298] sm:$0xff] %vm3027_vm3, %v3026_v30 }
 0x49d   :  { %v2931_v0 = vpop.permute.xlu0 %2930 }
 0x49e   :  { %v3024_v6 = vmul.f32 %v2931_v0, %v2520_v54 }
 0x4a0   :  { %3109 = vst.msk [vmem:[%s6331_s6 + $0x288] sm:$0xff] %vm3027_vm3, %v3024_v6 }
 0x4a5   :  { %v2936_v36 = vpop.permute.xlu1 %2935 }
 0x4a6   :  { %v3025_v32 = vmul.f32 %v2936_v36, %v2521_v55 }
 0x4a8   :  { %3110 = vst.msk [vmem:[%s6331_s6 + $0x290] sm:$0xff] %vm3027_vm3, %v3025_v32 }

</bundles_post_ra>
